<compile_context>
chip_gen: v6e
topology: v6e:2x2x1
jax: 0.10.0
libtpu: 0.0.40
codegen_flags: <defaults>
</compile_context>

<pallas_src>
import functools

import jax
import jax.numpy as jnp
from jax import lax
from jax.experimental import pallas as pl
from jax.experimental.pallas import tpu as pltpu


def rcab_kernel(x_ref, w1_ref, b1_ref, w2_ref, b2_ref,
                wf1_ref, bf1_ref, wf2_ref, bf2_ref, o_ref, *, H, W):
    # x_ref: (1, H*W, C) f32     w1_ref/w2_ref: (9*C, C) bf16
    # b*_ref: (1, C) f32         wf1: (C, Cr)  wf2: (Cr, C)  (f32)
    HW, C = x_ref.shape[1], x_ref.shape[2]
    x = x_ref[0]                                        # (H*W, C) f32

    # Precompute the 8 off-center tap shifts + validity masks once (shared by
    # both convs). Pixel (h, w) lives at flat row m = h*W + w; its neighbour
    # (h+dy, w+dx) is a roll of the flat slab by dy*W + dx rows, masked to
    # zero where the neighbour falls outside the image (SAME zero padding).
    h_ids = lax.broadcasted_iota(jnp.int32, (H, W, C), 0).reshape(HW, C)
    w_ids = lax.broadcasted_iota(jnp.int32, (H, W, C), 1).reshape(HW, C)
    taps = []
    for dy in (-1, 0, 1):           # tap order matches w.reshape(9*C, C)
        for dx in (-1, 0, 1):
            if dy == 0 and dx == 0:
                taps.append((0, None))
            else:
                valid = ((h_ids + dy >= 0) & (h_ids + dy < H) &
                         (w_ids + dx >= 0) & (w_ids + dx < W))
                taps.append(((-(dy * W + dx)) % HW, valid))

    def im2col_bf16(img):           # (H*W, C) f32 -> (H*W, 9C) bf16
        cols = [img if mask is None
                else jnp.where(mask, pltpu.roll(img, shift=shift, axis=0), 0.0)
                for shift, mask in taps]
        return jnp.concatenate(cols, axis=-1).astype(jnp.bfloat16)

    # ---- conv1 (3x3, SAME) + bias + ReLU : single MXU matmul, f32 accum ----
    r1 = jnp.dot(im2col_bf16(x), w1_ref[...],
                 preferred_element_type=jnp.float32)
    r1 = jnp.maximum(r1 + b1_ref[...], 0.0)             # (H*W, C) f32

    # ---- conv2 (3x3, SAME) + bias ----
    r2 = jnp.dot(im2col_bf16(r1), w2_ref[...],
                 preferred_element_type=jnp.float32) + b2_ref[...]

    # ---- channel attention (CALayer): avgpool -> fc -> ReLU -> fc -> sigmoid ----
    pooled = jnp.mean(r2, axis=0, keepdims=True)        # (1, C)
    h = jnp.maximum(jnp.dot(pooled, wf1_ref[...],
                            preferred_element_type=jnp.float32) + bf1_ref[...],
                    0.0)                                 # (1, Cr)
    y = jax.nn.sigmoid(jnp.dot(h, wf2_ref[...],
                               preferred_element_type=jnp.float32) + bf2_ref[...])

    # ---- gate + residual add (x block is unpadded and tile-aligned) ----
    o_ref[0] = (r2 * y + x).astype(o_ref.dtype)


def rcab_forward(x, params):
    N, H, W, C = x.shape
    Cr = params['wf1'].shape[1]
    HW = H * W

    # Reshape / cast weights once in the wrapper (not in the kernel).
    w1 = params['w1'].reshape(9 * C, C).astype(jnp.bfloat16)   # (ky,kx,cin,cout)->(9C,C)
    w2 = params['w2'].reshape(9 * C, C).astype(jnp.bfloat16)
    b1 = params['b1'].reshape(1, C)
    b2 = params['b2'].reshape(1, C)
    wf1 = params['wf1']
    bf1 = params['bf1'].reshape(1, Cr)
    wf2 = params['wf2']
    bf2 = params['bf2'].reshape(1, C)

    x_flat = x.reshape(N, HW, C)   # free reshape: pixels on sublanes, channels on lanes

    def full_spec(shape):
        return pl.BlockSpec(shape, lambda n, _nd=len(shape): (0,) * _nd)

    grid_spec = pltpu.PrefetchScalarGridSpec(
        num_scalar_prefetch=0,
        grid=(N,),
        in_specs=[
            pl.BlockSpec((1, HW, C), lambda n: (n, 0, 0)),      # x slab
            full_spec((9 * C, C)),                              # w1 (bf16)
            full_spec((1, C)),                                  # b1
            full_spec((9 * C, C)),                              # w2 (bf16)
            full_spec((1, C)),                                  # b2
            full_spec((C, Cr)),                                 # fc1 w
            full_spec((1, Cr)),                                 # fc1 b
            full_spec((Cr, C)),                                 # fc2 w
            full_spec((1, C)),                                  # fc2 b
        ],
        out_specs=pl.BlockSpec((1, HW, C), lambda n: (n, 0, 0)),
    )

    # TODO(synk): for large H*W*C that no longer fits v7x's 64 MiB VMEM, switch
    # to row-band spatial tiling (grid=(N, H//band)) with a 1-row halo.
    out_flat = pl.pallas_call(
        functools.partial(rcab_kernel, H=H, W=W),
        out_shape=jax.ShapeDtypeStruct((N, HW, C), x.dtype),
        grid_spec=grid_spec,
        compiler_params=pltpu.CompilerParams(
            dimension_semantics=("parallel",),
            vmem_limit_bytes=32 * 1024 * 1024),
    )(x_flat, w1, b1, w2, b2, wf1, bf1, wf2, bf2)

    return out_flat.reshape(N, H, W, C)


def ref_forward(x, params):
    # Pure-JAX (f32) reference mirroring the PyTorch RCABlock forward.
    dn = ('NHWC', 'HWIO', 'NHWC')
    r = lax.conv_general_dilated(x, params['w1'], (1, 1), 'SAME',
                                 dimension_numbers=dn) + params['b1']
    r = jnp.maximum(r, 0.0)
    r = lax.conv_general_dilated(r, params['w2'], (1, 1), 'SAME',
                                 dimension_numbers=dn) + params['b2']
    y = jnp.mean(r, axis=(1, 2))                                  # (N, C)
    y = jnp.maximum(y @ params['wf1'] + params['bf1'], 0.0)
    y = jax.nn.sigmoid(y @ params['wf2'] + params['bf2'])
    return r * y[:, None, None, :] + x


def init_params(key, C, reduction):
    Cr = C // reduction
    ks = jax.random.split(key, 8)
    scale = 0.1
    return {
        'w1':  scale * jax.random.normal(ks[0], (3, 3, C, C), jnp.float32),
        'b1':  scale * jax.random.normal(ks[1], (C,), jnp.float32),
        'w2':  scale * jax.random.normal(ks[2], (3, 3, C, C), jnp.float32),
        'b2':  scale * jax.random.normal(ks[3], (C,), jnp.float32),
        'wf1': scale * jax.random.normal(ks[4], (C, Cr), jnp.float32),
        'bf1': scale * jax.random.normal(ks[5], (Cr,), jnp.float32),
        'wf2': scale * jax.random.normal(ks[6], (Cr, C), jnp.float32),
        'bf2': scale * jax.random.normal(ks[7], (C,), jnp.float32),
    }


if __name__ == "__main__":
    # Small shapes consistent with the module: in_channels == out_channels,
    # reduction chosen so C // reduction >= 1.
    N, H, W, C = 2, 16, 16, 16
    reduction = 4

    key = jax.random.PRNGKey(0)
    kx, kp = jax.random.split(key)
    x = jax.random.normal(kx, (N, H, W, C), jnp.float32)
    params = init_params(kp, C, reduction)

    out = jax.block_until_ready(rcab_forward(x, params))
    ref = jax.block_until_ready(ref_forward(x, params))

    assert out.shape == (N, H, W, C)
    max_err = float(jnp.max(jnp.abs(out - ref)))
    # bf16 MXU inputs with f32 accumulation -> loosen the f32 tolerance.
    assert jnp.allclose(out, ref, atol=5e-2, rtol=5e-2), max_err

    print("KERNEL_OK")
</pallas_src>

<mosaic_0001>
module attributes {stable_mosaic.version = 11 : i64} {
  func.func @rcab_kernel(%arg0: i32, %arg1: memref<1x256x16xf32, #tpu.memory_space<vmem>>, %arg2: memref<144x16xbf16, #tpu.memory_space<vmem>>, %arg3: memref<1x16xf32, #tpu.memory_space<vmem>>, %arg4: memref<144x16xbf16, #tpu.memory_space<vmem>>, %arg5: memref<1x16xf32, #tpu.memory_space<vmem>>, %arg6: memref<16x4xf32, #tpu.memory_space<vmem>>, %arg7: memref<1x4xf32, #tpu.memory_space<vmem>>, %arg8: memref<4x16xf32, #tpu.memory_space<vmem>>, %arg9: memref<1x16xf32, #tpu.memory_space<vmem>>, %arg10: memref<1x256x16xf32, #tpu.memory_space<vmem>>) attributes {dimension_semantics = [#tpu.dimension_semantics<parallel>], iteration_bounds = array<i64: 2>, scalar_prefetch = 0 : i64, scratch_operands = 0 : i64, tpu.core_type = #tpu.core_type<tc>, window_params = [{transform_indices = @transform_0, window_bounds = array<i64: 1, 256, 16>}, {pipeline_mode = #tpu.pipeline_mode<synchronous>, transform_indices = @transform_1, window_bounds = array<i64: 144, 16>}, {pipeline_mode = #tpu.pipeline_mode<synchronous>, transform_indices = @transform_2, window_bounds = array<i64: 1, 16>}, {pipeline_mode = #tpu.pipeline_mode<synchronous>, transform_indices = @transform_3, window_bounds = array<i64: 144, 16>}, {pipeline_mode = #tpu.pipeline_mode<synchronous>, transform_indices = @transform_4, window_bounds = array<i64: 1, 16>}, {pipeline_mode = #tpu.pipeline_mode<synchronous>, transform_indices = @transform_5, window_bounds = array<i64: 16, 4>}, {pipeline_mode = #tpu.pipeline_mode<synchronous>, transform_indices = @transform_6, window_bounds = array<i64: 1, 4>}, {pipeline_mode = #tpu.pipeline_mode<synchronous>, transform_indices = @transform_7, window_bounds = array<i64: 4, 16>}, {pipeline_mode = #tpu.pipeline_mode<synchronous>, transform_indices = @transform_8, window_bounds = array<i64: 1, 16>}, {transform_indices = @transform_9, window_bounds = array<i64: 1, 256, 16>}]} {
    %c0 = arith.constant 0 : index
    %c0_0 = arith.constant 0 : index
    %c0_1 = arith.constant 0 : index
    %0 = vector.load %arg1[%c0, %c0_0, %c0_1] : memref<1x256x16xf32, #tpu.memory_space<vmem>>, vector<1x256x16xf32>
    %1 = vector.shape_cast %0 : vector<1x256x16xf32> to vector<256x16xf32>
    %2 = tpu.iota {dimensions = array<i32: 0>} : vector<16x16x16xi32>
    %3 = vector.shape_cast %2 : vector<16x16x16xi32> to vector<256x16xi32>
    %4 = tpu.iota {dimensions = array<i32: 1>} : vector<16x16x16xi32>
    %5 = vector.shape_cast %4 : vector<16x16x16xi32> to vector<256x16xi32>
    %c-1_i32 = arith.constant -1 : i32
    %6 = vector.broadcast %c-1_i32 : i32 to vector<256x16xi32>
    %7 = arith.addi %3, %6 : vector<256x16xi32>
    %c0_i32 = arith.constant 0 : i32
    %8 = vector.broadcast %c0_i32 : i32 to vector<256x16xi32>
    %9 = arith.cmpi sge, %7, %8 : vector<256x16xi32>
    %c-1_i32_2 = arith.constant -1 : i32
    %10 = vector.broadcast %c-1_i32_2 : i32 to vector<256x16xi32>
    %11 = arith.addi %3, %10 : vector<256x16xi32>
    %c16_i32 = arith.constant 16 : i32
    %12 = vector.broadcast %c16_i32 : i32 to vector<256x16xi32>
    %13 = arith.cmpi slt, %11, %12 : vector<256x16xi32>
    %14 = arith.andi %9, %13 : vector<256x16xi1>
    %c-1_i32_3 = arith.constant -1 : i32
    %15 = vector.broadcast %c-1_i32_3 : i32 to vector<256x16xi32>
    %16 = arith.addi %5, %15 : vector<256x16xi32>
    %c0_i32_4 = arith.constant 0 : i32
    %17 = vector.broadcast %c0_i32_4 : i32 to vector<256x16xi32>
    %18 = arith.cmpi sge, %16, %17 : vector<256x16xi32>
    %19 = arith.andi %14, %18 : vector<256x16xi1>
    %c-1_i32_5 = arith.constant -1 : i32
    %20 = vector.broadcast %c-1_i32_5 : i32 to vector<256x16xi32>
    %21 = arith.addi %5, %20 : vector<256x16xi32>
    %c16_i32_6 = arith.constant 16 : i32
    %22 = vector.broadcast %c16_i32_6 : i32 to vector<256x16xi32>
    %23 = arith.cmpi slt, %21, %22 : vector<256x16xi32>
    %24 = arith.andi %19, %23 : vector<256x16xi1>
    %c-1_i32_7 = arith.constant -1 : i32
    %25 = vector.broadcast %c-1_i32_7 : i32 to vector<256x16xi32>
    %26 = arith.addi %3, %25 : vector<256x16xi32>
    %c0_i32_8 = arith.constant 0 : i32
    %27 = vector.broadcast %c0_i32_8 : i32 to vector<256x16xi32>
    %28 = arith.cmpi sge, %26, %27 : vector<256x16xi32>
    %c-1_i32_9 = arith.constant -1 : i32
    %29 = vector.broadcast %c-1_i32_9 : i32 to vector<256x16xi32>
    %30 = arith.addi %3, %29 : vector<256x16xi32>
    %c16_i32_10 = arith.constant 16 : i32
    %31 = vector.broadcast %c16_i32_10 : i32 to vector<256x16xi32>
    %32 = arith.cmpi slt, %30, %31 : vector<256x16xi32>
    %33 = arith.andi %28, %32 : vector<256x16xi1>
    %c0_i32_11 = arith.constant 0 : i32
    %34 = vector.broadcast %c0_i32_11 : i32 to vector<256x16xi32>
    %35 = arith.addi %5, %34 : vector<256x16xi32>
    %c0_i32_12 = arith.constant 0 : i32
    %36 = vector.broadcast %c0_i32_12 : i32 to vector<256x16xi32>
    %37 = arith.cmpi sge, %35, %36 : vector<256x16xi32>
    %38 = arith.andi %33, %37 : vector<256x16xi1>
    %c0_i32_13 = arith.constant 0 : i32
    %39 = vector.broadcast %c0_i32_13 : i32 to vector<256x16xi32>
    %40 = arith.addi %5, %39 : vector<256x16xi32>
    %c16_i32_14 = arith.constant 16 : i32
    %41 = vector.broadcast %c16_i32_14 : i32 to vector<256x16xi32>
    %42 = arith.cmpi slt, %40, %41 : vector<256x16xi32>
    %43 = arith.andi %38, %42 : vector<256x16xi1>
    %c-1_i32_15 = arith.constant -1 : i32
    %44 = vector.broadcast %c-1_i32_15 : i32 to vector<256x16xi32>
    %45 = arith.addi %3, %44 : vector<256x16xi32>
    %c0_i32_16 = arith.constant 0 : i32
    %46 = vector.broadcast %c0_i32_16 : i32 to vector<256x16xi32>
    %47 = arith.cmpi sge, %45, %46 : vector<256x16xi32>
    %c-1_i32_17 = arith.constant -1 : i32
    %48 = vector.broadcast %c-1_i32_17 : i32 to vector<256x16xi32>
    %49 = arith.addi %3, %48 : vector<256x16xi32>
    %c16_i32_18 = arith.constant 16 : i32
    %50 = vector.broadcast %c16_i32_18 : i32 to vector<256x16xi32>
    %51 = arith.cmpi slt, %49, %50 : vector<256x16xi32>
    %52 = arith.andi %47, %51 : vector<256x16xi1>
    %c1_i32 = arith.constant 1 : i32
    %53 = vector.broadcast %c1_i32 : i32 to vector<256x16xi32>
    %54 = arith.addi %5, %53 : vector<256x16xi32>
    %c0_i32_19 = arith.constant 0 : i32
    %55 = vector.broadcast %c0_i32_19 : i32 to vector<256x16xi32>
    %56 = arith.cmpi sge, %54, %55 : vector<256x16xi32>
    %57 = arith.andi %52, %56 : vector<256x16xi1>
    %c1_i32_20 = arith.constant 1 : i32
    %58 = vector.broadcast %c1_i32_20 : i32 to vector<256x16xi32>
    %59 = arith.addi %5, %58 : vector<256x16xi32>
    %c16_i32_21 = arith.constant 16 : i32
    %60 = vector.broadcast %c16_i32_21 : i32 to vector<256x16xi32>
    %61 = arith.cmpi slt, %59, %60 : vector<256x16xi32>
    %62 = arith.andi %57, %61 : vector<256x16xi1>
    %c0_i32_22 = arith.constant 0 : i32
    %63 = vector.broadcast %c0_i32_22 : i32 to vector<256x16xi32>
    %64 = arith.addi %3, %63 : vector<256x16xi32>
    %c0_i32_23 = arith.constant 0 : i32
    %65 = vector.broadcast %c0_i32_23 : i32 to vector<256x16xi32>
    %66 = arith.cmpi sge, %64, %65 : vector<256x16xi32>
    %c0_i32_24 = arith.constant 0 : i32
    %67 = vector.broadcast %c0_i32_24 : i32 to vector<256x16xi32>
    %68 = arith.addi %3, %67 : vector<256x16xi32>
    %c16_i32_25 = arith.constant 16 : i32
    %69 = vector.broadcast %c16_i32_25 : i32 to vector<256x16xi32>
    %70 = arith.cmpi slt, %68, %69 : vector<256x16xi32>
    %71 = arith.andi %66, %70 : vector<256x16xi1>
    %c-1_i32_26 = arith.constant -1 : i32
    %72 = vector.broadcast %c-1_i32_26 : i32 to vector<256x16xi32>
    %73 = arith.addi %5, %72 : vector<256x16xi32>
    %c0_i32_27 = arith.constant 0 : i32
    %74 = vector.broadcast %c0_i32_27 : i32 to vector<256x16xi32>
    %75 = arith.cmpi sge, %73, %74 : vector<256x16xi32>
    %76 = arith.andi %71, %75 : vector<256x16xi1>
    %c-1_i32_28 = arith.constant -1 : i32
    %77 = vector.broadcast %c-1_i32_28 : i32 to vector<256x16xi32>
    %78 = arith.addi %5, %77 : vector<256x16xi32>
    %c16_i32_29 = arith.constant 16 : i32
    %79 = vector.broadcast %c16_i32_29 : i32 to vector<256x16xi32>
    %80 = arith.cmpi slt, %78, %79 : vector<256x16xi32>
    %81 = arith.andi %76, %80 : vector<256x16xi1>
    %c0_i32_30 = arith.constant 0 : i32
    %82 = vector.broadcast %c0_i32_30 : i32 to vector<256x16xi32>
    %83 = arith.addi %3, %82 : vector<256x16xi32>
    %c0_i32_31 = arith.constant 0 : i32
    %84 = vector.broadcast %c0_i32_31 : i32 to vector<256x16xi32>
    %85 = arith.cmpi sge, %83, %84 : vector<256x16xi32>
    %c0_i32_32 = arith.constant 0 : i32
    %86 = vector.broadcast %c0_i32_32 : i32 to vector<256x16xi32>
    %87 = arith.addi %3, %86 : vector<256x16xi32>
    %c16_i32_33 = arith.constant 16 : i32
    %88 = vector.broadcast %c16_i32_33 : i32 to vector<256x16xi32>
    %89 = arith.cmpi slt, %87, %88 : vector<256x16xi32>
    %90 = arith.andi %85, %89 : vector<256x16xi1>
    %c1_i32_34 = arith.constant 1 : i32
    %91 = vector.broadcast %c1_i32_34 : i32 to vector<256x16xi32>
    %92 = arith.addi %5, %91 : vector<256x16xi32>
    %c0_i32_35 = arith.constant 0 : i32
    %93 = vector.broadcast %c0_i32_35 : i32 to vector<256x16xi32>
    %94 = arith.cmpi sge, %92, %93 : vector<256x16xi32>
    %95 = arith.andi %90, %94 : vector<256x16xi1>
    %c1_i32_36 = arith.constant 1 : i32
    %96 = vector.broadcast %c1_i32_36 : i32 to vector<256x16xi32>
    %97 = arith.addi %5, %96 : vector<256x16xi32>
    %c16_i32_37 = arith.constant 16 : i32
    %98 = vector.broadcast %c16_i32_37 : i32 to vector<256x16xi32>
    %99 = arith.cmpi slt, %97, %98 : vector<256x16xi32>
    %100 = arith.andi %95, %99 : vector<256x16xi1>
    %c1_i32_38 = arith.constant 1 : i32
    %101 = vector.broadcast %c1_i32_38 : i32 to vector<256x16xi32>
    %102 = arith.addi %3, %101 : vector<256x16xi32>
    %c0_i32_39 = arith.constant 0 : i32
    %103 = vector.broadcast %c0_i32_39 : i32 to vector<256x16xi32>
    %104 = arith.cmpi sge, %102, %103 : vector<256x16xi32>
    %c1_i32_40 = arith.constant 1 : i32
    %105 = vector.broadcast %c1_i32_40 : i32 to vector<256x16xi32>
    %106 = arith.addi %3, %105 : vector<256x16xi32>
    %c16_i32_41 = arith.constant 16 : i32
    %107 = vector.broadcast %c16_i32_41 : i32 to vector<256x16xi32>
    %108 = arith.cmpi slt, %106, %107 : vector<256x16xi32>
    %109 = arith.andi %104, %108 : vector<256x16xi1>
    %c-1_i32_42 = arith.constant -1 : i32
    %110 = vector.broadcast %c-1_i32_42 : i32 to vector<256x16xi32>
    %111 = arith.addi %5, %110 : vector<256x16xi32>
    %c0_i32_43 = arith.constant 0 : i32
    %112 = vector.broadcast %c0_i32_43 : i32 to vector<256x16xi32>
    %113 = arith.cmpi sge, %111, %112 : vector<256x16xi32>
    %114 = arith.andi %109, %113 : vector<256x16xi1>
    %c-1_i32_44 = arith.constant -1 : i32
    %115 = vector.broadcast %c-1_i32_44 : i32 to vector<256x16xi32>
    %116 = arith.addi %5, %115 : vector<256x16xi32>
    %c16_i32_45 = arith.constant 16 : i32
    %117 = vector.broadcast %c16_i32_45 : i32 to vector<256x16xi32>
    %118 = arith.cmpi slt, %116, %117 : vector<256x16xi32>
    %119 = arith.andi %114, %118 : vector<256x16xi1>
    %c1_i32_46 = arith.constant 1 : i32
    %120 = vector.broadcast %c1_i32_46 : i32 to vector<256x16xi32>
    %121 = arith.addi %3, %120 : vector<256x16xi32>
    %c0_i32_47 = arith.constant 0 : i32
    %122 = vector.broadcast %c0_i32_47 : i32 to vector<256x16xi32>
    %123 = arith.cmpi sge, %121, %122 : vector<256x16xi32>
    %c1_i32_48 = arith.constant 1 : i32
    %124 = vector.broadcast %c1_i32_48 : i32 to vector<256x16xi32>
    %125 = arith.addi %3, %124 : vector<256x16xi32>
    %c16_i32_49 = arith.constant 16 : i32
    %126 = vector.broadcast %c16_i32_49 : i32 to vector<256x16xi32>
    %127 = arith.cmpi slt, %125, %126 : vector<256x16xi32>
    %128 = arith.andi %123, %127 : vector<256x16xi1>
    %c0_i32_50 = arith.constant 0 : i32
    %129 = vector.broadcast %c0_i32_50 : i32 to vector<256x16xi32>
    %130 = arith.addi %5, %129 : vector<256x16xi32>
    %c0_i32_51 = arith.constant 0 : i32
    %131 = vector.broadcast %c0_i32_51 : i32 to vector<256x16xi32>
    %132 = arith.cmpi sge, %130, %131 : vector<256x16xi32>
    %133 = arith.andi %128, %132 : vector<256x16xi1>
    %c0_i32_52 = arith.constant 0 : i32
    %134 = vector.broadcast %c0_i32_52 : i32 to vector<256x16xi32>
    %135 = arith.addi %5, %134 : vector<256x16xi32>
    %c16_i32_53 = arith.constant 16 : i32
    %136 = vector.broadcast %c16_i32_53 : i32 to vector<256x16xi32>
    %137 = arith.cmpi slt, %135, %136 : vector<256x16xi32>
    %138 = arith.andi %133, %137 : vector<256x16xi1>
    %c1_i32_54 = arith.constant 1 : i32
    %139 = vector.broadcast %c1_i32_54 : i32 to vector<256x16xi32>
    %140 = arith.addi %3, %139 : vector<256x16xi32>
    %c0_i32_55 = arith.constant 0 : i32
    %141 = vector.broadcast %c0_i32_55 : i32 to vector<256x16xi32>
    %142 = arith.cmpi sge, %140, %141 : vector<256x16xi32>
    %c1_i32_56 = arith.constant 1 : i32
    %143 = vector.broadcast %c1_i32_56 : i32 to vector<256x16xi32>
    %144 = arith.addi %3, %143 : vector<256x16xi32>
    %c16_i32_57 = arith.constant 16 : i32
    %145 = vector.broadcast %c16_i32_57 : i32 to vector<256x16xi32>
    %146 = arith.cmpi slt, %144, %145 : vector<256x16xi32>
    %147 = arith.andi %142, %146 : vector<256x16xi1>
    %c1_i32_58 = arith.constant 1 : i32
    %148 = vector.broadcast %c1_i32_58 : i32 to vector<256x16xi32>
    %149 = arith.addi %5, %148 : vector<256x16xi32>
    %c0_i32_59 = arith.constant 0 : i32
    %150 = vector.broadcast %c0_i32_59 : i32 to vector<256x16xi32>
    %151 = arith.cmpi sge, %149, %150 : vector<256x16xi32>
    %152 = arith.andi %147, %151 : vector<256x16xi1>
    %c1_i32_60 = arith.constant 1 : i32
    %153 = vector.broadcast %c1_i32_60 : i32 to vector<256x16xi32>
    %154 = arith.addi %5, %153 : vector<256x16xi32>
    %c16_i32_61 = arith.constant 16 : i32
    %155 = vector.broadcast %c16_i32_61 : i32 to vector<256x16xi32>
    %156 = arith.cmpi slt, %154, %155 : vector<256x16xi32>
    %157 = arith.andi %152, %156 : vector<256x16xi1>
    %c17_i32 = arith.constant 17 : i32
    %158 = tpu.dynamic_rotate %1 by %c17_i32 dim 0 : vector<256x16xf32>, i32 -> vector<256x16xf32>
    %cst = arith.constant 0.000000e+00 : f32
    %159 = vector.broadcast %cst : f32 to vector<256x16xf32>
    %160 = arith.select %24, %158, %159 : vector<256x16xi1>, vector<256x16xf32>
    %c16_i32_62 = arith.constant 16 : i32
    %161 = tpu.dynamic_rotate %1 by %c16_i32_62 dim 0 : vector<256x16xf32>, i32 -> vector<256x16xf32>
    %cst_63 = arith.constant 0.000000e+00 : f32
    %162 = vector.broadcast %cst_63 : f32 to vector<256x16xf32>
    %163 = arith.select %43, %161, %162 : vector<256x16xi1>, vector<256x16xf32>
    %c15_i32 = arith.constant 15 : i32
    %164 = tpu.dynamic_rotate %1 by %c15_i32 dim 0 : vector<256x16xf32>, i32 -> vector<256x16xf32>
    %cst_64 = arith.constant 0.000000e+00 : f32
    %165 = vector.broadcast %cst_64 : f32 to vector<256x16xf32>
    %166 = arith.select %62, %164, %165 : vector<256x16xi1>, vector<256x16xf32>
    %c1_i32_65 = arith.constant 1 : i32
    %167 = tpu.dynamic_rotate %1 by %c1_i32_65 dim 0 : vector<256x16xf32>, i32 -> vector<256x16xf32>
    %cst_66 = arith.constant 0.000000e+00 : f32
    %168 = vector.broadcast %cst_66 : f32 to vector<256x16xf32>
    %169 = arith.select %81, %167, %168 : vector<256x16xi1>, vector<256x16xf32>
    %c255_i32 = arith.constant 255 : i32
    %170 = tpu.dynamic_rotate %1 by %c255_i32 dim 0 : vector<256x16xf32>, i32 -> vector<256x16xf32>
    %cst_67 = arith.constant 0.000000e+00 : f32
    %171 = vector.broadcast %cst_67 : f32 to vector<256x16xf32>
    %172 = arith.select %100, %170, %171 : vector<256x16xi1>, vector<256x16xf32>
    %c241_i32 = arith.constant 241 : i32
    %173 = tpu.dynamic_rotate %1 by %c241_i32 dim 0 : vector<256x16xf32>, i32 -> vector<256x16xf32>
    %cst_68 = arith.constant 0.000000e+00 : f32
    %174 = vector.broadcast %cst_68 : f32 to vector<256x16xf32>
    %175 = arith.select %119, %173, %174 : vector<256x16xi1>, vector<256x16xf32>
    %c240_i32 = arith.constant 240 : i32
    %176 = tpu.dynamic_rotate %1 by %c240_i32 dim 0 : vector<256x16xf32>, i32 -> vector<256x16xf32>
    %cst_69 = arith.constant 0.000000e+00 : f32
    %177 = vector.broadcast %cst_69 : f32 to vector<256x16xf32>
    %178 = arith.select %138, %176, %177 : vector<256x16xi1>, vector<256x16xf32>
    %c239_i32 = arith.constant 239 : i32
    %179 = tpu.dynamic_rotate %1 by %c239_i32 dim 0 : vector<256x16xf32>, i32 -> vector<256x16xf32>
    %cst_70 = arith.constant 0.000000e+00 : f32
    %180 = vector.broadcast %cst_70 : f32 to vector<256x16xf32>
    %181 = arith.select %157, %179, %180 : vector<256x16xi1>, vector<256x16xf32>
    %182 = tpu.concatenate %160, %163, %166, %169, %1, %172, %175, %178, %181 in 1 : vector<256x16xf32>, vector<256x16xf32>, vector<256x16xf32>, vector<256x16xf32>, vector<256x16xf32>, vector<256x16xf32>, vector<256x16xf32>, vector<256x16xf32>, vector<256x16xf32> -> vector<256x144xf32>
    %183 = arith.truncf %182 : vector<256x144xf32> to vector<256x144xbf16>
    %c0_71 = arith.constant 0 : index
    %c0_72 = arith.constant 0 : index
    %184 = vector.load %arg2[%c0_71, %c0_72] : memref<144x16xbf16, #tpu.memory_space<vmem>>, vector<144x16xbf16>
    %cst_73 = arith.constant dense<0.000000e+00> : vector<256x16xf32>
    %185 = tpu.matmul %183, %184, %cst_73 {dimension_numbers = #tpu.dot_dimension_numbers<[1], [0], [0], [1], [0, 0, 1, 1], [], []>} : vector<256x144xbf16>, vector<144x16xbf16>, vector<256x16xf32> -> vector<256x16xf32>
    %c0_74 = arith.constant 0 : index
    %c0_75 = arith.constant 0 : index
    %186 = vector.load %arg3[%c0_74, %c0_75] : memref<1x16xf32, #tpu.memory_space<vmem>>, vector<1x16xf32>
    %187 = vector.broadcast %186 : vector<1x16xf32> to vector<256x16xf32>
    %188 = arith.addf %185, %187 : vector<256x16xf32>
    %cst_76 = arith.constant 0.000000e+00 : f32
    %189 = vector.broadcast %cst_76 : f32 to vector<256x16xf32>
    %190 = arith.maximumf %188, %189 : vector<256x16xf32>
    %c17_i32_77 = arith.constant 17 : i32
    %191 = tpu.dynamic_rotate %190 by %c17_i32_77 dim 0 : vector<256x16xf32>, i32 -> vector<256x16xf32>
    %cst_78 = arith.constant 0.000000e+00 : f32
    %192 = vector.broadcast %cst_78 : f32 to vector<256x16xf32>
    %193 = arith.select %24, %191, %192 : vector<256x16xi1>, vector<256x16xf32>
    %c16_i32_79 = arith.constant 16 : i32
    %194 = tpu.dynamic_rotate %190 by %c16_i32_79 dim 0 : vector<256x16xf32>, i32 -> vector<256x16xf32>
    %cst_80 = arith.constant 0.000000e+00 : f32
    %195 = vector.broadcast %cst_80 : f32 to vector<256x16xf32>
    %196 = arith.select %43, %194, %195 : vector<256x16xi1>, vector<256x16xf32>
    %c15_i32_81 = arith.constant 15 : i32
    %197 = tpu.dynamic_rotate %190 by %c15_i32_81 dim 0 : vector<256x16xf32>, i32 -> vector<256x16xf32>
    %cst_82 = arith.constant 0.000000e+00 : f32
    %198 = vector.broadcast %cst_82 : f32 to vector<256x16xf32>
    %199 = arith.select %62, %197, %198 : vector<256x16xi1>, vector<256x16xf32>
    %c1_i32_83 = arith.constant 1 : i32
    %200 = tpu.dynamic_rotate %190 by %c1_i32_83 dim 0 : vector<256x16xf32>, i32 -> vector<256x16xf32>
    %cst_84 = arith.constant 0.000000e+00 : f32
    %201 = vector.broadcast %cst_84 : f32 to vector<256x16xf32>
    %202 = arith.select %81, %200, %201 : vector<256x16xi1>, vector<256x16xf32>
    %c255_i32_85 = arith.constant 255 : i32
    %203 = tpu.dynamic_rotate %190 by %c255_i32_85 dim 0 : vector<256x16xf32>, i32 -> vector<256x16xf32>
    %cst_86 = arith.constant 0.000000e+00 : f32
    %204 = vector.broadcast %cst_86 : f32 to vector<256x16xf32>
    %205 = arith.select %100, %203, %204 : vector<256x16xi1>, vector<256x16xf32>
    %c241_i32_87 = arith.constant 241 : i32
    %206 = tpu.dynamic_rotate %190 by %c241_i32_87 dim 0 : vector<256x16xf32>, i32 -> vector<256x16xf32>
    %cst_88 = arith.constant 0.000000e+00 : f32
    %207 = vector.broadcast %cst_88 : f32 to vector<256x16xf32>
    %208 = arith.select %119, %206, %207 : vector<256x16xi1>, vector<256x16xf32>
    %c240_i32_89 = arith.constant 240 : i32
    %209 = tpu.dynamic_rotate %190 by %c240_i32_89 dim 0 : vector<256x16xf32>, i32 -> vector<256x16xf32>
    %cst_90 = arith.constant 0.000000e+00 : f32
    %210 = vector.broadcast %cst_90 : f32 to vector<256x16xf32>
    %211 = arith.select %138, %209, %210 : vector<256x16xi1>, vector<256x16xf32>
    %c239_i32_91 = arith.constant 239 : i32
    %212 = tpu.dynamic_rotate %190 by %c239_i32_91 dim 0 : vector<256x16xf32>, i32 -> vector<256x16xf32>
    %cst_92 = arith.constant 0.000000e+00 : f32
    %213 = vector.broadcast %cst_92 : f32 to vector<256x16xf32>
    %214 = arith.select %157, %212, %213 : vector<256x16xi1>, vector<256x16xf32>
    %215 = tpu.concatenate %193, %196, %199, %202, %190, %205, %208, %211, %214 in 1 : vector<256x16xf32>, vector<256x16xf32>, vector<256x16xf32>, vector<256x16xf32>, vector<256x16xf32>, vector<256x16xf32>, vector<256x16xf32>, vector<256x16xf32>, vector<256x16xf32> -> vector<256x144xf32>
    %216 = arith.truncf %215 : vector<256x144xf32> to vector<256x144xbf16>
    %c0_93 = arith.constant 0 : index
    %c0_94 = arith.constant 0 : index
    %217 = vector.load %arg4[%c0_93, %c0_94] : memref<144x16xbf16, #tpu.memory_space<vmem>>, vector<144x16xbf16>
    %cst_95 = arith.constant dense<0.000000e+00> : vector<256x16xf32>
    %218 = tpu.matmul %216, %217, %cst_95 {dimension_numbers = #tpu.dot_dimension_numbers<[1], [0], [0], [1], [0, 0, 1, 1], [], []>} : vector<256x144xbf16>, vector<144x16xbf16>, vector<256x16xf32> -> vector<256x16xf32>
    %c0_96 = arith.constant 0 : index
    %c0_97 = arith.constant 0 : index
    %219 = vector.load %arg5[%c0_96, %c0_97] : memref<1x16xf32, #tpu.memory_space<vmem>>, vector<1x16xf32>
    %220 = vector.broadcast %219 : vector<1x16xf32> to vector<256x16xf32>
    %221 = arith.addf %218, %220 : vector<256x16xf32>
    %cst_98 = arith.constant dense<0.000000e+00> : vector<16xf32>
    %222 = vector.multi_reduction <add>, %221, %cst_98 [0] : vector<256x16xf32> to vector<16xf32>
    %223 = vector.shape_cast %222 : vector<16xf32> to vector<1x16xf32>
    %cst_99 = arith.constant 2.560000e+02 : f32
    %224 = vector.broadcast %cst_99 : f32 to vector<1x16xf32>
    %225 = arith.divf %223, %224 : vector<1x16xf32>
    %c0_100 = arith.constant 0 : index
    %c0_101 = arith.constant 0 : index
    %226 = vector.load %arg6[%c0_100, %c0_101] : memref<16x4xf32, #tpu.memory_space<vmem>>, vector<16x4xf32>
    %cst_102 = arith.constant dense<0.000000e+00> : vector<1x4xf32>
    %227 = tpu.matmul %225, %226, %cst_102 {dimension_numbers = #tpu.dot_dimension_numbers<[1], [0], [0], [1], [0, 0, 1, 1], [], []>} : vector<1x16xf32>, vector<16x4xf32>, vector<1x4xf32> -> vector<1x4xf32>
    %c0_103 = arith.constant 0 : index
    %c0_104 = arith.constant 0 : index
    %228 = vector.load %arg7[%c0_103, %c0_104] : memref<1x4xf32, #tpu.memory_space<vmem>>, vector<1x4xf32>
    %229 = arith.addf %227, %228 : vector<1x4xf32>
    %cst_105 = arith.constant 0.000000e+00 : f32
    %230 = vector.broadcast %cst_105 : f32 to vector<1x4xf32>
    %231 = arith.maximumf %229, %230 : vector<1x4xf32>
    %c0_106 = arith.constant 0 : index
    %c0_107 = arith.constant 0 : index
    %232 = vector.load %arg8[%c0_106, %c0_107] : memref<4x16xf32, #tpu.memory_space<vmem>>, vector<4x16xf32>
    %cst_108 = arith.constant dense<0.000000e+00> : vector<1x16xf32>
    %233 = tpu.matmul %231, %232, %cst_108 {dimension_numbers = #tpu.dot_dimension_numbers<[1], [0], [0], [1], [0, 0, 1, 1], [], []>} : vector<1x4xf32>, vector<4x16xf32>, vector<1x16xf32> -> vector<1x16xf32>
    %c0_109 = arith.constant 0 : index
    %c0_110 = arith.constant 0 : index
    %234 = vector.load %arg9[%c0_109, %c0_110] : memref<1x16xf32, #tpu.memory_space<vmem>>, vector<1x16xf32>
    %235 = arith.addf %233, %234 : vector<1x16xf32>
    %236 = arith.negf %235 : vector<1x16xf32>
    %237 = math.exp %236 : vector<1x16xf32>
    %cst_111 = arith.constant 1.000000e+00 : f32
    %238 = vector.broadcast %cst_111 : f32 to vector<1x16xf32>
    %239 = arith.addf %238, %237 : vector<1x16xf32>
    %240 = arith.divf %238, %239 : vector<1x16xf32>
    %241 = vector.broadcast %240 : vector<1x16xf32> to vector<256x16xf32>
    %242 = arith.mulf %221, %241 : vector<256x16xf32>
    %243 = arith.addf %242, %1 : vector<256x16xf32>
    %c0_112 = arith.constant 0 : index
    %c0_113 = arith.constant 0 : index
    %c0_114 = arith.constant 0 : index
    %244 = vector.load %arg10[%c0_112, %c0_113, %c0_114] : memref<1x256x16xf32, #tpu.memory_space<vmem>>, vector<1x256x16xf32>
    %245 = vector.shape_cast %244 : vector<1x256x16xf32> to vector<256x16xf32>
    %246 = vector.shape_cast %243 : vector<256x16xf32> to vector<1x256x16xf32>
    tpu.vector_store %arg10[%c0_112, %c0_113, %c0_114], %246 {strides = array<i32>} : memref<1x256x16xf32, #tpu.memory_space<vmem>>, vector<1x256x16xf32>,
    return
  }
  func.func @transform_0(%arg0: i32) -> (i32, i32, i32) {
    %c0_i32 = arith.constant 0 : i32
    %c0_i32_0 = arith.constant 0 : i32
    %c0_i32_1 = arith.constant 0 : i32
    return %arg0, %c0_i32, %c0_i32_0 : i32, i32, i32
  }
  func.func @transform_1(%arg0: i32) -> (i32, i32) {
    %c0_i32 = arith.constant 0 : i32
    %c0_i32_0 = arith.constant 0 : i32
    %c0_i32_1 = arith.constant 0 : i32
    return %c0_i32, %c0_i32_0 : i32, i32
  }
  func.func @transform_2(%arg0: i32) -> (i32, i32) {
    %c0_i32 = arith.constant 0 : i32
    %c0_i32_0 = arith.constant 0 : i32
    %c0_i32_1 = arith.constant 0 : i32
    return %c0_i32, %c0_i32_0 : i32, i32
  }
  func.func @transform_3(%arg0: i32) -> (i32, i32) {
    %c0_i32 = arith.constant 0 : i32
    %c0_i32_0 = arith.constant 0 : i32
    %c0_i32_1 = arith.constant 0 : i32
    return %c0_i32, %c0_i32_0 : i32, i32
  }
  func.func @transform_4(%arg0: i32) -> (i32, i32) {
    %c0_i32 = arith.constant 0 : i32
    %c0_i32_0 = arith.constant 0 : i32
    %c0_i32_1 = arith.constant 0 : i32
    return %c0_i32, %c0_i32_0 : i32, i32
  }
  func.func @transform_5(%arg0: i32) -> (i32, i32) {
    %c0_i32 = arith.constant 0 : i32
    %c0_i32_0 = arith.constant 0 : i32
    %c0_i32_1 = arith.constant 0 : i32
    return %c0_i32, %c0_i32_0 : i32, i32
  }
  func.func @transform_6(%arg0: i32) -> (i32, i32) {
    %c0_i32 = arith.constant 0 : i32
    %c0_i32_0 = arith.constant 0 : i32
    %c0_i32_1 = arith.constant 0 : i32
    return %c0_i32, %c0_i32_0 : i32, i32
  }
  func.func @transform_7(%arg0: i32) -> (i32, i32) {
    %c0_i32 = arith.constant 0 : i32
    %c0_i32_0 = arith.constant 0 : i32
    %c0_i32_1 = arith.constant 0 : i32
    return %c0_i32, %c0_i32_0 : i32, i32
  }
  func.func @transform_8(%arg0: i32) -> (i32, i32) {
    %c0_i32 = arith.constant 0 : i32
    %c0_i32_0 = arith.constant 0 : i32
    %c0_i32_1 = arith.constant 0 : i32
    return %c0_i32, %c0_i32_0 : i32, i32
  }
  func.func @transform_9(%arg0: i32) -> (i32, i32, i32) {
    %c0_i32 = arith.constant 0 : i32
    %c0_i32_0 = arith.constant 0 : i32
    %c0_i32_1 = arith.constant 0 : i32
    return %arg0, %c0_i32, %c0_i32_0 : i32, i32, i32
  }
}

</mosaic_0001>

<bundles_post_ra>
// kernel: tpu_custom_call.1
= control target key start
LH: loop header
LB: loop body
LE: loop exit
PB: predicated region body
PF: predicated region fallthrough
CT: control target
= control target key end

     0   :  { %s5220_s30 = smov 0   ;;  %s8278_s0 = inlined_call_operand.vmem [shape: f32[2,256,16], index: 0, kind: input, shape index: {}]   ;;  %s8279_s1 = inlined_call_operand.vmem [shape: bf16[144,16], index: 1, kind: input, shape index: {}]   ;;  %s8280_s2 = inlined_call_operand.vmem [shape: f32[1,16], index: 2, kind: input, shape index: {}]   ;;  %s8281_s3 = inlined_call_operand.vmem [shape: bf16[144,16], index: 3, kind: input, shape index: {}]   ;;  %s8282_s4 = inlined_call_operand.vmem [shape: f32[1,16], index: 4, kind: input, shape index: {}]   ;;  %s8283_s5 = inlined_call_operand.vmem [shape: f32[16,4], index: 5, kind: input, shape index: {}]   ;;  %s8284_s6 = inlined_call_operand.vmem [shape: f32[1,4], index: 6, kind: input, shape index: {}]   ;;  %s8285_s7 = inlined_call_operand.vmem [shape: f32[4,16], index: 7, kind: input, shape index: {}]   ;;  %s8286_s8 = inlined_call_operand.vmem [shape: f32[1,16], index: 8, kind: input, shape index: {}]   ;;  %s8287_s9 = inlined_call_operand.vmem [shape: f32[2,256,16], index: 9, kind: output, shape index: {}]  }
   0x1 LB: > { %s3912_s10 = sadd.s32 4294967295, %s5157_s30   ;;  %p3916_p0 = scmp.ge.s32.totalorder %s5157_s30, 1  ;;  %s5157_s30 = sphi %s5220_s30, %s19_s30  }
   0x2   : > { %p287_p1 = scmp.lt.s32.totalorder %s5157_s30, 3 }
   0x4   : > { %p288_p2 = pnand %p3916_p0, %p287_p1 }
   0x6   : > { %291 = sbr.rel (%p288_p2) target bundleno = 1612 (0x64c), region = 56 }
   0xb   : > { %p323_p3 = scmp.lt.s32.totalorder %s3912_s10, 1  ;;  %v366_v0 = vlaneseq  ;;  %v8288_v1 = vmov 0   ;;  %v5095_v2 = vld [vmem:[%s8279_s1 + $0x38] sm:$0xff]   ;;  %v5096_v4 = vld [vmem:[%s8279_s1 + $0x30] sm:$0xff]   ;;  %v8290_v12 = vmov 0.0   ;;  %v5097_v18 = vld [vmem:[%s8279_s1 + $0x28] sm:$0xff]  }
   0xc   : > { %1794 = vmatprep.subr.bf16.mxu0 %v8288_v1  ;;  %3362 = vmatprep.subr.bf16.mxu1 %v8288_v1  ;;  %s5161_s21 = smov 64   ;;  %s5162_s22 = smov 16   ;;  %v5098_v38 = vld [vmem:[%s8279_s1 + $0x20] sm:$0xff]   ;;  %v5099_v41 = vld [vmem:[%s8279_s1 + $0x18] sm:$0xff]   ;;  %v5100_v48 = vld [vmem:[%s8279_s1 + $0x10] sm:$0xff]   ;;  %vm1406_vm4 = vcmask 130048  }
   0xd   : > { %s8572_s10 = smov (!%p323_p3, %s3912_s10), 1  ;;  %v5235_v3 = vshrl.u32 %v366_v0, 7  ;;  %1795 = vmatpush1.bf16.msra.mxu0 %v5095_v2  ;;  %s5163_s23 = smov 32   ;;  %v5101_v54 = vld [vmem:[%s8279_s1 + $0x8] sm:$0xff]   ;;  %v5102_v59 = vld [vmem:[%s8279_s1] sm:$0xff]   ;;  %vm1438_vm5 = vcmask 261120  }
   0xe   : > { %s3977_s15 = sshll.u32 %s8572_s10, 8  ;;  %1796 = vmatprep.subr.bf16.mxu0 %v8288_v1  ;;  %s5164_s26 = smov 48   ;;  %v5103_v2 = vld [vmem:[%s8279_s1 + $0x40] sm:$0xff]   ;;  %vm1470_vm6 = vcmask 392192   ;;  %vm1503_vm7 = vcmask 523264   ;;  %vm1536_vm8 = vcmask 654336  }
   0xf   : > { %8383 = vst [vmem:[#allocation2_spill] sm:$0xff] %v5235_v3  ;;  %v5242_v5 = vadd.s32 4294967295, %v5235_v3  ;;  %v368_v6 = vadd.s32 8, %v5235_v3  ;;  %s5251_s18 = scalar_lea.vmem %s8278_s0, %s3977_s15  ;;  %vm544_vm0 = vcmp.lt.s32.totalorder %v5235_v3, 7  ;;  %vm422_vm2 = vcmp.lt.s32.totalorder %v5235_v3, 1  ;;  %s5165_s29 = smov 80  }
  0x10   : > { %v5255_v7 = vld [vmem:[%s5251_s18] sm:$0xff]  ;;  %v5258_v8 = vld [vmem:[%s5251_s18 + $0x8] sm:$0xff]  ;;  %v5261_v9 = vld [vmem:[%s5251_s18 + $0xf8] sm:$0xff]  ;;  %s5166_s11 = smov 96   ;;  %s5167_s14 = smov 112   ;;  %vm1569_vm9 = vcmask 785408  }
  0x11   : > { %8384 = vst [vmem:[#allocation3_spill] sm:$0xff] %v5255_v7  ;;  %vm371_vm1 = vcmp.ge.s32.totalorder %v5242_v5, 0  ;;  %v5265_v10 = vadd.s32 1, %v368_v6  ;;  %v4020_v11 = vpack.i.bf16 %v5258_v8, %v5255_v7  ;;  %v4015_v13 = vpack.i.bf16 %v5255_v7, %v8290_v12  ;;  %v336_v16 = vld [vmem:[%s5251_s18 + $0x10] sm:$0xff]  ;;  %v5275_v17 = vld [vmem:[%s5251_s18 + $0x18] sm:$0xff]  ;;  %1797 = vmatpush1.bf16.msra.mxu0 %v5096_v4  ;;  %v5322_v36 = vld [vmem:[%s5251_s18 + $0x20] sm:$0xff]  ;;  %s8153_s25 = scalar_lea.vmem %s8287_s9, %s3977_s15 }
  0x12   : > { %v8292_v14 = vrot.slane %v5255_v7, 1  ;;  %v514_v15 = vrot.slane %v5258_v8, 1  ;;  %v391_v19 = vrot.slane %v5255_v7, 7  ;;  %v392_v20 = vrot.slane %v5258_v8, 7  ;;  %1798 = vmatprep.subr.bf16.mxu0 %v8288_v1  ;;  %v5347_v46 = vld [vmem:[%s5251_s18 + $0x28] sm:$0xff]  ;;  %v340_v60 = vld [vmem:[%s5251_s18 + $0x30] sm:$0xff] }
  0x13   : > { %v8293_v21 = vrot.slane %v5261_v9, 7  ;;  %vm388_vm3 = vcmp.lt.s32.totalorder %v5265_v10, 16  ;;  %4021 = vrot.lane.b32.xlu1 %v4020_v11, %s5161_s21  ;;  %4016 = vrot.lane.b32.xlu0 %v4015_v13, %s5162_s22  ;;  %v515_v23 = vrot.slane %v336_v16, 1  ;;  %v393_v24 = vrot.slane %v336_v16, 7  ;;  %v5399_v4 = vld [vmem:[%s5251_s18 + $0x38] sm:$0xff] }
  0x14   : > { %v574_v22 = vsel %vm544_vm0, %v8292_v14, %v514_v15  ;;  %v394_v25 = vrot.slane %v5275_v17, 7  ;;  %v5295_v27 = vsel %vm422_vm2, %v391_v19, %v392_v20  ;;  %v516_v40 = vrot.slane %v5275_v17, 1 }
  0x15   : > { %v4025_v26 = vpack.i.bf16 %v574_v22, %v8290_v12  ;;  %v452_v28 = vsel %vm422_vm2, %v8293_v21, %v391_v19  ;;  %v573_v30 = vsel %vm544_vm0, %v514_v15, %v515_v23  ;;  %v450_v32 = vsel %vm422_vm2, %v392_v20, %v393_v24  ;;  %1799 = vmatpush1.bf16.msra.mxu0 %v5097_v18 }
  0x16   : > { %v5303_v29 = vsel %vm371_vm1, %v452_v28, 0.0  ;;  %v5309_v31 = vsel %vm422_vm2, %v393_v24, %v394_v25  ;;  %v576_v34 = vsel %vm388_vm3, %v573_v30, 0.0  ;;  %v5319_v35 = vsel %vm371_vm1, %v450_v32, 0.0  ;;  %1800 = vmatprep.subr.bf16.mxu0 %v8288_v1  ;;  %v5444_v32 = vld [vmem:[%s5251_s18 + $0x48] sm:$0xff] }
  0x17   : > { %v4030_v33 = vpack.i.bf16 %v5295_v27, %v5303_v29  ;;  %4026 = vrot.lane.b32.xlu0 %v4025_v26, %s5163_s23  ;;  %v4035_v37 = vpack.i.bf16 %v576_v34, %v574_v22  ;;  %v4045_v39 = vpack.i.bf16 %v5309_v31, %v5319_v35  ;;  %v517_v42 = vrot.slane %v5322_v36, 1  ;;  %v342_v22 = vld [vmem:[%s5251_s18 + $0x40] sm:$0xff] }
  0x18   : > { %v4040_v43 = vpack.i.bf16 %v5275_v17, %v336_v16  ;;  %v4050_v44 = vpack.i.bf16 %v336_v16, %v5258_v8  ;;  %v5344_v45 = vsel %vm544_vm0, %v515_v23, %v516_v40  ;;  %v395_v47 = vrot.slane %v5322_v36, 7 }
  0x19   : > { %4031 = vrot.lane.b32.xlu1 %v4030_v33, %s5164_s26  ;;  %1801 = vmatpush1.bf16.msra.mxu0 %v5098_v38  ;;  %v571_v49 = vsel %vm544_vm0, %v516_v40, %v517_v42  ;;  %v4055_v50 = vpack.i.bf16 %v5344_v45, %v576_v34  ;;  %v396_v51 = vrot.slane %v5347_v46, 7  ;;  %v518_v58 = vrot.slane %v5347_v46, 1 }
  0x1a   : > { %1802 = vmatprep.subr.bf16.mxu0 %v8288_v1  ;;  %v578_v52 = vsel %vm388_vm3, %v571_v49, 0.0  ;;  %v448_v53 = vsel %vm422_vm2, %v394_v25, %v395_v47  ;;  %v4080_v62 = vpack.i.bf16 %v5347_v46, %v5322_v36  ;;  %v519_v0 = vrot.slane %v340_v60, 1 }
  0x1b   : > { %4036 = vrot.lane.b32.xlu0 %v4035_v37, %s5165_s29  ;;  %v4070_v55 = vpack.i.bf16 %v578_v52, %v5344_v45  ;;  %v5373_v56 = vsel %vm422_vm2, %v395_v47, %v396_v51  ;;  %v5377_v57 = vsel %vm371_vm1, %v448_v53, 0.0  ;;  %v5393_v63 = vsel %vm544_vm0, %v517_v42, %v518_v58 }
  0x1c   : > { %v4075_v61 = vpack.i.bf16 %v5373_v56, %v5377_v57  ;;  %v397_v6 = vrot.slane %v340_v60, 7  ;;  %v4085_v8 = vpack.i.bf16 %v5322_v36, %v5275_v17  ;;  %v4090_v11 = vpack.i.bf16 %v5393_v63, %v578_v52 }
  0x1d   : > { %4046 = vrot.lane.b32.xlu1 %v4045_v39, %s5166_s11  ;;  %1803 = vmatpush1.bf16.msra.mxu0 %v5099_v41  ;;  %v569_v13 = vsel %vm544_vm0, %v518_v58, %v519_v0  ;;  %v398_v15 = vrot.slane %v5399_v4, 7  ;;  %v520_v24 = vrot.slane %v5399_v4, 1  ;;  %v521_v25 = vrot.slane %v342_v22, 1  ;;  %v344_v41 = vld [vmem:[%s5251_s18 + $0x50] sm:$0xff] }
  0x1e   : > { %1804 = vmatprep.subr.bf16.mxu0 %v8288_v1  ;;  %v446_v16 = vsel %vm422_vm2, %v396_v51, %v397_v6  ;;  %v5417_v17 = vsel %vm388_vm3, %v569_v13, 0.0  ;;  %v4115_v26 = vpack.i.bf16 %v5399_v4, %v340_v60  ;;  %v4120_v28 = vpack.i.bf16 %v340_v60, %v5347_v46 }
  0x1f   : > { %4041 = vrot.lane.b32.xlu0 %v4040_v43, %s5167_s14  ;;  %v5421_v18 = vsel %vm422_vm2, %v397_v6, %v398_v15  ;;  %v5425_v19 = vsel %vm371_vm1, %v446_v16, 0.0  ;;  %v4105_v20 = vpack.i.bf16 %v5417_v17, %v5393_v63  ;;  %v5441_v30 = vsel %vm544_vm0, %v519_v0, %v520_v24 }
  0x20   : > { %v4110_v23 = vpack.i.bf16 %v5421_v18, %v5425_v19  ;;  %v399_v33 = vrot.slane %v342_v22, 7  ;;  %v1636_v34 = vpack.c.bf16 %v578_v52, %v5344_v45  ;;  %v567_v36 = vsel %vm544_vm0, %v520_v24, %v521_v25 }
  0x21   : > { %4051 = vrot.lane.b32.xlu1 %v4050_v44, %s5162_s22  ;;  %1805 = vmatpush1.bf16.msra.mxu0 %v5100_v48  ;;  %v4125_v37 = vpack.i.bf16 %v5441_v30, %v5417_v17  ;;  %v400_v38 = vrot.slane %v5444_v32, 7  ;;  %v523_v46 = vrot.slane %v344_v41, 1  ;;  %v522_v47 = vrot.slane %v5444_v32, 1  ;;  %v5478_v48 = vld [vmem:[%s5251_s18 + $0x60] sm:$0xff] }
  0x22   : > { %1806 = vmatprep.subr.bf16.mxu0 %v8288_v1  ;;  %3931 = vmatprep.mubr.msk.bf16.mxu0 %vm1406_vm4, %v1636_v34  ;;  %v444_v40 = vsel %vm422_vm2, %v398_v15, %v399_v33  ;;  %v4150_v51 = vpack.i.bf16 %v5444_v32, %v342_v22  ;;  %v401_v58 = vrot.slane %v344_v41, 7  ;;  %v403_v34 = vrot.slane %v5478_v48, 7 }
  0x23   : > { %4056 = vrot.lane.b32.xlu0 %v4055_v50, %s5163_s23  ;;  %v5470_v44 = vsel %vm422_vm2, %v399_v33, %v400_v38  ;;  %v5474_v45 = vsel %vm371_vm1, %v444_v40, 0.0  ;;  %v565_v52 = vsel %vm544_vm0, %v522_v47, %v523_v46  ;;  %v5491_v53 = vsel %vm544_vm0, %v521_v25, %v522_v47 }
  0x24   : > { %v4145_v50 = vpack.i.bf16 %v5470_v44, %v5474_v45  ;;  %v5501_v60 = vsel %vm388_vm3, %v565_v52, 0.0  ;;  %v442_v6 = vsel %vm422_vm2, %v400_v38, %v401_v58  ;;  %vm1602_vm10 = vcmask 916480  }
  0x25   : > { %4061 = vrot.lane.b32.xlu1 %v4045_v39, %s5164_s26  ;;  %1807 = vmatpush1.bf16.msra.mxu0 %v5101_v54  ;;  %v5457_v39 = vsel %vm388_vm3, %v567_v36, 0.0  ;;  %v525_v54 = vrot.slane %v5478_v48, 1  ;;  %v5530_v15 = vsel %vm371_vm1, %v442_v6, 0.0  ;;  %vm5169_vm11 = vmmov 0  }
  0x26   : > { %1808 = vmatprep.subr.bf16.mxu0 %v8288_v1  ;;  %vm3677_vm12 = vcmask 1043456   ;;  %vm3673_vm13 = vcmask 31744  }
  0x27   : > { %4066 = vrot.lane.b32.xlu0 %v4040_v43, %s5161_s21  ;;  %v4140_v43 = vpack.i.bf16 %v5457_v39, %v5441_v30 }
  0x29   : > { %4071 = vrot.lane.b32.xlu1 %v4070_v55, %s5165_s29  ;;  %1809 = vmatpush1.bf16.msra.mxu0 %v5102_v59  ;;  %v5495_v55 = vld [vmem:[%s5251_s18 + $0x58] sm:$0xff]  ;;  %v4155_v59 = vpack.i.bf16 %v342_v22, %v5399_v4  ;;  %v5538_v22 = vld [vmem:[%s5251_s18 + $0x70] sm:$0xff] }
  0x2a   : > { %1824 = vmatprep.subr.bf16.mxu0 %v8288_v1  ;;  %v527_v24 = vrot.slane %v5538_v22, 1  ;;  %v4185_v25 = vpack.i.bf16 %v5495_v55, %v344_v41  ;;  %v5704_v1 = vld [vmem:[%s5251_s18 + $0xa0] sm:$0xff] }
  0x2b   : > { %4076 = vrot.lane.b32.xlu0 %v4075_v61, %s5166_s11 }
  0x2d   : > { %4081 = vrot.lane.b32.xlu1 %v4080_v62, %s5167_s14  ;;  %1825 = vmatpush2.bf16.msra.mxu0 %v5103_v2  ;;  %v402_v2 = vrot.slane %v5495_v55, 7 }
  0x2e   : > { %3984 = vmatprep.subr.mxu0 %v8290_v12 }
  0x2f   : > { %4086 = vrot.lane.b32.xlu0 %v4085_v8, %s5162_s22  ;;  %v5526_v13 = vsel %vm422_vm2, %v401_v58, %v402_v2  ;;  %v440_v40 = vsel %vm422_vm2, %v402_v2, %v403_v34 }
  0x31   : > { %4091 = vrot.lane.b32.xlu1 %v4090_v11, %s5163_s23 }
  0x33   : > { %4096 = vrot.lane.b32.xlu0 %v4075_v61, %s5164_s26  ;;  %v524_v61 = vrot.slane %v5495_v55, 1 }
  0x35   : > { %4101 = vrot.lane.b32.xlu1 %v4080_v62, %s5161_s21  ;;  %v4160_v62 = vpack.i.bf16 %v5491_v53, %v5457_v39  ;;  %v563_v4 = vsel %vm544_vm0, %v524_v61, %v525_v54  ;;  %v5518_v8 = vsel %vm544_vm0, %v523_v46, %v524_v61  ;;  %v405_v61 = vrot.slane %v5538_v22, 7 }
  0x36   : > { %v5522_v11 = vsel %vm388_vm3, %v563_v4, 0.0 }
  0x37   : > { %4106 = vrot.lane.b32.xlu0 %v4105_v20, %s5165_s29  ;;  %v4175_v20 = vpack.i.bf16 %v5501_v60, %v5491_v53  ;;  %v4210_v46 = vpack.i.bf16 %v5522_v11, %v5518_v8 }
  0x39   : > { %4111 = vrot.lane.b32.xlu1 %v4110_v23, %s5166_s11 }
  0x3b   : > { %4116 = vrot.lane.b32.xlu0 %v4115_v26, %s5167_s14 }
  0x3d   : > { %4121 = vrot.lane.b32.xlu1 %v4120_v28, %s5162_s22  ;;  %v4190_v28 = vpack.i.bf16 %v344_v41, %v5444_v32 }
  0x3f   : > { %4126 = vrot.lane.b32.xlu0 %v4125_v37, %s5163_s23  ;;  %v4195_v37 = vpack.i.bf16 %v5518_v8, %v5501_v60 }
  0x41   : > { %4131 = vrot.lane.b32.xlu1 %v4110_v23, %s5164_s26  ;;  %v4180_v23 = vpack.i.bf16 %v5526_v13, %v5530_v15 }
  0x43   : > { %4136 = vrot.lane.b32.xlu0 %v4115_v26, %s5161_s21  ;;  %v347_v26 = vld [vmem:[%s5251_s18 + $0x68] sm:$0xff] }
  0x44   : > { %v526_v33 = vrot.slane %v347_v26, 1  ;;  %v404_v38 = vrot.slane %v347_v26, 7 }
  0x45   : > { %4141 = vrot.lane.b32.xlu1 %v4140_v43, %s5165_s29 }
  0x46   : > { %v561_v36 = vsel %vm544_vm0, %v526_v33, %v527_v24  ;;  %v5560_v32 = vsel %vm544_vm0, %v525_v54, %v526_v33  ;;  %v5574_v47 = vsel %vm422_vm2, %v403_v34, %v404_v38  ;;  %v4220_v54 = vpack.i.bf16 %v347_v26, %v5478_v48  ;;  %v5625_v34 = vld [vmem:[%s5251_s18 + $0x90] sm:$0xff] }
  0x47   : > { %4146 = vrot.lane.b32.xlu0 %v4145_v50, %s5166_s11  ;;  %v5564_v41 = vsel %vm388_vm3, %v561_v36, 0.0  ;;  %v4230_v4 = vpack.i.bf16 %v5560_v32, %v5522_v11 }
  0x49   : > { %4151 = vrot.lane.b32.xlu1 %v4150_v51, %s5167_s14 }
  0x4b   : > { %4156 = vrot.lane.b32.xlu0 %v4155_v59, %s5162_s22  ;;  %v349_v59 = vld [vmem:[%s5251_s18 + $0x78] sm:$0xff] }
  0x4c   : > { %v528_v2 = vrot.slane %v349_v59, 1  ;;  %v406_v6 = vrot.slane %v349_v59, 7 }
  0x4d   : > { %4161 = vrot.lane.b32.xlu1 %v4160_v62, %s5163_s23  ;;  %v4225_v62 = vpack.i.bf16 %v5478_v48, %v5495_v55 }
  0x4e   : > { %v5605_v48 = vsel %vm544_vm0, %v527_v24, %v528_v2  ;;  %v4245_v24 = vpack.i.bf16 %v5564_v41, %v5560_v32 }
  0x4f   : > { %4166 = vrot.lane.b32.xlu0 %v4145_v50, %s5164_s26  ;;  %v5578_v50 = vsel %vm371_vm1, %v440_v40, 0.0  ;;  %v5634_v40 = vld [vmem:[%s5251_s18 + $0x88] sm:$0xff] }
  0x50   : > { %v4215_v52 = vpack.i.bf16 %v5574_v47, %v5578_v50  ;;  %v4330_v43 = vpack.i.bf16 %v5625_v34, %v5634_v40 }
  0x51   : > { %4171 = vrot.lane.b32.xlu1 %v4150_v51, %s5161_s21  ;;  %v5581_v51 = vld [vmem:[%s5251_s18 + $0x80] sm:$0xff] }
  0x52   : > { %v529_v58 = vrot.slane %v5581_v51, 1 }
  0x53   : > { %4176 = vrot.lane.b32.xlu0 %v4175_v20, %s5165_s29 }
  0x54   : > { %v559_v20 = vsel %vm544_vm0, %v528_v2, %v529_v58  ;;  %v408_v2 = vrot.slane %v5634_v40, 7 }
  0x55   : > { %4181 = vrot.lane.b32.xlu1 %v4180_v23, %s5166_s11  ;;  %v5609_v55 = vsel %vm388_vm3, %v559_v20, 0.0 }
  0x57   : > { %4186 = vrot.lane.b32.xlu0 %v4185_v25, %s5167_s14 }
  0x59   : > { %4191 = vrot.lane.b32.xlu1 %v4190_v28, %s5162_s22 }
  0x5b   : > { %4196 = vrot.lane.b32.xlu0 %v4195_v37, %s5163_s23  ;;  %v531_v37 = vrot.slane %v5625_v34, 1 }
  0x5d   : > { %4201 = vrot.lane.b32.xlu1 %v4180_v23, %s5164_s26  ;;  %v438_v23 = vsel %vm422_vm2, %v404_v38, %v405_v61  ;;  %v4255_v38 = vpack.i.bf16 %v349_v59, %v5538_v22 }
  0x5e   : > { %v5617_v28 = vsel %vm371_vm1, %v438_v23, 0.0  ;;  %v4280_v23 = vpack.i.bf16 %v5609_v55, %v5605_v48 }
  0x5f   : > { %4206 = vrot.lane.b32.xlu0 %v4185_v25, %s5161_s21  ;;  %v5613_v25 = vsel %vm422_vm2, %v405_v61, %v406_v6  ;;  %v407_v61 = vrot.slane %v5581_v51, 7 }
  0x60   : > { %v4250_v36 = vpack.i.bf16 %v5613_v25, %v5617_v28 }
  0x61   : > { %4211 = vrot.lane.b32.xlu1 %v4210_v46, %s5165_s29  ;;  %v4260_v46 = vpack.i.bf16 %v5538_v22, %v347_v26  ;;  %v436_v22 = vsel %vm422_vm2, %v406_v6, %v407_v61  ;;  %v5667_v6 = vsel %vm422_vm2, %v407_v61, %v408_v2  ;;  %v4295_v61 = vpack.i.bf16 %v5581_v51, %v349_v59 }
  0x63   : > { %4216 = vrot.lane.b32.xlu0 %v4215_v52, %s5166_s11 }
  0x65   : > { %4221 = vrot.lane.b32.xlu1 %v4220_v54, %s5167_s14 }
  0x67   : > { %4226 = vrot.lane.b32.xlu0 %v4225_v62, %s5162_s22  ;;  %v4265_v62 = vpack.i.bf16 %v5605_v48, %v5564_v41 }
  0x69   : > { %4231 = vrot.lane.b32.xlu1 %v4230_v4, %s5163_s23 }
  0x6b   : > { %4236 = vrot.lane.b32.xlu0 %v4215_v52, %s5164_s26  ;;  %v530_v52 = vrot.slane %v5634_v40, 1 }
  0x6d   : > { %4241 = vrot.lane.b32.xlu1 %v4220_v54, %s5161_s21  ;;  %v557_v54 = vsel %vm544_vm0, %v530_v52, %v531_v37  ;;  %v5653_v26 = vsel %vm544_vm0, %v529_v58, %v530_v52  ;;  %v5671_v58 = vsel %vm371_vm1, %v436_v22, 0.0  ;;  %v409_v52 = vrot.slane %v5625_v34, 7 }
  0x6e   : > { %v5657_v4 = vsel %vm388_vm3, %v557_v54, 0.0 }
  0x6f   : > { %4246 = vrot.lane.b32.xlu0 %v4245_v24, %s5165_s29  ;;  %v4285_v24 = vpack.i.bf16 %v5667_v6, %v5671_v58 }
  0x71   : > { %4251 = vrot.lane.b32.xlu1 %v4250_v36, %s5166_s11 }
  0x73   : > { %4256 = vrot.lane.b32.xlu0 %v4255_v38, %s5167_s14 }
  0x75   : > { %4261 = vrot.lane.b32.xlu1 %v4260_v46, %s5162_s22  ;;  %v5680_v46 = vld [vmem:[%s5251_s18 + $0x98] sm:$0xff] }
  0x76   : > { %v410_v54 = vrot.slane %v5680_v46, 7 }
  0x77   : > { %4266 = vrot.lane.b32.xlu0 %v4265_v62, %s5163_s23  ;;  %v434_v62 = vsel %vm422_vm2, %v408_v2, %v409_v52  ;;  %v4315_v2 = vpack.i.bf16 %v5657_v4, %v5653_v26 }
  0x78   : > { %v5701_v59 = vsel %vm371_vm1, %v434_v62, 0.0  ;;  %v8299_v62 = vrot.slane %v5704_v1, 1 }
  0x79   : > { %4271 = vrot.lane.b32.xlu1 %v4250_v36, %s5164_s26  ;;  %v4290_v36 = vpack.i.bf16 %v5634_v40, %v5581_v51  ;;  %v5697_v51 = vsel %vm422_vm2, %v409_v52, %v410_v54  ;;  %8386 = vst [vmem:[#allocation5_spill] sm:$0xff] %v5701_v59  ;;  %v532_v52 = vrot.slane %v5680_v46, 1 }
  0x7a   : > { %8385 = vst [vmem:[#allocation4_spill] sm:$0xff] %v5697_v51 }
  0x7b   : > { %4276 = vrot.lane.b32.xlu0 %v4255_v38, %s5161_s21  ;;  %v4300_v38 = vpack.i.bf16 %v5653_v26, %v5609_v55  ;;  %v5732_v42 = vsel %vm544_vm0, %v531_v37, %v532_v52 }
  0x7d   : > { %4281 = vrot.lane.b32.xlu1 %v4280_v23, %s5165_s29 }
  0x7f   : > { %4286 = vrot.lane.b32.xlu0 %v4285_v24, %s5166_s11 }
  0x81   : > { %4291 = vrot.lane.b32.xlu1 %v4290_v36, %s5167_s14 }
  0x83   : > { %4296 = vrot.lane.b32.xlu0 %v4295_v61, %s5162_s22  ;;  %v4320_v61 = vpack.i.bf16 %v5697_v51, %v5701_v59 }
  0x85   : > { %4301 = vrot.lane.b32.xlu1 %v4300_v38, %s5163_s23  ;;  %v4022_v22 = vpop.permute.xlu1 %4021  ;;  %v5693_v23 = vpop.permute.xlu0 %4016 }
  0x86   : > { %v4018_v12 = vunpack.i.l.bf16 %v5693_v23  ;;  %v4024_v16 = vunpack.i.h.bf16 %v4022_v22  ;;  %v4023_v0 = vunpack.i.l.bf16 %v4022_v22 }
  0x87   : > { %4306 = vrot.lane.b32.xlu0 %v4285_v24, %s5164_s26 }
  0x88   : > { %v1407_v20 = vsel %vm1406_vm4, 0.0, %v4018_v12  ;;  %v5735_v12 = vld [vmem:[%s5251_s18 + $0xa8] sm:$0xff] }
  0x89   : > { %4311 = vrot.lane.b32.xlu1 %v4290_v36, %s5161_s21  ;;  %v5714_v38 = vpop.permute.xlu0 %4026  ;;  %v4325_v36 = vpack.i.bf16 %v5680_v46, %v5625_v34  ;;  %v411_v34 = vrot.slane %v5704_v1, 7 }
  0x8a   : > { %v4028_v14 = vunpack.i.l.bf16 %v5714_v38 }
  0x8b   : > { %v4032_v24 = vpop.permute.xlu1 %4031  ;;  %4316 = vrot.lane.b32.xlu0 %v4315_v2, %s5165_s29 }
  0x8c   : > { %v4034_v33 = vunpack.i.h.bf16 %v4032_v24  ;;  %v4033_v21 = vunpack.i.l.bf16 %v4032_v24  ;;  %v5725_v49 = vsel %vm1438_vm5, %v1407_v20, %v4028_v14  ;;  %v555_v14 = vsel %vm544_vm0, %v532_v52, %v8299_v62 }
  0x8d   : > { %8387 = vst [vmem:[#allocation6_spill] sm:$0xff] %v5725_v49  ;;  %4321 = vrot.lane.b32.xlu1 %v4320_v61, %s5166_s11  ;;  %v4037_v22 = vpop.permute.xlu0 %4036 }
  0x8e   : > { %v1472_v2 = vsel %vm1470_vm6, %v5725_v49, %v4034_v33  ;;  %v1471_v40 = vsel %vm1470_vm6, %v5725_v49, %v4033_v21  ;;  %v4039_v20 = vunpack.i.h.bf16 %v4037_v22  ;;  %v4038_v24 = vunpack.i.l.bf16 %v4037_v22 }
  0x8f   : > { %v1504_v37 = vsel %vm1503_vm7, %v1471_v40, %v4023_v0  ;;  %v1505_v7 = vsel %vm1503_vm7, %v1472_v2, %v4024_v16  ;;  %v4047_v51 = vpop.permute.xlu1 %4046  ;;  %4326 = vrot.lane.b32.xlu0 %v4325_v36, %s5167_s14  ;;  %v4335_v21 = vpack.i.bf16 %v5732_v42, %v5657_v4  ;;  %v8300_v49 = vrot.slane %v5735_v12, 7 }
  0x90   : > { %v4049_v59 = vunpack.i.h.bf16 %v4047_v51  ;;  %v4048_v33 = vunpack.i.l.bf16 %v4047_v51  ;;  %v1537_v52 = vsel %vm1536_vm8, %v1504_v37, %v4038_v24  ;;  %v1538_v62 = vsel %vm1536_vm8, %v1505_v7, %v4039_v20 }
  0x91   : > { %4331 = vrot.lane.b32.xlu1 %v4330_v43, %s5162_s22  ;;  %v4042_v0 = vpop.permute.xlu0 %4041  ;;  %v5757_v16 = vsel %vm388_vm3, %v555_v14, 0.0  ;;  %v432_v51 = vsel %vm422_vm2, %v410_v54, %v411_v34  ;;  %v5771_v14 = vsel %vm422_vm2, %v411_v34, %v8300_v49  ;;  %v534_v34 = vrot.slane %v5735_v12, 1 }
  0x92   : > { %v4044_v2 = vunpack.i.h.bf16 %v4042_v0  ;;  %v4043_v40 = vunpack.i.l.bf16 %v4042_v0  ;;  %v1570_v7 = vsel %vm1569_vm9, %v1537_v52, %v4048_v33  ;;  %v1571_v43 = vsel %vm1569_vm9, %v1538_v62, %v4049_v59  ;;  %8388 = vst [vmem:[#allocation7_spill] sm:$0xff] %v5771_v14 }
  0x93   : > { %v5761_v22 = vpop.permute.xlu1 %4051  ;;  %4336 = vrot.lane.b32.xlu0 %v4335_v21, %s5163_s23  ;;  %v4350_v37 = vpack.i.bf16 %v5757_v16, %v5732_v42  ;;  %v5780_v33 = vsel %vm371_vm1, %v432_v51, 0.0  ;;  %v4019_v59 = vunpack.i.h.bf16 %v5693_v23 }
  0x94   : > { %v4053_v24 = vunpack.i.l.bf16 %v5761_v22  ;;  %v1603_v54 = vsel %vm1602_vm10, %v1570_v7, %v4043_v40  ;;  %v1604_v20 = vsel %vm1602_vm10, %v1571_v43, %v4044_v2  ;;  %v5789_v2 = vld [vmem:[%s5251_s18 + $0xb0] sm:$0xff]  ;;  %v4355_v23 = vpack.i.bf16 %v5771_v14, %v5780_v33 }
  0x95   : > { %4341 = vrot.lane.b32.xlu1 %v4320_v61, %s5164_s26  ;;  %v5783_v62 = vpop.permute.xlu0 %4056  ;;  %v1635_v21 = vpack.c.bf16 %v1604_v20, %v1603_v54  ;;  %v4029_v61 = vunpack.i.h.bf16 %v5714_v38  ;;  %v4360_v38 = vpack.i.bf16 %v5735_v12, %v5704_v1  ;;  %v8389_v54 = vpack.c.bf16 %v5417_v17, %v5393_v63 }
  0x96   : > { %v4058_v52 = vunpack.i.l.bf16 %v5783_v62  ;;  %v1409_v40 = vsel %vm1406_vm4, %v5295_v27, %v4053_v24  ;;  %v1408_v27 = vsel %vm1406_vm4, %v5303_v29, %v4019_v59  ;;  %v4365_v24 = vpack.i.bf16 %v5704_v1, %v5680_v46 }
  0x97   : > { %v4062_v0 = vpop.permute.xlu1 %4061  ;;  %4346 = vrot.lane.b32.xlu0 %v4325_v36, %s5161_s21  ;;  %1827 = vmatmul.mubr.bf16.vlgmr.msra.gmra.mxu0 %v1635_v21  ;;  %v8390_v20 = vrot.slane %v5704_v1, 1  ;;  %v535_v21 = vrot.slane %v5789_v2, 1  ;;  %v413_v29 = vrot.slane %v5789_v2, 7 }
  0x98   : > { %v4064_v7 = vunpack.i.h.bf16 %v4062_v0  ;;  %v4063_v51 = vunpack.i.l.bf16 %v4062_v0  ;;  %v1441_v43 = vsel %vm1438_vm5, %v1409_v40, %v4058_v52  ;;  %3932 = vmatprep.mubr.msk.bf16.mxu0 %vm1406_vm4, %v8389_v54  ;;  %v1440_v52 = vsel %vm1438_vm5, %v1408_v27, %v4029_v61  ;;  %v5817_v40 = vld [vmem:[%s5251_s18 + $0xb8] sm:$0xff] }
  0x99   : > { %4351 = vrot.lane.b32.xlu1 %v4350_v37, %s5165_s29  ;;  %v4067_v36 = vpop.permute.xlu0 %4066  ;;  %v5812_v37 = vsel %vm544_vm0, %v8390_v20, %v534_v34 }
  0x9a   : > { %v4069_v63 = vunpack.i.h.bf16 %v4067_v36  ;;  %v4068_v17 = vunpack.i.l.bf16 %v4067_v36  ;;  %v1473_v59 = vsel %vm1470_vm6, %v1440_v52, %v4063_v51  ;;  %v1474_v46 = vsel %vm1470_vm6, %v1441_v43, %v4064_v7 }
  0x9b   : > { %v4072_v0 = vpop.permute.xlu1 %4071  ;;  %4356 = vrot.lane.b32.xlu0 %v4355_v23, %s5166_s11  ;;  %v4370_v61 = vpack.i.bf16 %v5812_v37, %v5757_v16  ;;  %v553_v36 = vsel %vm544_vm0, %v534_v34, %v535_v21 }
  0x9c   : > { %v4074_v1 = vunpack.i.h.bf16 %v4072_v0  ;;  %v4073_v54 = vunpack.i.l.bf16 %v4072_v0  ;;  %v1506_v20 = vsel %vm1503_vm7, %v1473_v59, %v4068_v17  ;;  %v1507_v49 = vsel %vm1503_vm7, %v1474_v46, %v4069_v63 }
  0x9d   : > { %4361 = vrot.lane.b32.xlu1 %v4360_v38, %s5167_s14  ;;  %v4077_v27 = vpop.permute.xlu0 %4076  ;;  %v8391_v0 = vrot.slane %v5735_v12, 7  ;;  %v5843_v51 = vsel %vm388_vm3, %v553_v36, 0.0 }
  0x9e   : > { %v4079_v7 = vunpack.i.h.bf16 %v4077_v27  ;;  %v4078_v43 = vunpack.i.l.bf16 %v4077_v27  ;;  %v1539_v63 = vsel %vm1536_vm8, %v1506_v20, %v4073_v54  ;;  %v1540_v59 = vsel %vm1536_vm8, %v1507_v49, %v4074_v1 }
  0x9f   : > { %v4082_v52 = vpop.permute.xlu1 %4081  ;;  %v430_v17 = vsel %vm422_vm2, %v8391_v0, %v413_v29  ;;  %4366 = vrot.lane.b32.xlu0 %v4365_v24, %s5162_s22  ;;  %v8392_v1 = vrot.slane %v5817_v40, 7 }
  0xa0   : > { %v4084_v46 = vunpack.i.h.bf16 %v4082_v52  ;;  %v4083_v14 = vunpack.i.l.bf16 %v4082_v52  ;;  %v1572_v34 = vsel %vm1569_vm9, %v1539_v63, %v4078_v43  ;;  %v1573_v27 = vsel %vm1569_vm9, %v1540_v59, %v4079_v7  ;;  %v5865_v52 = vld [vmem:[%s5251_s18 + $0xc0] sm:$0xff] }
  0xa1   : > { %4371 = vrot.lane.b32.xlu1 %v4370_v61, %s5163_s23  ;;  %v5845_v0 = vpop.permute.xlu0 %4086  ;;  %v5853_v24 = vsel %vm422_vm2, %v413_v29, %v8392_v1  ;;  %v5857_v20 = vsel %vm371_vm1, %v430_v17, 0.0  ;;  %v4054_v61 = vunpack.i.h.bf16 %v5761_v22  ;;  %v4059_v63 = vunpack.i.h.bf16 %v5783_v62 }
  0xa2   : > { %v1605_v54 = vsel %vm1602_vm10, %v1572_v34, %v4083_v14  ;;  %v1606_v49 = vsel %vm1602_vm10, %v1573_v27, %v4084_v46  ;;  %v4088_v36 = vunpack.i.l.bf16 %v5845_v0  ;;  %v536_v14 = vrot.slane %v5817_v40, 1 }
  0xa3   : > { %v5861_v7 = vpop.permute.xlu1 %4091  ;;  %v1637_v43 = vpack.c.bf16 %v1606_v49, %v1605_v54  ;;  %4376 = vrot.lane.b32.xlu0 %v4355_v23, %s5164_s26  ;;  %v4385_v17 = vpack.i.bf16 %v5843_v51, %v5812_v37  ;;  %v4390_v59 = vpack.i.bf16 %v5853_v24, %v5857_v20  ;;  %v8393_v62 = vpack.c.bf16 %v5457_v39, %v5441_v30 }
  0xa4   : > { %v4093_v29 = vunpack.i.l.bf16 %v5861_v7  ;;  %v1411_v22 = vsel %vm1406_vm4, %v5309_v31, %v4088_v36  ;;  %v537_v23 = vrot.slane %v5865_v52, 1  ;;  %v1410_v27 = vsel %vm1406_vm4, %v5319_v35, %v4054_v61 }
  0xa5   : > { %1835 = vmatmul.mubr.bf16.gmra.mxu0 %v1637_v43  ;;  %4381 = vrot.lane.b32.xlu1 %v4360_v38, %s5161_s21  ;;  %v4097_v34 = vpop.permute.xlu0 %4096  ;;  %v5887_v49 = vsel %vm544_vm0, %v535_v21, %v536_v14  ;;  %v1442_v1 = vsel %vm1438_vm5, %v1410_v27, %v4059_v63  ;;  %v4395_v30 = vpack.i.bf16 %v5817_v40, %v5789_v2  ;;  %v415_v21 = vrot.slane %v5865_v52, 7 }
  0xa6   : > { %v1443_v46 = vsel %vm1438_vm5, %v1411_v22, %v4093_v29  ;;  %3933 = vmatprep.mubr.msk.bf16.mxu0 %vm1406_vm4, %v8393_v62  ;;  %v4099_v31 = vunpack.i.h.bf16 %v4097_v34  ;;  %v4098_v54 = vunpack.i.l.bf16 %v4097_v34  ;;  %v4400_v61 = vpack.i.bf16 %v5789_v2, %v5735_v12  ;;  %v5903_v22 = vld [vmem:[%s5251_s18 + $0xc8] sm:$0xff] }
  0xa7   : > { %v4102_v38 = vpop.permute.xlu1 %4101  ;;  %4386 = vrot.lane.b32.xlu0 %v4385_v17, %s5165_s29  ;;  %v4405_v17 = vpack.i.bf16 %v5887_v49, %v5843_v51  ;;  %v4089_v12 = vunpack.i.h.bf16 %v5845_v0 }
  0xa8   : > { %v4104_v36 = vunpack.i.h.bf16 %v4102_v38  ;;  %v4103_v43 = vunpack.i.l.bf16 %v4102_v38  ;;  %v1475_v39 = vsel %vm1470_vm6, %v1442_v1, %v4098_v54  ;;  %v1476_v35 = vsel %vm1470_vm6, %v1443_v46, %v4099_v31 }
  0xa9   : > { %4391 = vrot.lane.b32.xlu1 %v4390_v59, %s5166_s11  ;;  %v4107_v29 = vpop.permute.xlu0 %4106  ;;  %v551_v46 = vsel %vm544_vm0, %v536_v14, %v537_v23 }
  0xaa   : > { %v1509_v63 = vsel %vm1503_vm7, %v1476_v35, %v4104_v36  ;;  %v4109_v34 = vunpack.i.h.bf16 %v4107_v29  ;;  %v4108_v62 = vunpack.i.l.bf16 %v4107_v29  ;;  %v1508_v2 = vsel %vm1503_vm7, %v1475_v39, %v4103_v43 }
  0xab   : > { %v4112_v27 = vpop.permute.xlu1 %4111  ;;  %4396 = vrot.lane.b32.xlu0 %v4395_v30, %s5167_s14  ;;  %v416_v36 = vrot.slane %v5903_v22, 7  ;;  %v8394_v35 = vrot.slane %v5817_v40, 7  ;;  %v5923_v39 = vsel %vm388_vm3, %v551_v46, 0.0  ;;  %v4094_v29 = vunpack.i.h.bf16 %v5861_v7 }
  0xac   : > { %v4114_v31 = vunpack.i.h.bf16 %v4112_v27  ;;  %v4113_v54 = vunpack.i.l.bf16 %v4112_v27  ;;  %v1541_v38 = vsel %vm1536_vm8, %v1508_v2, %v4108_v62  ;;  %v1542_v1 = vsel %vm1536_vm8, %v1509_v63, %v4109_v34 }
  0xad   : > { %4401 = vrot.lane.b32.xlu1 %v4400_v61, %s5162_s22  ;;  %v428_v14 = vsel %vm422_vm2, %v8394_v35, %v415_v21  ;;  %v4117_v0 = vpop.permute.xlu0 %4116  ;;  %v1412_v61 = vsel %vm1406_vm4, %v5377_v57, %v4089_v12  ;;  %v4420_v57 = vpack.i.bf16 %v5923_v39, %v5887_v49 }
  0xae   : > { %v1575_v43 = vsel %vm1569_vm9, %v1542_v1, %v4114_v31  ;;  %v4119_v62 = vunpack.i.h.bf16 %v4117_v0  ;;  %v4118_v63 = vunpack.i.l.bf16 %v4117_v0  ;;  %v1574_v2 = vsel %vm1569_vm9, %v1541_v38, %v4113_v54  ;;  %v5956_v0 = vld [vmem:[%s5251_s18 + $0xd0] sm:$0xff] }
  0xaf   : > { %v5926_v34 = vpop.permute.xlu1 %4121  ;;  %4406 = vrot.lane.b32.xlu0 %v4405_v17, %s5163_s23  ;;  %v5935_v46 = vsel %vm371_vm1, %v428_v14, 0.0  ;;  %v5946_v17 = vsel %vm422_vm2, %v415_v21, %v416_v36  ;;  %v1444_v1 = vsel %vm1438_vm5, %v1412_v61, %v4094_v29  ;;  %v4430_v29 = vpack.i.bf16 %v5903_v22, %v5865_v52 }
  0xb0   : > { %v4123_v27 = vunpack.i.l.bf16 %v5926_v34  ;;  %v1607_v7 = vsel %vm1602_vm10, %v1574_v2, %v4118_v63  ;;  %v1608_v31 = vsel %vm1602_vm10, %v1575_v43, %v4119_v62  ;;  %v8395_v63 = vpack.c.bf16 %v5501_v60, %v5491_v53 }
  0xb1   : > { %4411 = vrot.lane.b32.xlu1 %v4390_v59, %s5164_s26  ;;  %v5950_v54 = vpop.permute.xlu0 %4126  ;;  %v1639_v38 = vpack.c.bf16 %v1608_v31, %v1607_v7  ;;  %v538_v59 = vrot.slane %v5903_v22, 1  ;;  %v539_v7 = vrot.slane %v5956_v0, 1  ;;  %v5979_v31 = vld [vmem:[%s5251_s18 + $0xd8] sm:$0xff]  ;;  %v417_v60 = vrot.slane %v5956_v0, 7 }
  0xb2   : > { %v1413_v12 = vsel %vm1406_vm4, %v5373_v56, %v4123_v27  ;;  %v4128_v35 = vunpack.i.l.bf16 %v5950_v54  ;;  %v4425_v56 = vpack.i.bf16 %v5946_v17, %v5935_v46 }
  0xb3   : > { %v4132_v14 = vpop.permute.xlu1 %4131  ;;  %4416 = vrot.lane.b32.xlu0 %v4395_v30, %s5161_s21  ;;  %1843 = vmatmul.mubr.bf16.gmra.mxu0 %v1639_v38  ;;  %v5975_v2 = vsel %vm544_vm0, %v537_v23, %v538_v59 }
  0xb4   : > { %v4134_v43 = vunpack.i.h.bf16 %v4132_v14  ;;  %v4133_v62 = vunpack.i.l.bf16 %v4132_v14  ;;  %v1445_v21 = vsel %vm1438_vm5, %v1413_v12, %v4128_v35  ;;  %3934 = vmatprep.mubr.msk.bf16.mxu0 %vm1406_vm4, %v8395_v63  ;;  %v4435_v35 = vpack.i.bf16 %v5865_v52, %v5817_v40 }
  0xb5   : > { %4421 = vrot.lane.b32.xlu1 %v4420_v57, %s5165_s29  ;;  %v4137_v27 = vpop.permute.xlu0 %4136  ;;  %v549_v40 = vsel %vm544_vm0, %v538_v59, %v539_v7  ;;  %v4124_v52 = vunpack.i.h.bf16 %v5926_v34 }
  0xb6   : > { %v1477_v61 = vsel %vm1470_vm6, %v1444_v1, %v4133_v62  ;;  %v1478_v30 = vsel %vm1470_vm6, %v1445_v21, %v4134_v43  ;;  %v4139_v57 = vunpack.i.h.bf16 %v4137_v27  ;;  %v4138_v12 = vunpack.i.l.bf16 %v4137_v27 }
  0xb7   : > { %v4142_v53 = vpop.permute.xlu1 %4141  ;;  %4426 = vrot.lane.b32.xlu0 %v4425_v56, %s5166_s11  ;;  %v4440_v43 = vpack.i.bf16 %v5975_v2, %v5923_v39  ;;  %v418_v62 = vrot.slane %v5979_v31, 7  ;;  %v6008_v34 = vsel %vm388_vm3, %v549_v40, 0.0 }
  0xb8   : > { %v4144_v38 = vunpack.i.h.bf16 %v4142_v53  ;;  %v4143_v1 = vunpack.i.l.bf16 %v4142_v53  ;;  %v1510_v14 = vsel %vm1503_vm7, %v1477_v61, %v4138_v12  ;;  %v1511_v23 = vsel %vm1503_vm7, %v1478_v30, %v4139_v57 }
  0xb9   : > { %4431 = vrot.lane.b32.xlu1 %v4430_v29, %s5167_s14  ;;  %v4147_v27 = vpop.permute.xlu0 %4146  ;;  %v426_v12 = vsel %vm422_vm2, %v416_v36, %v417_v60  ;;  %v6014_v36 = vsel %vm422_vm2, %v417_v60, %v418_v62 }
  0xba   : > { %v1543_v21 = vsel %vm1536_vm8, %v1510_v14, %v4143_v1  ;;  %v1544_v63 = vsel %vm1536_vm8, %v1511_v23, %v4144_v38  ;;  %v4149_v61 = vunpack.i.h.bf16 %v4147_v27  ;;  %v4148_v30 = vunpack.i.l.bf16 %v4147_v27 }
  0xbb   : > { %v4152_v57 = vpop.permute.xlu1 %4151  ;;  %4436 = vrot.lane.b32.xlu0 %v4435_v35, %s5162_s22  ;;  %v4129_v14 = vunpack.i.h.bf16 %v5950_v54 }
  0xbc   : > { %v4154_v53 = vunpack.i.h.bf16 %v4152_v57  ;;  %v4153_v1 = vunpack.i.l.bf16 %v4152_v57  ;;  %v1576_v38 = vsel %vm1569_vm9, %v1543_v21, %v4148_v30  ;;  %v1577_v59 = vsel %vm1569_vm9, %v1544_v63, %v4149_v61  ;;  %v6036_v57 = vld [vmem:[%s5251_s18 + $0xe0] sm:$0xff] }
  0xbd   : > { %4441 = vrot.lane.b32.xlu1 %v4440_v43, %s5163_s23  ;;  %v6017_v35 = vpop.permute.xlu0 %4156  ;;  %v6023_v21 = vsel %vm371_vm1, %v426_v12, 0.0  ;;  %v1414_v63 = vsel %vm1406_vm4, %v5425_v19, %v4124_v52  ;;  %v4455_v61 = vpack.i.bf16 %v6008_v34, %v5975_v2  ;;  %v540_v30 = vrot.slane %v5979_v31, 1 }
  0xbe   : > { %v1609_v23 = vsel %vm1602_vm10, %v1576_v38, %v4153_v1  ;;  %v1610_v43 = vsel %vm1602_vm10, %v1577_v59, %v4154_v53  ;;  %v4158_v27 = vunpack.i.l.bf16 %v6017_v35  ;;  %v4460_v19 = vpack.i.bf16 %v6014_v36, %v6023_v21 }
  0xbf   : > { %v6028_v40 = vpop.permute.xlu1 %4161  ;;  %v1641_v60 = vpack.c.bf16 %v1610_v43, %v1609_v23  ;;  %4446 = vrot.lane.b32.xlu0 %v4425_v56, %s5164_s26  ;;  %v1446_v52 = vsel %vm1438_vm5, %v1414_v63, %v4129_v14  ;;  %v8396_v1 = vpack.c.bf16 %v5522_v11, %v5518_v8  ;;  %v541_v23 = vrot.slane %v6036_v57, 1 }
  0xc0   : > { %v4163_v54 = vunpack.i.l.bf16 %v6028_v40  ;;  %v1415_v12 = vsel %vm1406_vm4, %v5421_v18, %v4158_v27  ;;  %v4465_v14 = vpack.i.bf16 %v5979_v31, %v5956_v0  ;;  %v6057_v63 = vsel %vm544_vm0, %v539_v7, %v540_v30 }
  0xc1   : > { %1851 = vmatmul.mubr.bf16.gmra.mxu0 %v1641_v60  ;;  %4451 = vrot.lane.b32.xlu1 %v4430_v29, %s5161_s21  ;;  %v4167_v53 = vpop.permute.xlu0 %4166  ;;  %v4470_v27 = vpack.i.bf16 %v5956_v0, %v5903_v22  ;;  %v6065_v60 = vld [vmem:[%s5251_s18 + $0xe8] sm:$0xff]  ;;  %v547_v22 = vsel %vm544_vm0, %v540_v30, %v541_v23  ;;  %v4159_v0 = vunpack.i.h.bf16 %v6017_v35 }
  0xc2   : > { %v1447_v56 = vsel %vm1438_vm5, %v1415_v12, %v4163_v54  ;;  %3935 = vmatprep.mubr.msk.bf16.mxu0 %vm1406_vm4, %v8396_v1  ;;  %v4169_v38 = vunpack.i.h.bf16 %v4167_v53  ;;  %v4168_v59 = vunpack.i.l.bf16 %v4167_v53  ;;  %v419_v53 = vrot.slane %v6036_v57, 7 }
  0xc3   : > { %v4172_v18 = vpop.permute.xlu1 %4171  ;;  %4456 = vrot.lane.b32.xlu0 %v4455_v61, %s5165_s29  ;;  %v6086_v35 = vsel %vm388_vm3, %v547_v22, 0.0 }
  0xc4   : > { %v4174_v29 = vunpack.i.h.bf16 %v4172_v18  ;;  %v4173_v43 = vunpack.i.l.bf16 %v4172_v18  ;;  %v1479_v8 = vsel %vm1470_vm6, %v1446_v52, %v4168_v59  ;;  %v1480_v11 = vsel %vm1470_vm6, %v1447_v56, %v4169_v38 }
  0xc5   : > { %4461 = vrot.lane.b32.xlu1 %v4460_v19, %s5166_s11  ;;  %v4177_v12 = vpop.permute.xlu0 %4176  ;;  %v4475_v52 = vpack.i.bf16 %v6057_v63, %v6008_v34  ;;  %v420_v59 = vrot.slane %v6065_v60, 7  ;;  %v424_v30 = vsel %vm422_vm2, %v418_v62, %v419_v53 }
  0xc6   : > { %v1512_v54 = vsel %vm1503_vm7, %v1479_v8, %v4173_v43  ;;  %v1513_v61 = vsel %vm1503_vm7, %v1480_v11, %v4174_v29  ;;  %v4179_v7 = vunpack.i.h.bf16 %v4177_v12  ;;  %v4178_v1 = vunpack.i.l.bf16 %v4177_v12 }
  0xc7   : > { %v4182_v18 = vpop.permute.xlu1 %4181  ;;  %4466 = vrot.lane.b32.xlu0 %v4465_v14, %s5167_s14  ;;  %v6103_v22 = vsel %vm422_vm2, %v419_v53, %v420_v59 }
  0xc8   : > { %v4184_v56 = vunpack.i.h.bf16 %v4182_v18  ;;  %v4183_v38 = vunpack.i.l.bf16 %v4182_v18  ;;  %v1545_v29 = vsel %vm1536_vm8, %v1512_v54, %v4178_v1  ;;  %v1546_v43 = vsel %vm1536_vm8, %v1513_v61, %v4179_v7 }
  0xc9   : > { %4471 = vrot.lane.b32.xlu1 %v4470_v27, %s5162_s22  ;;  %v4187_v8 = vpop.permute.xlu0 %4186  ;;  %v4164_v54 = vunpack.i.h.bf16 %v6028_v40  ;;  %v1416_v27 = vsel %vm1406_vm4, %v5474_v45, %v4159_v0  ;;  %v4490_v45 = vpack.i.bf16 %v6086_v35, %v6057_v63  ;;  %v6112_v0 = vsel %vm371_vm1, %v424_v30, 0.0 }
  0xca   : > { %v1578_v11 = vsel %vm1569_vm9, %v1545_v29, %v4183_v38  ;;  %v1579_v12 = vsel %vm1569_vm9, %v1546_v43, %v4184_v56  ;;  %v4189_v1 = vunpack.i.h.bf16 %v4187_v8  ;;  %v4188_v61 = vunpack.i.l.bf16 %v4187_v8  ;;  %v6122_v8 = vld [vmem:[%s5251_s18 + $0xf0] sm:$0xff] }
  0xcb   : > { %v6093_v7 = vpop.permute.xlu1 %4191  ;;  %4476 = vrot.lane.b32.xlu0 %v4475_v52, %s5163_s23  ;;  %v542_v38 = vrot.slane %v6065_v60, 1 }
  0xcc   : > { %v4193_v18 = vunpack.i.l.bf16 %v6093_v7  ;;  %v1611_v62 = vsel %vm1602_vm10, %v1578_v11, %v4188_v61  ;;  %v1612_v40 = vsel %vm1602_vm10, %v1579_v12, %v4189_v1  ;;  %v8397_v1 = vpack.c.bf16 %v5564_v41, %v5560_v32 }
  0xcd   : > { %4481 = vrot.lane.b32.xlu1 %v4460_v19, %s5164_s26  ;;  %v6116_v56 = vpop.permute.xlu0 %4196  ;;  %v1643_v53 = vpack.c.bf16 %v1612_v40, %v1611_v62  ;;  %v1448_v19 = vsel %vm1438_vm5, %v1416_v27, %v4164_v54  ;;  %v4500_v54 = vpack.i.bf16 %v6065_v60, %v6036_v57  ;;  %v543_v62 = vrot.slane %v6122_v8, 1 }
  0xce   : > { %v1417_v52 = vsel %vm1406_vm4, %v5470_v44, %v4193_v18  ;;  %v4198_v29 = vunpack.i.l.bf16 %v6116_v56  ;;  %v4495_v44 = vpack.i.bf16 %v6103_v22, %v6112_v0  ;;  %v6141_v18 = vsel %vm544_vm0, %v541_v23, %v542_v38 }
  0xcf   : > { %v4202_v43 = vpop.permute.xlu1 %4201  ;;  %4486 = vrot.lane.b32.xlu0 %v4465_v14, %s5161_s21  ;;  %1859 = vmatmul.mubr.bf16.gmra.mxu0 %v1643_v53  ;;  %v605_v32 = vrot.slane %v6122_v8, 7  ;;  %v4510_v23 = vpack.i.bf16 %v6141_v18, %v6086_v35 }
  0xd0   : > { %v4204_v11 = vunpack.i.h.bf16 %v4202_v43  ;;  %v4203_v12 = vunpack.i.l.bf16 %v4202_v43  ;;  %v1449_v30 = vsel %vm1438_vm5, %v1417_v52, %v4198_v29  ;;  %3936 = vmatprep.mubr.msk.bf16.mxu0 %vm1406_vm4, %v8397_v1  ;;  %v545_v1 = vsel %vm544_vm0, %v542_v38, %v543_v62 }
  0xd1   : > { %4491 = vrot.lane.b32.xlu1 %v4490_v45, %s5165_s29  ;;  %v4207_v27 = vpop.permute.xlu0 %4206 }
  0xd2   : > { %v1481_v61 = vsel %vm1470_vm6, %v1448_v19, %v4203_v12  ;;  %v1482_v14 = vsel %vm1470_vm6, %v1449_v30, %v4204_v11  ;;  %v4209_v40 = vunpack.i.h.bf16 %v4207_v27  ;;  %v4208_v45 = vunpack.i.l.bf16 %v4207_v27 }
  0xd3   : > { %v4212_v52 = vpop.permute.xlu1 %4211  ;;  %4496 = vrot.lane.b32.xlu0 %v4495_v44, %s5166_s11  ;;  %v4505_v19 = vpack.i.bf16 %v6036_v57, %v5979_v31  ;;  %v4194_v31 = vunpack.i.h.bf16 %v6093_v7  ;;  %v607_v27 = vsel %vm422_vm2, %v420_v59, %v605_v32  ;;  %v6170_v7 = vsel %vm388_vm3, %v545_v1, 0.0 }
  0xd4   : > { %v4214_v41 = vunpack.i.h.bf16 %v4212_v52  ;;  %v4213_v53 = vunpack.i.l.bf16 %v4212_v52  ;;  %v1514_v29 = vsel %vm1503_vm7, %v1481_v61, %v4208_v45  ;;  %v1515_v43 = vsel %vm1503_vm7, %v1482_v14, %v4209_v40 }
  0xd5   : > { %4501 = vrot.lane.b32.xlu1 %v4500_v54, %s5167_s14  ;;  %v4217_v30 = vpop.permute.xlu0 %4216  ;;  %v4199_v59 = vunpack.i.h.bf16 %v6116_v56  ;;  %v4525_v56 = vpack.i.bf16 %v6170_v7, %v6141_v18 }
  0xd6   : > { %v1547_v11 = vsel %vm1536_vm8, %v1514_v29, %v4213_v53  ;;  %v1548_v12 = vsel %vm1536_vm8, %v1515_v43, %v4214_v41  ;;  %v4219_v57 = vunpack.i.h.bf16 %v4217_v30  ;;  %v4218_v61 = vunpack.i.l.bf16 %v4217_v30 }
  0xd7   : > { %v4222_v14 = vpop.permute.xlu1 %4221  ;;  %4506 = vrot.lane.b32.xlu0 %v4505_v19, %s5162_s22  ;;  %v8398_v41 = vrot.slane %v5261_v9, 7 }
  0xd8   : > { %v4224_v40 = vunpack.i.h.bf16 %v4222_v14  ;;  %v4223_v45 = vunpack.i.l.bf16 %v4222_v14  ;;  %v1580_v52 = vsel %vm1569_vm9, %v1547_v11, %v4218_v61  ;;  %v1581_v38 = vsel %vm1569_vm9, %v1548_v12, %v4219_v57 }
  0xd9   : > { %4511 = vrot.lane.b32.xlu1 %v4510_v23, %s5163_s23  ;;  %v606_v53 = vsel %vm422_vm2, %v605_v32, %v8398_v41  ;;  %v4227_v29 = vpop.permute.xlu0 %4226  ;;  %v608_v23 = vsel %vm371_vm1, %v607_v27, 0.0  ;;  %v1418_v11 = vsel %vm1406_vm4, %v5530_v15, %v4194_v31  ;;  %v8399_v14 = vpack.c.bf16 %v5609_v55, %v5605_v48 }
  0xda   : > { %v1613_v19 = vsel %vm1602_vm10, %v1580_v52, %v4223_v45  ;;  %v1614_v43 = vsel %vm1602_vm10, %v1581_v38, %v4224_v40  ;;  %v4228_v12 = vunpack.i.l.bf16 %v4227_v29  ;;  %v4530_v57 = vpack.i.bf16 %v606_v53, %v608_v23 }
  0xdb   : > { %v4232_v30 = vpop.permute.xlu1 %4231  ;;  %v1645_v1 = vpack.c.bf16 %v1614_v43, %v1613_v19  ;;  %4516 = vrot.lane.b32.xlu0 %v4495_v44, %s5164_s26  ;;  %v1450_v61 = vsel %vm1438_vm5, %v1418_v11, %v4199_v59  ;;  %v4229_v23 = vunpack.i.h.bf16 %v4227_v29 }
  0xdc   : > { %v4233_v9 = vunpack.i.l.bf16 %v4232_v30  ;;  %v1419_v32 = vsel %vm1406_vm4, %v5526_v13, %v4228_v12  ;;  %v6197_v13 = vld [vmem:[%s5251_s18 + $0xf8] sm:$0xff] }
  0xdd   : > { %1867 = vmatmul.mubr.bf16.gmra.mxu0 %v1645_v1  ;;  %4521 = vrot.lane.b32.xlu1 %v4500_v54, %s5161_s21  ;;  %v4237_v31 = vpop.permute.xlu0 %4236  ;;  %v4535_v54 = vpack.i.bf16 %v6197_v13, %v6122_v8  ;;  %v1420_v29 = vsel %vm1406_vm4, %v5578_v50, %v4229_v23 }
  0xde   : > { %v1451_v15 = vsel %vm1438_vm5, %v1419_v32, %v4233_v9  ;;  %3937 = vmatprep.mubr.msk.bf16.mxu0 %vm1406_vm4, %v8399_v14  ;;  %v4239_v44 = vunpack.i.h.bf16 %v4237_v31  ;;  %v4238_v27 = vunpack.i.l.bf16 %v4237_v31 }
  0xdf   : > { %v4242_v40 = vpop.permute.xlu1 %4241  ;;  %4526 = vrot.lane.b32.xlu0 %v4525_v56, %s5165_s29 }
  0xe0   : > { %v4244_v45 = vunpack.i.h.bf16 %v4242_v40  ;;  %v4243_v52 = vunpack.i.l.bf16 %v4242_v40  ;;  %v1483_v38 = vsel %vm1470_vm6, %v1450_v61, %v4238_v27  ;;  %v1484_v41 = vsel %vm1470_vm6, %v1451_v15, %v4239_v44 }
  0xe1   : > { %4531 = vrot.lane.b32.xlu1 %v4530_v57, %s5166_s11  ;;  %v4247_v53 = vpop.permute.xlu0 %4246  ;;  %v4234_v15 = vunpack.i.h.bf16 %v4232_v30 }
  0xe2   : > { %v1516_v48 = vsel %vm1503_vm7, %v1483_v38, %v4243_v52  ;;  %v1517_v55 = vsel %vm1503_vm7, %v1484_v41, %v4244_v45  ;;  %v4249_v59 = vunpack.i.h.bf16 %v4247_v53  ;;  %v4248_v19 = vunpack.i.l.bf16 %v4247_v53 }
  0xe3   : > { %v4252_v43 = vpop.permute.xlu1 %4251  ;;  %4536 = vrot.lane.b32.xlu0 %v4535_v54, %s5167_s14  ;;  %v1452_v30 = vsel %vm1438_vm5, %v1420_v29, %v4234_v15 }
  0xe4   : > { %v4254_v11 = vunpack.i.h.bf16 %v4252_v43  ;;  %v4253_v12 = vunpack.i.l.bf16 %v4252_v43  ;;  %v1549_v1 = vsel %vm1536_vm8, %v1516_v48, %v4248_v19  ;;  %v1550_v9 = vsel %vm1536_vm8, %v1517_v55, %v4249_v59 }
  0xe5   : > { %4541 = vrot.lane.b32.xlu1 %v4530_v57, %s5164_s26  ;;  %v4257_v56 = vpop.permute.xlu0 %4256 }
  0xe6   : > { %v1582_v32 = vsel %vm1569_vm9, %v1549_v1, %v4253_v12  ;;  %v1583_v61 = vsel %vm1569_vm9, %v1550_v9, %v4254_v11  ;;  %v4259_v31 = vunpack.i.h.bf16 %v4257_v56  ;;  %v4258_v14 = vunpack.i.l.bf16 %v4257_v56 }
  0xe7   : > { %v4262_v44 = vpop.permute.xlu1 %4261  ;;  %4546 = vrot.lane.b32.xlu0 %v4535_v54, %s5161_s21  ;;  %v8400_v54 = vpack.c.bf16 %v5657_v4, %v5653_v26 }
  0xe8   : > { %v4263_v27 = vunpack.i.l.bf16 %v4262_v44  ;;  %v1615_v40 = vsel %vm1602_vm10, %v1582_v32, %v4258_v14  ;;  %v1616_v45 = vsel %vm1602_vm10, %v1583_v61, %v4259_v31  ;;  %v4264_v61 = vunpack.i.h.bf16 %v4262_v44 }
  0xe9   : > { %v4267_v52 = vpop.permute.xlu0 %4266  ;;  %v1647_v38 = vpack.c.bf16 %v1616_v45, %v1615_v40 }
  0xea   : > { %v1421_v57 = vsel %vm1406_vm4, %v5574_v47, %v4263_v27  ;;  %v4268_v41 = vunpack.i.l.bf16 %v4267_v52  ;;  %v1422_v44 = vsel %vm1406_vm4, %v5617_v28, %v4264_v61 }
  0xeb   : > { %v4272_v48 = vpop.permute.xlu1 %4271  ;;  %1875 = vmatmul.mubr.bf16.gmra.mxu0 %v1647_v38 }
  0xec   : > { %v4274_v55 = vunpack.i.h.bf16 %v4272_v48  ;;  %v4273_v53 = vunpack.i.l.bf16 %v4272_v48  ;;  %v1453_v50 = vsel %vm1438_vm5, %v1421_v57, %v4268_v41  ;;  %3938 = vmatprep.mubr.msk.bf16.mxu0 %vm1406_vm4, %v8400_v54  ;;  %v4269_v57 = vunpack.i.h.bf16 %v4267_v52 }
  0xed   : > { %v4277_v19 = vpop.permute.xlu0 %4276  ;;  %v1652_v48 = vpack.c.bf16 %v5757_v16, %v5732_v42 }
  0xee   : > { %v1485_v59 = vsel %vm1470_vm6, %v1452_v30, %v4273_v53  ;;  %v1486_v47 = vsel %vm1470_vm6, %v1453_v50, %v4274_v55  ;;  %v4279_v43 = vunpack.i.h.bf16 %v4277_v19  ;;  %v4278_v23 = vunpack.i.l.bf16 %v4277_v19 }
  0xef   : > { %v4282_v11 = vpop.permute.xlu1 %4281  ;;  %v1454_v52 = vsel %vm1438_vm5, %v1422_v44, %v4269_v57 }
  0xf0   : > { %v4284_v12 = vunpack.i.h.bf16 %v4282_v11  ;;  %v4283_v1 = vunpack.i.l.bf16 %v4282_v11  ;;  %v1518_v9 = vsel %vm1503_vm7, %v1485_v59, %v4278_v23  ;;  %v1519_v56 = vsel %vm1503_vm7, %v1486_v47, %v4279_v43 }
  0xf1   : > { %v4287_v4 = vpop.permute.xlu0 %4286 }
  0xf2   : > { %v1551_v32 = vsel %vm1536_vm8, %v1518_v9, %v4283_v1  ;;  %v1552_v26 = vsel %vm1536_vm8, %v1519_v56, %v4284_v12  ;;  %v4289_v15 = vunpack.i.h.bf16 %v4287_v4  ;;  %v4288_v31 = vunpack.i.l.bf16 %v4287_v4 }
  0xf3   : > { %v4292_v14 = vpop.permute.xlu1 %4291 }
  0xf4   : > { %v4294_v29 = vunpack.i.h.bf16 %v4292_v14  ;;  %v4293_v27 = vunpack.i.l.bf16 %v4292_v14  ;;  %v1584_v40 = vsel %vm1569_vm9, %v1551_v32, %v4288_v31  ;;  %v1585_v45 = vsel %vm1569_vm9, %v1552_v26, %v4289_v15 }
  0xf5   : > { %v4297_v38 = vpop.permute.xlu0 %4296 }
  0xf6   : > { %v1617_v30 = vsel %vm1602_vm10, %v1584_v40, %v4293_v27  ;;  %v1618_v41 = vsel %vm1602_vm10, %v1585_v45, %v4294_v29  ;;  %v4298_v55 = vunpack.i.l.bf16 %v4297_v38  ;;  %v4299_v4 = vunpack.i.h.bf16 %v4297_v38 }
  0xf7   : > { %v4302_v53 = vpop.permute.xlu1 %4301  ;;  %v1649_v50 = vpack.c.bf16 %v1618_v41, %v1617_v30 }
  0xf8   : > { %v4303_v54 = vunpack.i.l.bf16 %v4302_v53  ;;  %v1423_v59 = vsel %vm1406_vm4, %v5613_v25, %v4298_v55  ;;  %v4304_v45 = vunpack.i.h.bf16 %v4302_v53 }
  0xf9   : > { %1883 = vmatmul.mubr.bf16.gmra.mxu0 %v1649_v50  ;;  %v4307_v19 = vpop.permute.xlu0 %4306  ;;  %v1654_v50 = vpack.c.bf16 %v5843_v51, %v5812_v37 }
  0xfa   : > { %v1455_v47 = vsel %vm1438_vm5, %v1423_v59, %v4303_v54  ;;  %3939 = vmatprep.mubr.msk.bf16.mxu0 %vm1406_vm4, %v1652_v48  ;;  %v4309_v43 = vunpack.i.h.bf16 %v4307_v19  ;;  %v4308_v42 = vunpack.i.l.bf16 %v4307_v19  ;;  %v1424_v48 = vsel %vm1406_vm4, %v5671_v58, %v4299_v4 }
  0xfb   : > { %v4312_v16 = vpop.permute.xlu1 %4311  ;;  %v1456_v53 = vsel %vm1438_vm5, %v1424_v48, %v4304_v45  ;;  %v1656_v48 = vpack.c.bf16 %v5923_v39, %v5887_v49 }
  0xfc   : > { %v4314_v23 = vunpack.i.h.bf16 %v4312_v16  ;;  %v4313_v28 = vunpack.i.l.bf16 %v4312_v16  ;;  %v1487_v11 = vsel %vm1470_vm6, %v1454_v52, %v4308_v42  ;;  %v1488_v12 = vsel %vm1470_vm6, %v1455_v47, %v4309_v43 }
  0xfd   : > { %v4317_v9 = vpop.permute.xlu0 %4316 }
  0xfe   : > { %v1520_v1 = vsel %vm1503_vm7, %v1487_v11, %v4313_v28  ;;  %v1521_v25 = vsel %vm1503_vm7, %v1488_v12, %v4314_v23  ;;  %v4319_v56 = vunpack.i.h.bf16 %v4317_v9  ;;  %v4318_v32 = vunpack.i.l.bf16 %v4317_v9 }
  0xff   : > { %v4322_v26 = vpop.permute.xlu1 %4321 }
 0x100   : > { %v4324_v61 = vunpack.i.h.bf16 %v4322_v26  ;;  %v4323_v15 = vunpack.i.l.bf16 %v4322_v26  ;;  %v1553_v31 = vsel %vm1536_vm8, %v1520_v1, %v4318_v32  ;;  %v1554_v14 = vsel %vm1536_vm8, %v1521_v25, %v4319_v56 }
 0x101   : > { %v4327_v29 = vpop.permute.xlu0 %4326 }
 0x102   : > { %v1586_v27 = vsel %vm1569_vm9, %v1553_v31, %v4323_v15  ;;  %v1587_v40 = vsel %vm1569_vm9, %v1554_v14, %v4324_v61  ;;  %v4329_v57 = vunpack.i.h.bf16 %v4327_v29  ;;  %v4328_v30 = vunpack.i.l.bf16 %v4327_v29 }
 0x103   : > { %v4332_v41 = vpop.permute.xlu1 %4331 }
 0x104   : > { %v4333_v44 = vunpack.i.l.bf16 %v4332_v41  ;;  %v1619_v38 = vsel %vm1602_vm10, %v1586_v27, %v4328_v30  ;;  %v1620_v55 = vsel %vm1602_vm10, %v1587_v40, %v4329_v57  ;;  %v4334_v26 = vunpack.i.h.bf16 %v4332_v41 }
 0x105   : > { %v4337_v59 = vpop.permute.xlu0 %4336  ;;  %v1651_v52 = vpack.c.bf16 %v1620_v55, %v1619_v38 }
 0x106   : > { %v1425_v54 = vsel %vm1406_vm4, %v5667_v6, %v4333_v44  ;;  %v4338_v47 = vunpack.i.l.bf16 %v4337_v59  ;;  %v4339_v40 = vunpack.i.h.bf16 %v4337_v59  ;;  %v8401_v44 = vld [vmem:[#allocation5_spill] sm:$0xff] }
 0x107   : > { %v4342_v19 = vpop.permute.xlu1 %4341  ;;  %1891 = vmatmul.mubr.bf16.gmra.mxu0 %v1651_v52  ;;  %v1426_v41 = vsel %vm1406_vm4, %v8401_v44, %v4334_v26  ;;  %v8402_v52 = vld [vmem:[#allocation4_spill] sm:$0xff] }
 0x108   : > { %v4344_v43 = vunpack.i.h.bf16 %v4342_v19  ;;  %v4343_v58 = vunpack.i.l.bf16 %v4342_v19  ;;  %v1457_v42 = vsel %vm1438_vm5, %v1425_v54, %v4338_v47  ;;  %3940 = vmatprep.mubr.msk.bf16.mxu0 %vm1406_vm4, %v1654_v50  ;;  %v1458_v59 = vsel %vm1438_vm5, %v1426_v41, %v4339_v40 }
 0x109   : > { %v4347_v51 = vpop.permute.xlu0 %4346 }
 0x10a   : > { %v1489_v16 = vsel %vm1470_vm6, %v1456_v53, %v4343_v58  ;;  %v1490_v37 = vsel %vm1470_vm6, %v1457_v42, %v4344_v43  ;;  %v4349_v23 = vunpack.i.h.bf16 %v4347_v51  ;;  %v4348_v6 = vunpack.i.l.bf16 %v4347_v51 }
 0x10b   : > { %v4352_v28 = vpop.permute.xlu1 %4351 }
 0x10c   : > { %v4354_v11 = vunpack.i.h.bf16 %v4352_v28  ;;  %v4353_v12 = vunpack.i.l.bf16 %v4352_v28  ;;  %v1522_v1 = vsel %vm1503_vm7, %v1489_v16, %v4348_v6  ;;  %v1523_v25 = vsel %vm1503_vm7, %v1490_v37, %v4349_v23 }
 0x10d   : > { %v4357_v32 = vpop.permute.xlu0 %4356 }
 0x10e   : > { %v1555_v9 = vsel %vm1536_vm8, %v1522_v1, %v4353_v12  ;;  %v1556_v56 = vsel %vm1536_vm8, %v1523_v25, %v4354_v11  ;;  %v4359_v4 = vunpack.i.h.bf16 %v4357_v32  ;;  %v4358_v61 = vunpack.i.l.bf16 %v4357_v32 }
 0x10f   : > { %v4362_v15 = vpop.permute.xlu1 %4361 }
 0x110   : > { %v4364_v31 = vunpack.i.h.bf16 %v4362_v15  ;;  %v4363_v14 = vunpack.i.l.bf16 %v4362_v15  ;;  %v1588_v29 = vsel %vm1569_vm9, %v1555_v9, %v4358_v61  ;;  %v1589_v27 = vsel %vm1569_vm9, %v1556_v56, %v4359_v4 }
 0x111   : > { %v4367_v45 = vpop.permute.xlu0 %4366 }
 0x112   : > { %v1621_v57 = vsel %vm1602_vm10, %v1588_v29, %v4363_v14  ;;  %v1622_v30 = vsel %vm1602_vm10, %v1589_v27, %v4364_v31  ;;  %v4368_v38 = vunpack.i.l.bf16 %v4367_v45  ;;  %v4369_v1 = vunpack.i.h.bf16 %v4367_v45 }
 0x113   : > { %v4372_v55 = vpop.permute.xlu1 %4371  ;;  %v1653_v50 = vpack.c.bf16 %v1622_v30, %v1621_v57  ;;  %v1658_v30 = vpack.c.bf16 %v6008_v34, %v5975_v2 }
 0x114   : > { %v4373_v54 = vunpack.i.l.bf16 %v4372_v55  ;;  %v1427_v53 = vsel %vm1406_vm4, %v8402_v52, %v4368_v38  ;;  %v4374_v15 = vunpack.i.h.bf16 %v4372_v55  ;;  %v1428_v27 = vsel %vm1406_vm4, %v5780_v33, %v4369_v1 }
 0x115   : > { %1899 = vmatmul.mubr.bf16.gmra.mxu0 %v1653_v50  ;;  %v4377_v19 = vpop.permute.xlu0 %4376 }
 0x116   : > { %v1459_v47 = vsel %vm1438_vm5, %v1427_v53, %v4373_v54  ;;  %3941 = vmatprep.mubr.msk.bf16.mxu0 %vm1406_vm4, %v1656_v48  ;;  %v4379_v43 = vunpack.i.h.bf16 %v4377_v19  ;;  %v4378_v49 = vunpack.i.l.bf16 %v4377_v19  ;;  %v8403_v48 = vld [vmem:[#allocation7_spill] sm:$0xff]  ;;  %v1460_v55 = vsel %vm1438_vm5, %v1428_v27, %v4374_v15 }
 0x117   : > { %v4382_v39 = vpop.permute.xlu1 %4381 }
 0x118   : > { %v4384_v58 = vunpack.i.h.bf16 %v4382_v39  ;;  %v4383_v42 = vunpack.i.l.bf16 %v4382_v39  ;;  %v1491_v16 = vsel %vm1470_vm6, %v1458_v59, %v4378_v49  ;;  %v1492_v37 = vsel %vm1470_vm6, %v1459_v47, %v4379_v43 }
 0x119   : > { %v4387_v6 = vpop.permute.xlu0 %4386 }
 0x11a   : > { %v1524_v51 = vsel %vm1503_vm7, %v1491_v16, %v4383_v42  ;;  %v1525_v23 = vsel %vm1503_vm7, %v1492_v37, %v4384_v58  ;;  %v4389_v28 = vunpack.i.h.bf16 %v4387_v6  ;;  %v4388_v11 = vunpack.i.l.bf16 %v4387_v6 }
 0x11b   : > { %v4392_v12 = vpop.permute.xlu1 %4391 }
 0x11c   : > { %v4394_v25 = vunpack.i.h.bf16 %v4392_v12  ;;  %v4393_v9 = vunpack.i.l.bf16 %v4392_v12  ;;  %v1557_v56 = vsel %vm1536_vm8, %v1524_v51, %v4388_v11  ;;  %v1558_v32 = vsel %vm1536_vm8, %v1525_v23, %v4389_v28 }
 0x11d   : > { %v4397_v26 = vpop.permute.xlu0 %4396 }
 0x11e   : > { %v1590_v4 = vsel %vm1569_vm9, %v1557_v56, %v4393_v9  ;;  %v1591_v61 = vsel %vm1569_vm9, %v1558_v32, %v4394_v25  ;;  %v4399_v31 = vunpack.i.h.bf16 %v4397_v26  ;;  %v4398_v14 = vunpack.i.l.bf16 %v4397_v26 }
 0x11f   : > { %v4402_v29 = vpop.permute.xlu1 %4401 }
 0x120   : > { %v4403_v40 = vunpack.i.l.bf16 %v4402_v29  ;;  %v1623_v45 = vsel %vm1602_vm10, %v1590_v4, %v4398_v14  ;;  %v1624_v57 = vsel %vm1602_vm10, %v1591_v61, %v4399_v31  ;;  %v4404_v23 = vunpack.i.h.bf16 %v4402_v29 }
 0x121   : > { %v4407_v41 = vpop.permute.xlu0 %4406  ;;  %v1655_v38 = vpack.c.bf16 %v1624_v57, %v1623_v45  ;;  %v1660_v61 = vpack.c.bf16 %v6086_v35, %v6057_v63 }
 0x122   : > { %v1429_v44 = vsel %vm1406_vm4, %v8403_v48, %v4403_v40  ;;  %v4408_v50 = vunpack.i.l.bf16 %v4407_v41  ;;  %v4409_v56 = vunpack.i.h.bf16 %v4407_v41  ;;  %v1430_v15 = vsel %vm1406_vm4, %v5857_v20, %v4404_v23 }
 0x123   : > { %v4412_v54 = vpop.permute.xlu1 %4411  ;;  %1907 = vmatmul.mubr.bf16.gmra.mxu0 %v1655_v38 }
 0x124   : > { %v4414_v52 = vunpack.i.h.bf16 %v4412_v54  ;;  %v4413_v33 = vunpack.i.l.bf16 %v4412_v54  ;;  %v1461_v53 = vsel %vm1438_vm5, %v1429_v44, %v4408_v50  ;;  %3942 = vmatprep.mubr.msk.bf16.mxu0 %vm1406_vm4, %v1658_v30  ;;  %v1462_v45 = vsel %vm1438_vm5, %v1430_v15, %v4409_v56 }
 0x125   : > { %v4417_v34 = vpop.permute.xlu0 %4416 }
 0x126   : > { %v1493_v59 = vsel %vm1470_vm6, %v1460_v55, %v4413_v33  ;;  %v1494_v2 = vsel %vm1470_vm6, %v1461_v53, %v4414_v52  ;;  %v4419_v47 = vunpack.i.h.bf16 %v4417_v34  ;;  %v4418_v19 = vunpack.i.l.bf16 %v4417_v34 }
 0x127   : > { %v4422_v43 = vpop.permute.xlu1 %4421 }
 0x128   : > { %v4424_v49 = vunpack.i.h.bf16 %v4422_v43  ;;  %v4423_v39 = vunpack.i.l.bf16 %v4422_v43  ;;  %v1526_v58 = vsel %vm1503_vm7, %v1493_v59, %v4418_v19  ;;  %v1527_v42 = vsel %vm1503_vm7, %v1494_v2, %v4419_v47 }
 0x129   : > { %v4427_v51 = vpop.permute.xlu0 %4426 }
 0x12a   : > { %v1559_v16 = vsel %vm1536_vm8, %v1526_v58, %v4423_v39  ;;  %v1560_v37 = vsel %vm1536_vm8, %v1527_v42, %v4424_v49  ;;  %v4429_v6 = vunpack.i.h.bf16 %v4427_v51  ;;  %v4428_v28 = vunpack.i.l.bf16 %v4427_v51 }
 0x12b   : > { %v4432_v11 = vpop.permute.xlu1 %4431 }
 0x12c   : > { %v4434_v12 = vunpack.i.h.bf16 %v4432_v11  ;;  %v4433_v1 = vunpack.i.l.bf16 %v4432_v11  ;;  %v1592_v25 = vsel %vm1569_vm9, %v1559_v16, %v4428_v28  ;;  %v1593_v9 = vsel %vm1569_vm9, %v1560_v37, %v4429_v6 }
 0x12d   : > { %v4437_v32 = vpop.permute.xlu0 %4436  ;;  %v1662_v28 = vpack.c.bf16 %v6170_v7, %v6141_v18 }
 0x12e   : > { %v1625_v26 = vsel %vm1602_vm10, %v1592_v25, %v4433_v1  ;;  %v1626_v4 = vsel %vm1602_vm10, %v1593_v9, %v4434_v12  ;;  %v4438_v31 = vunpack.i.l.bf16 %v4437_v32  ;;  %v4439_v53 = vunpack.i.h.bf16 %v4437_v32 }
 0x12f   : > { %v4442_v14 = vpop.permute.xlu1 %4441  ;;  %v1657_v29 = vpack.c.bf16 %v1626_v4, %v1625_v26  ;;  %v610_v26 = vrot.slane %v6197_v13, 1 }
 0x130   : > { %v4443_v27 = vunpack.i.l.bf16 %v4442_v14  ;;  %v1431_v40 = vsel %vm1406_vm4, %v5853_v24, %v4438_v31  ;;  %v4444_v39 = vunpack.i.h.bf16 %v4442_v14  ;;  %v1432_v37 = vsel %vm1406_vm4, %v5935_v46, %v4439_v53 }
 0x131   : > { %1915 = vmatmul.mubr.bf16.gmra.mxu0 %v1657_v29  ;;  %v4447_v30 = vpop.permute.xlu0 %4446 }
 0x132   : > { %v1463_v57 = vsel %vm1438_vm5, %v1431_v40, %v4443_v27  ;;  %3943 = vmatprep.mubr.msk.bf16.mxu0 %vm1406_vm4, %v1660_v61  ;;  %v4449_v48 = vunpack.i.h.bf16 %v4447_v30  ;;  %v4448_v63 = vunpack.i.l.bf16 %v4447_v30  ;;  %v1464_v25 = vsel %vm1438_vm5, %v1432_v37, %v4444_v39  ;;  %v8404_v40 = vld [vmem:[#allocation3_spill] sm:$0xff] }
 0x133   : > { %v4452_v35 = vpop.permute.xlu1 %4451 }
 0x134   : > { %v4454_v44 = vunpack.i.h.bf16 %v4452_v35  ;;  %v4453_v20 = vunpack.i.l.bf16 %v4452_v35  ;;  %v1495_v41 = vsel %vm1470_vm6, %v1462_v45, %v4448_v63  ;;  %v1496_v38 = vsel %vm1470_vm6, %v1463_v57, %v4449_v48 }
 0x135   : > { %v4457_v50 = vpop.permute.xlu0 %4456  ;;  %v8405_v45 = vrot.slane %v8404_v40, 1 }
 0x136   : > { %v1528_v55 = vsel %vm1503_vm7, %v1495_v41, %v4453_v20  ;;  %v1529_v24 = vsel %vm1503_vm7, %v1496_v38, %v4454_v44  ;;  %v4459_v54 = vunpack.i.h.bf16 %v4457_v50  ;;  %v4458_v52 = vunpack.i.l.bf16 %v4457_v50 }
 0x137   : > { %v4462_v33 = vpop.permute.xlu1 %4461  ;;  %v612_v57 = vsel %vm544_vm0, %v610_v26, %v8405_v45  ;;  %v6354_v44 = vsel %vm544_vm0, %v543_v62, %v610_v26 }
 0x138   : > { %v4464_v59 = vunpack.i.h.bf16 %v4462_v33  ;;  %v4463_v2 = vunpack.i.l.bf16 %v4462_v33  ;;  %v1561_v34 = vsel %vm1536_vm8, %v1528_v55, %v4458_v52  ;;  %v1562_v47 = vsel %vm1536_vm8, %v1529_v24, %v4459_v54 }
 0x139   : > { %v4467_v19 = vpop.permute.xlu0 %4466  ;;  %v6358_v24 = vsel %vm388_vm3, %v612_v57, 0.0 }
 0x13a   : > { %v1594_v43 = vsel %vm1569_vm9, %v1561_v34, %v4463_v2  ;;  %v1595_v49 = vsel %vm1569_vm9, %v1562_v47, %v4464_v59  ;;  %v4469_v58 = vunpack.i.h.bf16 %v4467_v19  ;;  %v4468_v42 = vunpack.i.l.bf16 %v4467_v19 }
 0x13b   : > { %v4472_v16 = vpop.permute.xlu1 %4471  ;;  %v1664_v2 = vpack.c.bf16 %v6358_v24, %v6354_v44 }
 0x13c   : > { %v4473_v51 = vunpack.i.l.bf16 %v4472_v16  ;;  %v1627_v23 = vsel %vm1602_vm10, %v1594_v43, %v4468_v42  ;;  %v1628_v6 = vsel %vm1602_vm10, %v1595_v49, %v4469_v58  ;;  %v4474_v20 = vunpack.i.h.bf16 %v4472_v16 }
 0x13d   : > { %v4477_v12 = vpop.permute.xlu0 %4476  ;;  %v1659_v1 = vpack.c.bf16 %v1628_v6, %v1627_v23 }
 0x13e   : > { %v1433_v11 = vsel %vm1406_vm4, %v5946_v17, %v4473_v51  ;;  %v4478_v9 = vunpack.i.l.bf16 %v4477_v12  ;;  %v4479_v53 = vunpack.i.h.bf16 %v4477_v12  ;;  %v1434_v34 = vsel %vm1406_vm4, %v6023_v21, %v4474_v20 }
 0x13f   : > { %v4482_v56 = vpop.permute.xlu1 %4481  ;;  %1923 = vmatmul.mubr.bf16.gmra.mxu0 %v1659_v1 }
 0x140   : > { %v4484_v32 = vunpack.i.h.bf16 %v4482_v56  ;;  %v4483_v46 = vunpack.i.l.bf16 %v4482_v56  ;;  %v1465_v4 = vsel %vm1438_vm5, %v1433_v11, %v4478_v9  ;;  %3944 = vmatprep.mubr.msk.bf16.mxu0 %vm1406_vm4, %v1662_v28  ;;  %v1466_v58 = vsel %vm1438_vm5, %v1434_v34, %v4479_v53 }
 0x141   : > { %v4487_v17 = vpop.permute.xlu0 %4486  ;;  %v8302_v34 = vmov 0.0|0.0  }
 0x142   : > { %v1497_v18 = vsel %vm1470_vm6, %v1464_v25, %v4483_v46  ;;  %v1498_v61 = vsel %vm1470_vm6, %v1465_v4, %v4484_v32  ;;  %v4489_v15 = vunpack.i.h.bf16 %v4487_v17  ;;  %v4488_v31 = vunpack.i.l.bf16 %v4487_v17 }
 0x143   : > { %v4492_v14 = vpop.permute.xlu1 %4491 }
 0x144   : > { %v4494_v29 = vunpack.i.h.bf16 %v4492_v14  ;;  %v4493_v27 = vunpack.i.l.bf16 %v4492_v14  ;;  %v1530_v13 = vsel %vm1503_vm7, %v1497_v18, %v4488_v31  ;;  %v1531_v30 = vsel %vm1503_vm7, %v1498_v61, %v4489_v15  ;;  %v6388_v61 = vld [vmem:[%s8280_s2] ss:$0 sm:$0xff] }
 0x145   : > { %v4497_v35 = vpop.permute.xlu0 %4496 }
 0x146   : > { %v1563_v48 = vsel %vm1536_vm8, %v1530_v13, %v4493_v27  ;;  %v1564_v63 = vsel %vm1536_vm8, %v1531_v30, %v4494_v29  ;;  %v4499_v41 = vunpack.i.h.bf16 %v4497_v35  ;;  %v4498_v38 = vunpack.i.l.bf16 %v4497_v35 }
 0x147   : > { %v4502_v55 = vpop.permute.xlu1 %4501 }
 0x148   : > { %v4504_v50 = vunpack.i.h.bf16 %v4502_v55  ;;  %v4503_v54 = vunpack.i.l.bf16 %v4502_v55  ;;  %v1596_v52 = vsel %vm1569_vm9, %v1563_v48, %v4498_v38  ;;  %v1597_v33 = vsel %vm1569_vm9, %v1564_v63, %v4499_v41 }
 0x149   : > { %v6362_v8 = vpop.permute.xlu0 %4506  ;;  %v4555_v38 = vpack.i.bf16 %v6358_v24, %v6354_v44 }
 0x14a   : > { %v1629_v62 = vsel %vm1602_vm10, %v1596_v52, %v4503_v54  ;;  %v1630_v59 = vsel %vm1602_vm10, %v1597_v33, %v4504_v50  ;;  %v4508_v47 = vunpack.i.l.bf16 %v6362_v8 }
 0x14b   : > { %v6371_v19 = vpop.permute.xlu1 %4511  ;;  %v1661_v43 = vpack.c.bf16 %v1630_v59, %v1629_v62 }
 0x14c   : > { %v4513_v49 = vunpack.i.l.bf16 %v6371_v19  ;;  %v1435_v39 = vsel %vm1406_vm4, %v6014_v36, %v4508_v47 }
 0x14d   : > { %1931 = vmatmul.mubr.bf16.gmra.mxu0 %v1661_v43  ;;  %v4517_v16 = vpop.permute.xlu0 %4516 }
 0x14e   : > { %v1467_v42 = vsel %vm1438_vm5, %v1435_v39, %v4513_v49  ;;  %3945 = vmatprep.mubr.msk.bf16.mxu0 %vm1406_vm4, %v1664_v2  ;;  %v4519_v37 = vunpack.i.h.bf16 %v4517_v16  ;;  %v4518_v21 = vunpack.i.l.bf16 %v4517_v16  ;;  %v8406_v39 = vmov 0.0  }
 0x14f   : > { %v4522_v51 = vpop.permute.xlu1 %4521 }
 0x150   : > { %v4524_v23 = vunpack.i.h.bf16 %v4522_v51  ;;  %v4523_v6 = vunpack.i.l.bf16 %v4522_v51  ;;  %v1499_v28 = vsel %vm1470_vm6, %v1466_v58, %v4518_v21  ;;  %v1500_v11 = vsel %vm1470_vm6, %v1467_v42, %v4519_v37 }
 0x151   : > { %v4527_v1 = vpop.permute.xlu0 %4526 }
 0x152   : > { %v1532_v12 = vsel %vm1503_vm7, %v1499_v28, %v4523_v6  ;;  %v1533_v36 = vsel %vm1503_vm7, %v1500_v11, %v4524_v23  ;;  %v4529_v25 = vunpack.i.h.bf16 %v4527_v1  ;;  %v4528_v9 = vunpack.i.l.bf16 %v4527_v1 }
 0x153   : > { %v4532_v56 = vpop.permute.xlu1 %4531 }
 0x154   : > { %v4534_v32 = vunpack.i.h.bf16 %v4532_v56  ;;  %v4533_v46 = vunpack.i.l.bf16 %v4532_v56  ;;  %v1565_v26 = vsel %vm1536_vm8, %v1532_v12, %v4528_v9  ;;  %v1566_v4 = vsel %vm1536_vm8, %v1533_v36, %v4529_v25 }
 0x155   : > { %v4537_v18 = vpop.permute.xlu0 %4536 }
 0x156   : > { %v1598_v17 = vsel %vm1569_vm9, %v1565_v26, %v4533_v46  ;;  %v1599_v15 = vsel %vm1569_vm9, %v1566_v4, %v4534_v32  ;;  %v4539_v31 = vunpack.i.h.bf16 %v4537_v18  ;;  %v4538_v14 = vunpack.i.l.bf16 %v4537_v18 }
 0x157   : > { %v1828_v29 = vpop.f32.mrf.mxu0 }
 0x158   : > { %v1829_v27 = vadd.f32 %v6388_v61, %v1828_v29  ;;  %v1631_v40 = vsel %vm1602_vm10, %v1598_v17, %v4538_v14  ;;  %v1632_v45 = vsel %vm1602_vm10, %v1599_v15, %v4539_v31 }
 0x159   : > { %v1830_v57 = vpop.f32.mrf.mxu0  ;;  %v1663_v13 = vpack.c.bf16 %v1632_v45, %v1631_v40 }
 0x15a   : > { %v6395_v30 = vmax.f32 %v1829_v27, 0.0 }
 0x15b   : > { %v1831_v48 = vpop.f32.mrf.mxu0  ;;  %1939 = vmatmul.mubr.bf16.gmra.mxu0 %v1663_v13 }
 0x15c   : > { %v1832_v63 = vadd.f32 %v6388_v61, %v1831_v48  ;;  %v4550_v35 = vpack.i.bf16 %v6395_v30, %v6065_v60  ;;  %v8304_v55 = vrot.slane %v6395_v30, 7  ;;  %v8303_v50 = vrot.slane %v6395_v30, 1  ;;  %1946 = vmatprep.mubr.bf16.mxu0 %v8302_v34 }
 0x15d   : > { %v1833_v20 = vpop.f32.mrf.mxu0 }
 0x15e   : > { %v1956_v41 = vmax.f32 %v1832_v63, 0.0  ;;  %4551 = vrot.lane.b32.xlu1 %v4550_v35, %s5162_s22 }
 0x160   : > { %v1988_v54 = vrot.slane %v1956_v41, 7  ;;  %v2109_v52 = vrot.slane %v1956_v41, 1  ;;  %v4575_v51 = vpack.i.bf16 %v1956_v41, %v6395_v30 }
 0x162   : > { %4556 = vrot.lane.b32.xlu1 %v4555_v38, %s5165_s29  ;;  %v2168_v60 = vsel %vm544_vm0, %v8303_v50, %v2109_v52  ;;  %v6414_v33 = vsel %vm422_vm2, %v8304_v55, %v1988_v54 }
 0x163   : > { %v4560_v44 = vpack.i.bf16 %v2168_v60, %v6170_v7 }
 0x165   : > { %v1836_v24 = vpop.f32.mrf.mxu0  ;;  %4561 = vrot.lane.b32.xlu0 %v4560_v44, %s5163_s23 }
 0x166   : > { %v1837_v53 = vadd.f32 %v6388_v61, %v1836_v24 }
 0x167   : > { %v1838_v62 = vpop.f32.mrf.mxu0 }
 0x168   : > { %v1957_v59 = vmax.f32 %v1837_v53, 0.0 }
 0x169   : > { %v1839_v2 = vpop.f32.mrf.mxu0 }
 0x16a   : > { %v1989_v47 = vrot.slane %v1957_v59, 7  ;;  %v2110_v43 = vrot.slane %v1957_v59, 1  ;;  %v1840_v49 = vadd.f32 %v6388_v61, %v1839_v2  ;;  %v4570_v58 = vpack.i.bf16 %v1957_v59, %v8406_v39 }
 0x16b   : > { %v1841_v42 = vpop.f32.mrf.mxu0  ;;  %v4580_v11 = vpack.i.bf16 %v1957_v59, %v1956_v41 }
 0x16c   : > { %v1958_v16 = vmax.f32 %v1840_v49, 0.0  ;;  %4571 = vrot.lane.b32.xlu1 %v4570_v58, %s5167_s14  ;;  %v2045_v7 = vsel %vm422_vm2, %v1988_v54, %v1989_v47  ;;  %v2167_v37 = vsel %vm544_vm0, %v2109_v52, %v2110_v43 }
 0x16d   : > { %v6429_v21 = vsel %vm371_vm1, %v2045_v7, 0.0  ;;  %v2170_v28 = vsel %vm388_vm3, %v2167_v37, 0.0 }
 0x16e   : > { %v4565_v23 = vpack.i.bf16 %v6429_v21, %v8406_v39  ;;  %v1990_v6 = vrot.slane %v1958_v16, 7  ;;  %v4585_v12 = vpack.i.bf16 %v2170_v28, %v2168_v60  ;;  %v2111_v36 = vrot.slane %v1958_v16, 1 }
 0x16f   : > { %v4590_v46 = vpack.i.bf16 %v1958_v16, %v1957_v59 }
 0x170   : > { %4576 = vrot.lane.b32.xlu1 %v4575_v51, %s5161_s21  ;;  %4566 = vrot.lane.b32.xlu0 %v4565_v23, %s5166_s11  ;;  %v6440_v1 = vsel %vm422_vm2, %v1989_v47, %v1990_v6  ;;  %v2166_v4 = vsel %vm544_vm0, %v2110_v43, %v2111_v36 }
 0x171   : > { %v4600_v32 = vpack.i.bf16 %v6440_v1, %v6429_v21  ;;  %v4595_v29 = vpack.i.bf16 %v2166_v4, %v2170_v28 }
 0x173   : > { %v1844_v25 = vpop.f32.mrf.mxu0 }
 0x174   : > { %4581 = vrot.lane.b32.xlu1 %v4580_v11, %s5162_s22  ;;  %4586 = vrot.lane.b32.xlu0 %v4585_v12, %s5165_s29  ;;  %v1845_v9 = vadd.f32 %v6388_v61, %v1844_v25 }
 0x175   : > { %v1846_v56 = vpop.f32.mrf.mxu0 }
 0x176   : > { %v1959_v26 = vmax.f32 %v1845_v9, 0.0 }
 0x177   : > { %v1847_v18 = vpop.f32.mrf.mxu0 }
 0x178   : > { %4601 = vrot.lane.b32.xlu1 %v4600_v32, %s5164_s26  ;;  %4591 = vrot.lane.b32.xlu0 %v4590_v46, %s5161_s21  ;;  %v1991_v17 = vrot.slane %v1959_v26, 7  ;;  %v1848_v15 = vadd.f32 %v6388_v61, %v1847_v18  ;;  %v2112_v31 = vrot.slane %v1959_v26, 1  ;;  %v4605_v35 = vpack.i.bf16 %v1959_v26, %v1958_v16 }
 0x179   : > { %v1849_v14 = vpop.f32.mrf.mxu0 }
 0x17a   : > { %v1960_v27 = vmax.f32 %v1848_v15, 0.0  ;;  %v2165_v40 = vsel %vm544_vm0, %v2111_v36, %v2112_v31  ;;  %v2043_v45 = vsel %vm422_vm2, %v1990_v6, %v1991_v17 }
 0x17b   : > { %v2172_v57 = vsel %vm388_vm3, %v2165_v40, 0.0  ;;  %v6461_v13 = vsel %vm371_vm1, %v2043_v45, 0.0 }
 0x17c   : > { %4596 = vrot.lane.b32.xlu0 %v4595_v29, %s5163_s23  ;;  %v3208_v48 = vpack.c.bf16 %v2172_v57, %v2166_v4  ;;  %v4615_v63 = vpack.i.bf16 %v6461_v13, %v6440_v1  ;;  %v1992_v20 = vrot.slane %v1960_v27, 7  ;;  %v4620_v38 = vpack.i.bf16 %v2172_v57, %v2166_v4 }
 0x17d   : > { %v2113_v52 = vrot.slane %v1960_v27, 1  ;;  %v4625_v2 = vpack.i.bf16 %v1960_v27, %v1959_v26 }
 0x17e   : > { %3956 = vmatprep.mubr.msk.bf16.mxu1 %vm1406_vm4, %v3208_v48  ;;  %4616 = vrot.lane.b32.xlu1 %v4615_v63, %s5166_s11  ;;  %v6471_v44 = vsel %vm422_vm2, %v1991_v17, %v1992_v20 }
 0x17f   : > { %v4635_v47 = vpack.i.bf16 %v6471_v44, %v6461_v13  ;;  %v6479_v43 = vsel %vm544_vm0, %v2112_v31, %v2113_v52 }
 0x180   : > { %4606 = vrot.lane.b32.xlu0 %v4605_v35, %s5167_s14  ;;  %8407 = vst [vmem:[#allocation5_spill] sm:$0xff] %v6479_v43  ;;  %v4630_v51 = vpack.i.bf16 %v6479_v43, %v2172_v57 }
 0x181   : > { %v1852_v41 = vpop.f32.mrf.mxu0 }
 0x182   : > { %v1853_v54 = vadd.f32 %v6388_v61, %v1852_v41  ;;  %4621 = vrot.lane.b32.xlu1 %v4620_v38, %s5165_s29 }
 0x183   : > { %v1854_v60 = vpop.f32.mrf.mxu0 }
 0x184   : > { %v1961_v24 = vmax.f32 %v1853_v54, 0.0  ;;  %4611 = vrot.lane.b32.xlu0 %v4605_v35, %s5162_s22 }
 0x185   : > { %v1855_v53 = vpop.f32.mrf.mxu0 }
 0x186   : > { %v1993_v62 = vrot.slane %v1961_v24, 7  ;;  %v2114_v59 = vrot.slane %v1961_v24, 1  ;;  %v1856_v49 = vadd.f32 %v6388_v61, %v1855_v53  ;;  %4626 = vrot.lane.b32.xlu1 %v4625_v2, %s5161_s21  ;;  %v4640_v11 = vpack.i.bf16 %v1961_v24, %v1960_v27 }
 0x187   : > { %v1857_v58 = vpop.f32.mrf.mxu0 }
 0x188   : > { %4636 = vrot.lane.b32.xlu0 %v4635_v47, %s5164_s26  ;;  %v2041_v42 = vsel %vm422_vm2, %v1992_v20, %v1993_v62  ;;  %v2163_v16 = vsel %vm544_vm0, %v2113_v52, %v2114_v59  ;;  %v1962_v6 = vmax.f32 %v1856_v49, 0.0 }
 0x189   : > { %v6490_v7 = vsel %vm371_vm1, %v2041_v42, 0.0  ;;  %v6494_v37 = vsel %vm388_vm3, %v2163_v16, 0.0 }
 0x18a   : > { %8408 = vst [vmem:[#allocation4_spill] sm:$0xff] %v6494_v37  ;;  %v4650_v23 = vpack.i.bf16 %v6490_v7, %v6471_v44  ;;  %4631 = vrot.lane.b32.xlu1 %v4630_v51, %s5163_s23  ;;  %v4655_v12 = vpack.i.bf16 %v6494_v37, %v6479_v43  ;;  %v1994_v36 = vrot.slane %v1962_v6, 7  ;;  %v2115_v25 = vrot.slane %v1962_v6, 1 }
 0x18b   : > { %v4660_v56 = vpack.i.bf16 %v1962_v6, %v1961_v24 }
 0x18c   : > { %4651 = vrot.lane.b32.xlu0 %v4650_v23, %s5166_s11  ;;  %v6510_v4 = vsel %vm422_vm2, %v1993_v62, %v1994_v36  ;;  %v6514_v18 = vsel %vm544_vm0, %v2114_v59, %v2115_v25 }
 0x18d   : > { %8409 = vst [vmem:[#allocation7_spill] sm:$0xff] %v6514_v18  ;;  %v4670_v29 = vpack.i.bf16 %v6510_v4, %v6490_v7  ;;  %v4665_v27 = vpack.i.bf16 %v6514_v18, %v6494_v37 }
 0x18e   : > { %4641 = vrot.lane.b32.xlu1 %v4640_v11, %s5167_s14 }
 0x18f   : > { %v1860_v9 = vpop.f32.mrf.mxu0 }
 0x190   : > { %4656 = vrot.lane.b32.xlu0 %v4655_v12, %s5165_s29  ;;  %v1861_v32 = vadd.f32 %v6388_v61, %v1860_v9 }
 0x191   : > { %v1862_v46 = vpop.f32.mrf.mxu0 }
 0x192   : > { %v1963_v26 = vmax.f32 %v1861_v32, 0.0  ;;  %4646 = vrot.lane.b32.xlu1 %v4640_v11, %s5162_s22 }
 0x193   : > { %v1863_v17 = vpop.f32.mrf.mxu0 }
 0x194   : > { %4661 = vrot.lane.b32.xlu0 %v4660_v56, %s5161_s21  ;;  %v1995_v15 = vrot.slane %v1963_v26, 7  ;;  %v2116_v31 = vrot.slane %v1963_v26, 1  ;;  %v1864_v14 = vadd.f32 %v6388_v61, %v1863_v17  ;;  %v4675_v35 = vpack.i.bf16 %v1963_v26, %v1962_v6 }
 0x195   : > { %v1865_v40 = vpop.f32.mrf.mxu0 }
 0x196   : > { %v1964_v45 = vmax.f32 %v1864_v14, 0.0  ;;  %v2039_v57 = vsel %vm422_vm2, %v1994_v36, %v1995_v15  ;;  %v2161_v48 = vsel %vm544_vm0, %v2115_v25, %v2116_v31  ;;  %4671 = vrot.lane.b32.xlu1 %v4670_v29, %s5164_s26 }
 0x197   : > { %v6531_v63 = vsel %vm371_vm1, %v2039_v57, 0.0  ;;  %v6537_v38 = vsel %vm388_vm3, %v2161_v48, 0.0 }
 0x198   : > { %4666 = vrot.lane.b32.xlu0 %v4665_v27, %s5163_s23  ;;  %v1996_v20 = vrot.slane %v1964_v45, 7  ;;  %v4685_v41 = vpack.i.bf16 %v6531_v63, %v6510_v4  ;;  %8410 = vst [vmem:[#allocation3_spill] sm:$0xff] %v6537_v38  ;;  %v4690_v52 = vpack.i.bf16 %v6537_v38, %v6514_v18  ;;  %v2117_v60 = vrot.slane %v1964_v45, 1 }
 0x199   : > { %v4695_v47 = vpack.i.bf16 %v1964_v45, %v1963_v26 }
 0x19a   : > { %4686 = vrot.lane.b32.xlu1 %v4685_v41, %s5166_s11  ;;  %v6547_v53 = vsel %vm422_vm2, %v1995_v15, %v1996_v20  ;;  %v6556_v58 = vsel %vm544_vm0, %v2116_v31, %v2117_v60 }
 0x19b   : > { %v4705_v49 = vpack.i.bf16 %v6547_v53, %v6531_v63  ;;  %8411 = vst [vmem:[#allocation8_spill] sm:$0xff] %v6556_v58  ;;  %v4700_v11 = vpack.i.bf16 %v6556_v58, %v6537_v38 }
 0x19c   : > { %4676 = vrot.lane.b32.xlu0 %v4675_v35, %s5167_s14 }
 0x19d   : > { %v1868_v24 = vpop.f32.mrf.mxu0 }
 0x19e   : > { %v1869_v62 = vadd.f32 %v6388_v61, %v1868_v24  ;;  %4691 = vrot.lane.b32.xlu1 %v4690_v52, %s5165_s29 }
 0x19f   : > { %v1870_v59 = vpop.f32.mrf.mxu0 }
 0x1a0   : > { %v1965_v2 = vmax.f32 %v1869_v62, 0.0  ;;  %4681 = vrot.lane.b32.xlu0 %v4675_v35, %s5162_s22 }
 0x1a1   : > { %v1871_v42 = vpop.f32.mrf.mxu0 }
 0x1a2   : > { %v1997_v16 = vrot.slane %v1965_v2, 7  ;;  %v2118_v51 = vrot.slane %v1965_v2, 1  ;;  %v1872_v23 = vadd.f32 %v6388_v61, %v1871_v42  ;;  %4696 = vrot.lane.b32.xlu1 %v4695_v47, %s5161_s21  ;;  %v4710_v26 = vpack.i.bf16 %v1965_v2, %v1964_v45 }
 0x1a3   : > { %v1873_v6 = vpop.f32.mrf.mxu0 }
 0x1a4   : > { %4706 = vrot.lane.b32.xlu0 %v4705_v49, %s5164_s26  ;;  %v2037_v12 = vsel %vm422_vm2, %v1996_v20, %v1997_v16  ;;  %v2159_v36 = vsel %vm544_vm0, %v2117_v60, %v2118_v51  ;;  %v1966_v25 = vmax.f32 %v1872_v23, 0.0 }
 0x1a5   : > { %v6569_v9 = vsel %vm371_vm1, %v2037_v12, 0.0  ;;  %v6573_v56 = vsel %vm388_vm3, %v2159_v36, 0.0 }
 0x1a6   : > { %8412 = vst [vmem:[#allocation9_spill] sm:$0xff] %v6573_v56  ;;  %v4720_v32 = vpack.i.bf16 %v6569_v9, %v6547_v53  ;;  %4701 = vrot.lane.b32.xlu1 %v4700_v11, %s5163_s23  ;;  %v4725_v17 = vpack.i.bf16 %v6573_v56, %v6556_v58  ;;  %v1998_v15 = vrot.slane %v1966_v25, 7  ;;  %v2119_v31 = vrot.slane %v1966_v25, 1 }
 0x1a7   : > { %v4730_v29 = vpack.i.bf16 %v1966_v25, %v1965_v2 }
 0x1a8   : > { %4721 = vrot.lane.b32.xlu0 %v4720_v32, %s5166_s11  ;;  %v6588_v40 = vsel %vm422_vm2, %v1997_v16, %v1998_v15  ;;  %v6592_v45 = vsel %vm544_vm0, %v2118_v51, %v2119_v31 }
 0x1a9   : > { %8413 = vst [vmem:[#allocation10_spill] sm:$0xff] %v6588_v40  ;;  %8414 = vst [vmem:[#allocation11_spill] sm:$0xff] %v6592_v45  ;;  %v4740_v35 = vpack.i.bf16 %v6588_v40, %v6569_v9  ;;  %v4735_v20 = vpack.i.bf16 %v6592_v45, %v6573_v56 }
 0x1aa   : > { %4711 = vrot.lane.b32.xlu1 %v4710_v26, %s5167_s14 }
 0x1ab   : > { %v1876_v14 = vpop.f32.mrf.mxu0 }
 0x1ac   : > { %4726 = vrot.lane.b32.xlu0 %v4725_v17, %s5165_s29  ;;  %v1877_v27 = vadd.f32 %v6388_v61, %v1876_v14 }
 0x1ad   : > { %v1878_v57 = vpop.f32.mrf.mxu0 }
 0x1ae   : > { %v1967_v48 = vmax.f32 %v1877_v27, 0.0  ;;  %4716 = vrot.lane.b32.xlu1 %v4710_v26, %s5162_s22 }
 0x1af   : > { %v1879_v41 = vpop.f32.mrf.mxu0 }
 0x1b0   : > { %4731 = vrot.lane.b32.xlu0 %v4730_v29, %s5161_s21  ;;  %v1999_v52 = vrot.slane %v1967_v48, 7  ;;  %v2120_v60 = vrot.slane %v1967_v48, 1  ;;  %v1880_v24 = vadd.f32 %v6388_v61, %v1879_v41  ;;  %v4745_v42 = vpack.i.bf16 %v1967_v48, %v1966_v25 }
 0x1b1   : > { %v1881_v62 = vpop.f32.mrf.mxu0 }
 0x1b2   : > { %v1968_v59 = vmax.f32 %v1880_v24, 0.0  ;;  %v2035_v2 = vsel %vm422_vm2, %v1998_v15, %v1999_v52  ;;  %v2157_v47 = vsel %vm544_vm0, %v2119_v31, %v2120_v60  ;;  %4741 = vrot.lane.b32.xlu1 %v4740_v35, %s5164_s26 }
 0x1b3   : > { %v6609_v49 = vsel %vm371_vm1, %v2035_v2, 0.0  ;;  %v6615_v23 = vsel %vm388_vm3, %v2157_v47, 0.0 }
 0x1b4   : > { %4736 = vrot.lane.b32.xlu0 %v4735_v20, %s5163_s23  ;;  %8415 = vst [vmem:[#allocation12_spill] sm:$0xff] %v6609_v49  ;;  %v2000_v16 = vrot.slane %v1968_v59, 7  ;;  %v4755_v51 = vpack.i.bf16 %v6609_v49, %v6588_v40  ;;  %8416 = vst [vmem:[#allocation13_spill] sm:$0xff] %v6615_v23  ;;  %v4760_v11 = vpack.i.bf16 %v6615_v23, %v6592_v45  ;;  %v2121_v12 = vrot.slane %v1968_v59, 1 }
 0x1b5   : > { %v4765_v15 = vpack.i.bf16 %v1968_v59, %v1967_v48 }
 0x1b6   : > { %4756 = vrot.lane.b32.xlu1 %v4755_v51, %s5166_s11  ;;  %v6625_v25 = vsel %vm422_vm2, %v1999_v52, %v2000_v16  ;;  %v6636_v14 = vsel %vm544_vm0, %v2120_v60, %v2121_v12 }
 0x1b7   : > { %8417 = vst [vmem:[#allocation14_spill] sm:$0xff] %v6625_v25  ;;  %v4775_v31 = vpack.i.bf16 %v6625_v25, %v6609_v49  ;;  %8418 = vst [vmem:[#allocation15_spill] sm:$0xff] %v6636_v14  ;;  %v4770_v48 = vpack.i.bf16 %v6636_v14, %v6615_v23 }
 0x1b8   : > { %4746 = vrot.lane.b32.xlu0 %v4745_v42, %s5167_s14 }
 0x1b9   : > { %v1884_v36 = vpop.f32.mrf.mxu0 }
 0x1ba   : > { %v1885_v32 = vadd.f32 %v6388_v61, %v1884_v36  ;;  %4761 = vrot.lane.b32.xlu1 %v4760_v11, %s5165_s29 }
 0x1bb   : > { %v1886_v26 = vpop.f32.mrf.mxu0 }
 0x1bc   : > { %v6628_v17 = vmax.f32 %v1885_v32, 0.0  ;;  %4751 = vrot.lane.b32.xlu0 %v4745_v42, %s5162_s22 }
 0x1bd   : > { %v1887_v29 = vpop.f32.mrf.mxu0 }
 0x1be   : > { %v2001_v27 = vrot.slane %v6628_v17, 7  ;;  %v2122_v57 = vrot.slane %v6628_v17, 1  ;;  %v1888_v35 = vadd.f32 %v6388_v61, %v1887_v29  ;;  %4766 = vrot.lane.b32.xlu1 %v4765_v15, %s5161_s21  ;;  %v4780_v51 = vpack.i.bf16 %v6628_v17, %v1968_v59 }
 0x1bf   : > { %v1889_v20 = vpop.f32.mrf.mxu0 }
 0x1c0   : > { %4776 = vrot.lane.b32.xlu0 %v4775_v31, %s5164_s26  ;;  %v6645_v41 = vmax.f32 %v1888_v35, 0.0  ;;  %v2033_v52 = vsel %vm422_vm2, %v2000_v16, %v2001_v27  ;;  %v2155_v60 = vsel %vm544_vm0, %v2121_v12, %v2122_v57  ;;  %v4542_v20 = vpop.permute.xlu1 %4541 }
 0x1c1   : > { %v6653_v24 = vsel %vm371_vm1, %v2033_v52, 0.0  ;;  %v6657_v62 = vsel %vm388_vm3, %v2155_v60, 0.0  ;;  %v4543_v28 = vunpack.i.l.bf16 %v4542_v20 }
 0x1c2   : > { %8419 = vst [vmem:[#allocation16_spill] sm:$0xff] %v6653_v24  ;;  %v2123_v2 = vrot.slane %v6645_v41, 1  ;;  %v4785_v47 = vpack.i.bf16 %v6653_v24, %v6625_v25  ;;  %4771 = vrot.lane.b32.xlu1 %v4770_v48, %s5163_s23  ;;  %v4790_v11 = vpack.i.bf16 %v6657_v62, %v6636_v14  ;;  %v2002_v15 = vrot.slane %v6645_v41, 7 }
 0x1c4   : > { %4786 = vrot.lane.b32.xlu0 %v4785_v47, %s5166_s11  ;;  %v6673_v12 = vsel %vm544_vm0, %v2122_v57, %v2123_v2  ;;  %v6692_v60 = vsel %vm422_vm2, %v2001_v27, %v2002_v15 }
 0x1c5   : > { %8420 = vst [vmem:[#allocation17_spill] sm:$0xff] %v6692_v60 }
 0x1c6   : > { %4781 = vrot.lane.b32.xlu1 %v4780_v51, %s5167_s14 }
 0x1c7   : > { %v1892_v32 = vpop.f32.mrf.mxu0 }
 0x1c8   : > { %4791 = vrot.lane.b32.xlu0 %v4790_v11, %s5165_s29  ;;  %v1893_v26 = vadd.f32 %v6388_v61, %v1892_v32 }
 0x1c9   : > { %v1894_v59 = vpop.f32.mrf.mxu0 }
 0x1ca   : > { %v6681_v31 = vmax.f32 %v1893_v26, 0.0 }
 0x1cb   : > { %v1895_v29 = vpop.f32.mrf.mxu0 }
 0x1cc   : > { %v2003_v35 = vrot.slane %v6681_v31, 7  ;;  %v2124_v57 = vrot.slane %v6681_v31, 1  ;;  %v1896_v48 = vadd.f32 %v6388_v61, %v1895_v29  ;;  %v6688_v52 = vpack.i.bf16 %v6681_v31, %v6645_v41 }
 0x1cd   : > { %v1897_v47 = vpop.f32.mrf.mxu0 }
 0x1ce   : > { %v2031_v11 = vsel %vm422_vm2, %v2002_v15, %v2003_v35  ;;  %v6696_v32 = vmax.f32 %v1896_v48, 0.0  ;;  %v2153_v26 = vsel %vm544_vm0, %v2123_v2, %v2124_v57  ;;  %v4509_v47 = vunpack.i.h.bf16 %v6362_v8 }
 0x1cf   : > { %v6702_v59 = vsel %vm371_vm1, %v2031_v11, 0.0  ;;  %v6709_v27 = vsel %vm388_vm3, %v2153_v26, 0.0  ;;  %v4547_v11 = vpop.permute.xlu0 %4546  ;;  %v4514_v15 = vunpack.i.h.bf16 %v6371_v19 }
 0x1d0   : > { %v4795_v29 = vpack.i.bf16 %v6702_v59, %v6692_v60  ;;  %v8305_v34 = vrot.slane %v6696_v32, 7  ;;  %8421 = vst [vmem:[#allocation18_spill] sm:$0xff] %v6709_v27  ;;  %v6713_v48 = vpop.permute.xlu1 %4551  ;;  %v8434_v40 = vrot.slane %v6696_v32, 7 }
 0x1d1   : > { %v4553_v26 = vunpack.i.l.bf16 %v6713_v48 }
 0x1d2   : > { %4796 = vrot.lane.b32.xlu1 %v4795_v29, %s5166_s11  ;;  %v6720_v2 = vsel %vm422_vm2, %v2003_v35, %v8305_v34  ;;  %v4820_v29 = vpack.i.bf16 %v6692_v60, %v6653_v24  ;;  %v1436_v35 = vsel %vm1406_vm4, %v6112_v0, %v4509_v47  ;;  %v4544_v34 = vunpack.i.h.bf16 %v4542_v20 }
 0x1d3   : > { %v1437_v19 = vsel %vm1406_vm4, %v6103_v22, %v4553_v26  ;;  %v1468_v0 = vsel %vm1438_vm5, %v1436_v35, %v4514_v15  ;;  %v4549_v26 = vunpack.i.h.bf16 %v4547_v11  ;;  %v4548_v20 = vunpack.i.l.bf16 %v4547_v11 }
 0x1d4   : > { %v1501_v15 = vsel %vm1470_vm6, %v1468_v0, %v4543_v28  ;;  %v4855_v5 = vpack.i.bf16 %v6720_v2, %v6702_v59 }
 0x1d5   : > { %v1900_v16 = vpop.f32.mrf.mxu0 }
 0x1d6   : > { %v1901_v6 = vadd.f32 %v6388_v61, %v1900_v16  ;;  %4811 = vrot.lane.b32.xlu1 %v4780_v51, %s5162_s22  ;;  %v4557_v16 = vpop.permute.xlu1 %4556  ;;  %v2125_v51 = vrot.slane %v6696_v32, 1 }
 0x1d7   : > { %v1902_v46 = vpop.f32.mrf.mxu0  ;;  %v6731_v54 = vpop.permute.xlu0 %4561  ;;  %v4558_v0 = vunpack.i.l.bf16 %v4557_v16 }
 0x1d8   : > { %v6733_v8 = vmax.f32 %v1901_v6, 0.0  ;;  %v4563_v42 = vunpack.i.l.bf16 %v6731_v54  ;;  %v4830_v6 = vpack.i.bf16 %v6709_v27, %v6673_v12 }
 0x1d9   : > { %v1903_v36 = vpop.f32.mrf.mxu0 }
 0x1da   : > { %8422 = vst [vmem:[#allocation19_spill] sm:$0xff] %v6733_v8  ;;  %v2126_v50 = vrot.slane %v6733_v8, 1  ;;  %v1904_v46 = vadd.f32 %v6388_v61, %v1903_v36  ;;  %v1469_v47 = vsel %vm1438_vm5, %v1437_v19, %v4563_v42  ;;  %4821 = vrot.lane.b32.xlu1 %v4820_v29, %s5164_s26  ;;  %v6766_v19 = vpack.i.bf16 %v6733_v8, %v6696_v32 }
 0x1db   : > { %v1905_v55 = vpop.f32.mrf.mxu0  ;;  %v1502_v42 = vsel %vm1470_vm6, %v1469_v47, %v4544_v34  ;;  %v1534_v34 = vsel %vm1503_vm7, %v1501_v15, %v4548_v20 }
 0x1dc   : > { %v6746_v24 = vmax.f32 %v1904_v46, 0.0  ;;  %v2151_v22 = vsel %vm544_vm0, %v2125_v51, %v2126_v50  ;;  %v6761_v55 = vsel %vm544_vm0, %v2124_v57, %v2125_v51  ;;  %v4559_v46 = vunpack.i.h.bf16 %v4557_v16 }
 0x1dd   : > { %v6752_v36 = vsel %vm388_vm3, %v2151_v22, 0.0  ;;  %v1535_v11 = vsel %vm1503_vm7, %v1502_v42, %v4549_v26  ;;  %v1567_v26 = vsel %vm1536_vm8, %v1534_v34, %v4558_v0  ;;  %v2005_v0 = vrot.slane %v6733_v8, 7 }
 0x1de   : > { %8423 = vst [vmem:[#allocation20_spill] sm:$0xff] %v6746_v24  ;;  %v6756_v29 = vpop.permute.xlu1 %4571  ;;  %v2127_v35 = vrot.slane %v6746_v24, 1  ;;  %4831 = vrot.lane.b32.xlu1 %v4830_v6, %s5165_s29  ;;  %v1568_v51 = vsel %vm1536_vm8, %v1535_v11, %v4559_v46  ;;  %v2006_v46 = vrot.slane %v6746_v24, 7 }
 0x1df   : > { %8424 = vst [vmem:[#allocation21_spill] sm:$0xff] %v6756_v29  ;;  %v6795_v42 = vunpack.i.l.bf16 %v6756_v29 }
 0x1e0   : > { %v6774_v47 = vsel %vm544_vm0, %v2126_v50, %v2127_v35  ;;  %v4850_v50 = vpack.i.bf16 %v6761_v55, %v6709_v27 }
 0x1e1   : > { %8425 = vst [vmem:[#allocation22_spill] sm:$0xff] %v6774_v47  ;;  %8429 = vst [vmem:[#allocation26_spill] sm:$0xff] %v6795_v42 }
 0x1e2   : > { %v6781_v6 = vpop.permute.xlu1 %4576  ;;  %v6783_v22 = vpop.permute.xlu0 %4566  ;;  %4841 = vrot.lane.b32.xlu1 %v6766_v19, %s5167_s14 }
 0x1e3   : > { %8426 = vst [vmem:[#allocation23_spill] sm:$0xff] %v6781_v6  ;;  %8427 = vst [vmem:[#allocation24_spill] sm:$0xff] %v6783_v22  ;;  %v6787_v16 = vunpack.i.l.bf16 %v6783_v22  ;;  %v1908_v57 = vpop.f32.mrf.mxu0 }
 0x1e4   : > { %v1909_v28 = vadd.f32 %v6388_v61, %v1908_v57  ;;  %v4860_v57 = vpack.i.bf16 %v6696_v32, %v6681_v31  ;;  %v6828_v31 = vsel %vm422_vm2, %v2005_v0, %v2006_v46 }
 0x1e5   : > { %8428 = vst [vmem:[#allocation25_spill] sm:$0xff] %v6787_v16  ;;  %v1600_v15 = vsel %vm1569_vm9, %v1567_v26, %v6787_v16  ;;  %v1601_v20 = vsel %vm1569_vm9, %v1568_v51, %v6787_v16  ;;  %v1910_v51 = vpop.f32.mrf.mxu0  ;;  %8432 = vst [vmem:[#allocation29_spill] sm:$0xff] %v6828_v31 }
 0x1e6   : > { %v6803_v60 = vpop.permute.xlu0 %4586  ;;  %v1633_v27 = vsel %vm1602_vm10, %v1600_v15, %v6795_v42  ;;  %v1634_v34 = vsel %vm1602_vm10, %v1601_v20, %v6795_v42  ;;  %v6811_v11 = vmax.f32 %v1909_v28, 0.0  ;;  %4851 = vrot.lane.b32.xlu1 %v4850_v50, %s5163_s23  ;;  %v4582_v26 = vpop.permute.xlu1 %4581 }
 0x1e7   : > { %8430 = vst [vmem:[#allocation27_spill] sm:$0xff] %v6803_v60  ;;  %v1665_v16 = vpack.c.bf16 %v1634_v34, %v1633_v27  ;;  %v1911_v49 = vpop.f32.mrf.mxu0 }
 0x1e8   : > { %v2007_v25 = vrot.slane %v6811_v11, 7  ;;  %v2128_v15 = vrot.slane %v6811_v11, 1  ;;  %v1912_v42 = vadd.f32 %v6388_v61, %v1911_v49  ;;  %v6823_v28 = vpack.i.bf16 %v6811_v11, %v6746_v24 }
 0x1e9   : > { %1947 = vmatmul.mubr.bf16.gmra.mxu0 %v1665_v16  ;;  %v1913_v27 = vpop.f32.mrf.mxu0 }
 0x1ea   : > { %v6818_v20 = vpop.permute.xlu0 %4591  ;;  %8431 = vst [vmem:[#allocation28_spill] sm:$0xff] %v6823_v28  ;;  %4861 = vrot.lane.b32.xlu1 %v4860_v57, %s5161_s21  ;;  %v2027_v50 = vsel %vm422_vm2, %v2006_v46, %v2007_v25  ;;  %v6832_v34 = vmax.f32 %v1912_v42, 0.0  ;;  %v2149_v16 = vsel %vm544_vm0, %v2127_v35, %v2128_v15  ;;  %v6840_v51 = vpop.permute.xlu1 %4601  ;;  %v2029_v42 = vsel %vm422_vm2, %v8434_v40, %v2005_v0 }
 0x1eb   : > { %v6838_v49 = vsel %vm371_vm1, %v2027_v50, 0.0  ;;  %v6851_v35 = vsel %vm388_vm3, %v2149_v16, 0.0  ;;  %v6864_v32 = vsel %vm371_vm1, %v2029_v42, 0.0  ;;  %v4583_v46 = vunpack.i.l.bf16 %v4582_v26 }
 0x1ec   : > { %8433 = vst [vmem:[#allocation30_spill] sm:$0xff] %v6838_v49  ;;  %v4870_v14 = vpack.i.bf16 %v6838_v49, %v6828_v31  ;;  %v8319_v27 = vrot.slane %v6832_v34, 7  ;;  %8435 = vst [vmem:[#allocation31_spill] sm:$0xff] %v6851_v35  ;;  %v4584_v42 = vunpack.i.h.bf16 %v4582_v26  ;;  %v2129_v18 = vrot.slane %v6832_v34, 1 }
 0x1ed   : > { %v4900_v26 = vpack.i.bf16 %v6851_v35, %v6774_v47 }
 0x1ee   : > { %v4597_v57 = vpop.permute.xlu0 %4596  ;;  %4871 = vrot.lane.b32.xlu1 %v4870_v14, %s5166_s11  ;;  %v6860_v50 = vsel %vm422_vm2, %v2007_v25, %v8319_v27  ;;  %v4890_v25 = vpack.i.bf16 %v6828_v31, %v6864_v32  ;;  %v2989_v29 = vsel %vm1406_vm4, %v6429_v21, %v4584_v42 }
 0x1ef   : > { %8436 = vst [vmem:[#allocation32_spill] sm:$0xff] %v6860_v50  ;;  %v4598_v14 = vunpack.i.l.bf16 %v4597_v57  ;;  %v4599_v56 = vunpack.i.h.bf16 %v4597_v57 }
 0x1f0   : > { %v6866_v0 = vpop.permute.xlu1 %4616 }
 0x1f1   : > { %v1916_v40 = vpop.f32.mrf.mxu0 }
 0x1f2   : > { %v6868_v16 = vpop.permute.xlu0 %4606  ;;  %v1917_v45 = vadd.f32 %v6388_v61, %v1916_v40  ;;  %4881 = vrot.lane.b32.xlu1 %v6766_v19, %s5162_s22  ;;  %v2988_v19 = vsel %vm1406_vm4, %v6414_v33, %v4583_v46  ;;  %v3019_v46 = vsel %vm1438_vm5, %v2989_v29, %v4599_v56 }
 0x1f3   : > { %v1918_v23 = vpop.f32.mrf.mxu0 }
 0x1f4   : > { %v6875_v27 = vmax.f32 %v1917_v45, 0.0  ;;  %v6878_v38 = vpop.permute.xlu1 %4621  ;;  %v3018_v45 = vsel %vm1438_vm5, %v2988_v19, %v4598_v14 }
 0x1f5   : > { %v1919_v58 = vpop.f32.mrf.mxu0  ;;  %v4624_v6 = vunpack.i.h.bf16 %v6878_v38 }
 0x1f6   : > { %8437 = vst [vmem:[#allocation33_spill] sm:$0xff] %v6875_v27  ;;  %v6880_v43 = vpop.permute.xlu0 %4611  ;;  %v2130_v23 = vrot.slane %v6875_v27, 1  ;;  %v1920_v40 = vadd.f32 %v6388_v61, %v1919_v58  ;;  %4891 = vrot.lane.b32.xlu1 %v4890_v25, %s5164_s26  ;;  %v4604_v58 = vunpack.i.h.bf16 %v6840_v51  ;;  %v6901_v25 = vsel %vm544_vm0, %v2128_v15, %v2129_v18 }
 0x1f7   : > { %v1921_v37 = vpop.f32.mrf.mxu0  ;;  %8439 = vst [vmem:[#allocation35_spill] sm:$0xff] %v6901_v25  ;;  %v4613_v21 = vunpack.i.l.bf16 %v6880_v43  ;;  %v6911_v56 = vpack.i.bf16 %v6875_v27, %v6832_v34 }
 0x1f8   : > { %v6890_v57 = vmax.f32 %v1920_v40, 0.0  ;;  %v2147_v31 = vsel %vm544_vm0, %v2129_v18, %v2130_v23  ;;  %v4627_v37 = vpop.permute.xlu1 %4626  ;;  %v3050_v19 = vsel %vm1470_vm6, %v3018_v45, %v4604_v58  ;;  %v4594_v45 = vunpack.i.h.bf16 %v6818_v20 }
 0x1f9   : > { %v6905_v40 = vsel %vm388_vm3, %v2147_v31, 0.0  ;;  %v4628_v29 = vunpack.i.l.bf16 %v4627_v37  ;;  %v4920_v31 = vpack.i.bf16 %v6901_v25, %v6851_v35 }
 0x1fa   : > { %8438 = vst [vmem:[#allocation34_spill] sm:$0xff] %v6890_v57  ;;  %v4637_v22 = vpop.permute.xlu0 %4636  ;;  %v8331_v14 = vrot.slane %v6890_v57, 1  ;;  %8440 = vst [vmem:[#allocation36_spill] sm:$0xff] %v6905_v40  ;;  %4901 = vrot.lane.b32.xlu1 %v4900_v26, %s5165_s29  ;;  %v3082_v15 = vsel %vm1503_vm7, %v3050_v19, %v4594_v45  ;;  %v2009_v26 = vrot.slane %v6875_v27, 7  ;;  %v4614_v19 = vunpack.i.h.bf16 %v6880_v43 }
 0x1fb   : > { %v4638_v42 = vunpack.i.l.bf16 %v4637_v22  ;;  %v4639_v60 = vunpack.i.h.bf16 %v4637_v22  ;;  %v3114_v35 = vsel %vm1536_vm8, %v3082_v15, %v4624_v6  ;;  %v2010_v25 = vrot.slane %v6890_v57, 7 }
 0x1fc   : > { %v6918_v18 = vsel %vm544_vm0, %v2130_v23, %v8331_v14  ;;  %v4632_v23 = vpop.permute.xlu1 %4631 }
 0x1fd   : > { %8441 = vst [vmem:[#allocation37_spill] sm:$0xff] %v6918_v18  ;;  %v3051_v58 = vsel %vm1470_vm6, %v3019_v46, %v4638_v42  ;;  %v4633_v50 = vunpack.i.l.bf16 %v4632_v23  ;;  %v4930_v46 = vpack.i.bf16 %v6832_v34, %v6811_v11  ;;  %v2990_v42 = vsel %vm1406_vm4, %v6440_v1, %v4613_v21 }
 0x1fe   : > { %v4652_v14 = vpop.permute.xlu0 %4651  ;;  %v3083_v49 = vsel %vm1503_vm7, %v3051_v58, %v4628_v29  ;;  %4911 = vrot.lane.b32.xlu1 %v6911_v56, %s5167_s14  ;;  %v4629_v11 = vunpack.i.h.bf16 %v4627_v37  ;;  %v4634_v27 = vunpack.i.h.bf16 %v4632_v23 }
 0x1ff   : > { %v4653_v40 = vunpack.i.l.bf16 %v4652_v14  ;;  %v1924_v29 = vpop.f32.mrf.mxu0  ;;  %v3020_v45 = vsel %vm1438_vm5, %v2990_v42, %v4633_v50  ;;  %v4654_v43 = vunpack.i.h.bf16 %v4652_v14 }
 0x200   : > { %v1925_v58 = vadd.f32 %v6388_v61, %v1924_v29  ;;  %v3052_v1 = vsel %vm1470_vm6, %v3020_v45, %v4639_v60  ;;  %v4642_v21 = vpop.permute.xlu1 %4641 }
 0x201   : > { %v4643_v24 = vunpack.i.l.bf16 %v4642_v21  ;;  %v1926_v28 = vpop.f32.mrf.mxu0  ;;  %v3146_v50 = vsel %vm1569_vm9, %v3114_v35, %v4653_v40  ;;  %v3084_v29 = vsel %vm1503_vm7, %v3052_v1, %v4629_v11  ;;  %v8444_v1 = vrot.slane %v6832_v34, 7 }
 0x202   : > { %v4657_v22 = vpop.permute.xlu0 %4656  ;;  %v6948_v8 = vmax.f32 %v1925_v58, 0.0  ;;  %4921 = vrot.lane.b32.xlu1 %v4920_v31, %s5163_s23  ;;  %v2991_v31 = vsel %vm1406_vm4, %v6461_v13, %v4614_v19 }
 0x203   : > { %v4659_v47 = vunpack.i.h.bf16 %v4657_v22  ;;  %v4658_v42 = vunpack.i.l.bf16 %v4657_v22  ;;  %v1927_v15 = vpop.f32.mrf.mxu0  ;;  %v6963_v45 = vsel %vm1602_vm10, %v3146_v50, %v4643_v24  ;;  %v3021_v19 = vsel %vm1438_vm5, %v2991_v31, %v4634_v27 }
 0x204   : > { %v2011_v6 = vrot.slane %v6948_v8, 7  ;;  %v2132_v60 = vrot.slane %v6948_v8, 1  ;;  %v6958_v23 = vpack.i.bf16 %v6948_v8, %v6890_v57  ;;  %v4647_v14 = vpop.permute.xlu1 %4646  ;;  %v1928_v40 = vadd.f32 %v6388_v61, %v1927_v15 }
 0x205   : > { %v3116_v37 = vsel %vm1536_vm8, %v3084_v29, %v4659_v47  ;;  %v3115_v28 = vsel %vm1536_vm8, %v3083_v49, %v4658_v42  ;;  %v4649_v58 = vunpack.i.h.bf16 %v4647_v14  ;;  %v6969_v47 = vsel %vm422_vm2, %v2009_v26, %v2010_v25  ;;  %v1929_v11 = vpop.f32.mrf.mxu0 }
 0x206   : > { %8442 = vst [vmem:[#allocation38_spill] sm:$0xff] %v6958_v23  ;;  %v4662_v35 = vpop.permute.xlu0 %4661  ;;  %8443 = vst [vmem:[#allocation39_spill] sm:$0xff] %v6969_v47  ;;  %v2025_v49 = vsel %vm422_vm2, %v8444_v1, %v2009_v26  ;;  %v4648_v22 = vunpack.i.l.bf16 %v4647_v14  ;;  %4931 = vrot.lane.b32.xlu1 %v4930_v46, %s5161_s21  ;;  %v2023_v24 = vsel %vm422_vm2, %v2010_v25, %v2011_v6  ;;  %v6978_v50 = vmax.f32 %v1928_v40, 0.0 }
 0x207   : > { %v3147_v13 = vsel %vm1569_vm9, %v3115_v28, %v4654_v43  ;;  %v4644_v42 = vunpack.i.h.bf16 %v4642_v21  ;;  %v4664_v29 = vunpack.i.h.bf16 %v4662_v35  ;;  %v6984_v34 = vsel %vm371_vm1, %v2023_v24, 0.0 }
 0x208   : > { %8445 = vst [vmem:[#allocation40_spill] sm:$0xff] %v6984_v34  ;;  %v4663_v15 = vunpack.i.l.bf16 %v4662_v35  ;;  %v4672_v26 = vpop.permute.xlu1 %4671  ;;  %v4940_v46 = vpack.i.bf16 %v6984_v34, %v6969_v47  ;;  %v8346_v25 = vrot.slane %v6978_v50, 7  ;;  %v8446_v43 = vrot.slane %v6890_v57, 1 }
 0x209   : > { %v2993_v21 = vsel %vm1406_vm4, %v6490_v7, %v4649_v58  ;;  %v4673_v28 = vunpack.i.l.bf16 %v4672_v26  ;;  %v2992_v31 = vsel %vm1406_vm4, %v6471_v44, %v4648_v22  ;;  %v4674_v11 = vunpack.i.h.bf16 %v4672_v26 }
 0x20a   : > { %v4667_v14 = vpop.permute.xlu0 %4666  ;;  %v2145_v27 = vsel %vm544_vm0, %v8446_v43, %v2132_v60  ;;  %4941 = vrot.lane.b32.xlu1 %v4940_v46, %s5166_s11  ;;  %v7004_v1 = vsel %vm422_vm2, %v2011_v6, %v8346_v25  ;;  %v7007_v24 = vsel %vm1602_vm10, %v3147_v13, %v4644_v42  ;;  %v7014_v44 = vsel %vm371_vm1, %v2025_v49, 0.0 }
 0x20b   : > { %v4669_v40 = vunpack.i.h.bf16 %v4667_v14  ;;  %v4668_v35 = vunpack.i.l.bf16 %v4667_v14  ;;  %8447 = vst [vmem:[#allocation41_spill] sm:$0xff] %v7004_v1  ;;  %8448 = vst [vmem:[#allocation42_spill] sm:$0xff] %v7007_v24  ;;  %v3053_v7 = vsel %vm1470_vm6, %v3021_v19, %v4673_v28  ;;  %v2133_v6 = vrot.slane %v6978_v50, 1 }
 0x20c   : > { %8449 = vst [vmem:[#allocation43_spill] sm:$0xff] %v7014_v44  ;;  %v4687_v46 = vpop.permute.xlu1 %4686  ;;  %v3085_v13 = vsel %vm1503_vm7, %v3053_v7, %v4663_v15  ;;  %v7024_v28 = vsel %vm388_vm3, %v2145_v27, 0.0 }
 0x20d   : > { %v3023_v58 = vsel %vm1438_vm5, %v2993_v21, %v4669_v40  ;;  %v3022_v14 = vsel %vm1438_vm5, %v2992_v31, %v4668_v35  ;;  %v1932_v22 = vpop.f32.mrf.mxu0  ;;  %v4688_v42 = vunpack.i.l.bf16 %v4687_v46  ;;  %8450 = vst [vmem:[#allocation44_spill] sm:$0xff] %v7024_v28  ;;  %v4960_v40 = vpack.i.bf16 %v6969_v47, %v7014_v44 }
 0x20e   : > { %v3054_v26 = vsel %vm1470_vm6, %v3022_v14, %v4674_v11  ;;  %v7017_v43 = vpop.permute.xlu0 %4676  ;;  %v1933_v19 = vadd.f32 %v6388_v61, %v1932_v22  ;;  %4951 = vrot.lane.b32.xlu1 %v6911_v56, %s5162_s22  ;;  %v7040_v56 = vld [vmem:[%s8280_s2] ss:$0 sm:$0xff]  ;;  %v7047_v14 = vsel %vm544_vm0, %v2132_v60, %v2133_v6  ;;  %v4689_v25 = vunpack.i.h.bf16 %v4687_v46 }
 0x20f   : > { %v1934_v21 = vpop.f32.mrf.mxu0  ;;  %v3086_v49 = vsel %vm1503_vm7, %v3054_v26, %v4664_v29  ;;  %v3148_v61 = vsel %vm1569_vm9, %v3116_v37, %v4688_v42  ;;  %8451 = vst [vmem:[#allocation45_spill] sm:$0xff] %v7047_v14  ;;  %v4990_v60 = vpack.i.bf16 %v7047_v14, %v7024_v28 }
 0x210   : > { %v7031_v35 = vmax.f32 %v1933_v19, 0.0  ;;  %v4692_v11 = vpop.permute.xlu1 %4691  ;;  %v4970_v19 = vpack.i.bf16 %v7024_v28, %v6918_v18 }
 0x211   : > { %v1935_v31 = vpop.f32.mrf.mxu0  ;;  %v4694_v22 = vunpack.i.h.bf16 %v4692_v11  ;;  %v4693_v37 = vunpack.i.l.bf16 %v4692_v11  ;;  %v4678_v11 = vunpack.i.l.bf16 %v7017_v43 }
 0x212   : > { %v4682_v7 = vpop.permute.xlu0 %4681  ;;  %v2134_v27 = vrot.slane %v7031_v35, 1  ;;  %v1936_v29 = vadd.f32 %v7040_v56, %v1935_v31  ;;  %4961 = vrot.lane.b32.xlu1 %v4960_v40, %s5164_s26  ;;  %v7070_v46 = vpack.i.bf16 %v7031_v35, %v6978_v50 }
 0x213   : > { %v1937_v26 = vpop.f32.mrf.mxu0  ;;  %v3117_v31 = vsel %vm1536_vm8, %v3085_v13, %v4693_v37  ;;  %v3118_v15 = vsel %vm1536_vm8, %v3086_v49, %v4694_v22  ;;  %v4684_v34 = vunpack.i.h.bf16 %v4682_v7  ;;  %v4679_v49 = vunpack.i.h.bf16 %v7017_v43 }
 0x214   : > { %v7052_v42 = vmax.f32 %v1936_v29, 0.0  ;;  %v2143_v21 = vsel %vm544_vm0, %v2133_v6, %v2134_v27  ;;  %v4697_v26 = vpop.permute.xlu1 %4696  ;;  %v4683_v6 = vunpack.i.l.bf16 %v4682_v7 }
 0x215   : > { %v7064_v29 = vsel %vm388_vm3, %v2143_v21, 0.0  ;;  %v4698_v1 = vunpack.i.l.bf16 %v4697_v26  ;;  %v4699_v37 = vunpack.i.h.bf16 %v4697_v26 }
 0x216   : > { %v4707_v40 = vpop.permute.xlu0 %4706  ;;  %v8355_v47 = vrot.slane %v7052_v42, 1  ;;  %8452 = vst [vmem:[#allocation46_spill] sm:$0xff] %v7064_v29  ;;  %4971 = vrot.lane.b32.xlu1 %v4970_v19, %s5165_s29 }
 0x217   : > { %v4708_v13 = vunpack.i.l.bf16 %v4707_v40  ;;  %v4709_v7 = vunpack.i.h.bf16 %v4707_v40 }
 0x218   : > { %v7076_v22 = vsel %vm544_vm0, %v2134_v27, %v8355_v47  ;;  %v4702_v28 = vpop.permute.xlu1 %4701  ;;  %v7089_v27 = vsel %vm1602_vm10, %v3148_v61, %v4678_v11  ;;  %v3149_v47 = vsel %vm1569_vm9, %v3117_v31, %v4689_v25 }
 0x219   : > { %8453 = vst [vmem:[#allocation47_spill] sm:$0xff] %v7076_v22  ;;  %v3055_v21 = vsel %vm1470_vm6, %v3023_v58, %v4708_v13  ;;  %v2995_v58 = vsel %vm1406_vm4, %v6531_v63, %v4684_v34  ;;  %v2994_v13 = vsel %vm1406_vm4, %v6510_v4, %v4683_v6  ;;  %v4704_v19 = vunpack.i.h.bf16 %v4702_v28 }
 0x21a   : > { %v7085_v57 = vpop.permute.xlu0 %4721  ;;  %v3087_v18 = vsel %vm1503_vm7, %v3055_v21, %v4698_v1  ;;  %v4703_v43 = vunpack.i.l.bf16 %v4702_v28  ;;  %4981 = vrot.lane.b32.xlu1 %v7070_v46, %s5167_s14  ;;  %v7104_v61 = vsel %vm1602_vm10, %v3149_v47, %v4679_v49  ;;  %v2013_v28 = vrot.slane %v7031_v35, 7 }
 0x21b   : > { %v4723_v23 = vunpack.i.l.bf16 %v7085_v57  ;;  %v1940_v1 = vpop.f32.mrf.mxu0  ;;  %8454 = vst [vmem:[#allocation48_spill] sm:$0xff] %v7104_v61  ;;  %v3025_v34 = vsel %vm1438_vm5, %v2995_v58, %v4704_v19  ;;  %v5000_v6 = vpack.i.bf16 %v6978_v50, %v6948_v8  ;;  %v2014_v21 = vrot.slane %v7052_v42, 7 }
 0x21c   : > { %v3024_v63 = vsel %vm1438_vm5, %v2994_v13, %v4703_v43  ;;  %v1941_v4 = vadd.f32 %v7040_v56, %v1940_v1  ;;  %v4712_v11 = vpop.permute.xlu1 %4711 }
 0x21d   : > { %v3056_v31 = vsel %vm1470_vm6, %v3024_v63, %v4709_v7  ;;  %v4713_v47 = vunpack.i.l.bf16 %v4712_v11  ;;  %v1942_v43 = vpop.f32.mrf.mxu0  ;;  %v3150_v19 = vsel %vm1569_vm9, %v3118_v15, %v4723_v23 }
 0x21e   : > { %v4727_v26 = vpop.permute.xlu0 %4726  ;;  %v7114_v40 = vmax.f32 %v1941_v4, 0.0  ;;  %v3088_v13 = vsel %vm1503_vm7, %v3056_v31, %v4699_v37  ;;  %4991 = vrot.lane.b32.xlu1 %v4990_v60, %s5163_s23  ;;  %v4724_v60 = vunpack.i.h.bf16 %v7085_v57  ;;  %v8457_v57 = vrot.slane %v7052_v42, 1 }
 0x21f   : > { %v4729_v49 = vunpack.i.h.bf16 %v4727_v26  ;;  %v4728_v58 = vunpack.i.l.bf16 %v4727_v26  ;;  %v1943_v63 = vpop.f32.mrf.mxu0  ;;  %v7129_v37 = vsel %vm1602_vm10, %v3150_v19, %v4713_v47  ;;  %v4714_v19 = vunpack.i.h.bf16 %v4712_v11 }
 0x220   : > { %v8357_v7 = vrot.slane %v7114_v40, 7  ;;  %v8358_v1 = vrot.slane %v7114_v40, 1  ;;  %v7124_v4 = vpack.i.bf16 %v7114_v40, %v7052_v42  ;;  %v4717_v25 = vpop.permute.xlu1 %4716  ;;  %v1944_v15 = vadd.f32 %v7040_v56, %v1943_v63  ;;  %8455 = vst [vmem:[#allocation49_spill] sm:$0xff] %v7129_v37 }
 0x221   : > { %v3120_v8 = vsel %vm1536_vm8, %v3088_v13, %v4729_v49  ;;  %v3119_v43 = vsel %vm1536_vm8, %v3087_v18, %v4728_v58  ;;  %v4719_v31 = vunpack.i.h.bf16 %v4717_v25  ;;  %v4718_v26 = vunpack.i.l.bf16 %v4717_v25  ;;  %v1945_v13 = vpop.f32.mrf.mxu0 }
 0x222   : > { %v4732_v23 = vpop.permute.xlu0 %4731  ;;  %v7134_v49 = vsel %vm422_vm2, %v2013_v28, %v2014_v21  ;;  %5001 = vrot.lane.b32.xlu1 %v5000_v6, %s5161_s21  ;;  %v2019_v18 = vsel %vm422_vm2, %v2014_v21, %v8357_v7  ;;  %v7141_v58 = vmax.f32 %v1944_v15, 0.0  ;;  %v2141_v25 = vsel %vm544_vm0, %v8457_v57, %v8358_v1 }
 0x223   : > { %8456 = vst [vmem:[#allocation50_spill] sm:$0xff] %v7134_v49  ;;  %v7153_v6 = vsel %vm371_vm1, %v2019_v18, 0.0  ;;  %v8459_v63 = vrot.slane %v6978_v50, 7  ;;  %v7161_v15 = vsel %vm388_vm3, %v2141_v25, 0.0  ;;  %v4734_v13 = vunpack.i.h.bf16 %v4732_v23 }
 0x224   : > { %8458 = vst [vmem:[#allocation51_spill] sm:$0xff] %v7153_v6  ;;  %8460 = vst [vmem:[#allocation52_spill] sm:$0xff] %v7161_v15  ;;  %v4733_v7 = vunpack.i.l.bf16 %v4732_v23  ;;  %v4742_v57 = vpop.permute.xlu1 %4741  ;;  %v5010_v11 = vpack.i.bf16 %v7153_v6, %v7134_v49  ;;  %v2996_v25 = vsel %vm1406_vm4, %v6547_v53, %v4718_v26  ;;  %v3151_v23 = vsel %vm1569_vm9, %v3119_v43, %v4724_v60 }
 0x225   : > { %v2021_v21 = vsel %vm422_vm2, %v8459_v63, %v2013_v28  ;;  %v4744_v47 = vunpack.i.h.bf16 %v4742_v57  ;;  %v4743_v61 = vunpack.i.l.bf16 %v4742_v57  ;;  %v2997_v28 = vsel %vm1406_vm4, %v6569_v9, %v4719_v31 }
 0x226   : > { %v4737_v1 = vpop.permute.xlu0 %4736  ;;  %5011 = vrot.lane.b32.xlu1 %v5010_v11, %s5166_s11  ;;  %v7182_v9 = vsel %vm371_vm1, %v2021_v21, 0.0  ;;  %v7187_v60 = vsel %vm1602_vm10, %v3151_v23, %v4714_v19 }
 0x227   : > { %v4739_v50 = vunpack.i.h.bf16 %v4737_v1  ;;  %v4738_v37 = vunpack.i.l.bf16 %v4737_v1  ;;  %v3057_v24 = vsel %vm1470_vm6, %v3025_v34, %v4743_v61  ;;  %8461 = vst [vmem:[#allocation53_spill] sm:$0xff] %v7182_v9 }
 0x228   : > { %v4757_v31 = vpop.permute.xlu1 %4756  ;;  %v3089_v43 = vsel %vm1503_vm7, %v3057_v24, %v4733_v7 }
 0x229   : > { %v7177_v18 = vsel %vm1438_vm5, %v2997_v28, %v4739_v50  ;;  %v3026_v1 = vsel %vm1438_vm5, %v2996_v25, %v4738_v37  ;;  %v4758_v57 = vunpack.i.l.bf16 %v4757_v31  ;;  %v5030_v37 = vpack.i.bf16 %v7134_v49, %v7182_v9  ;;  %v8502_v49 = vld [vmem:[#allocation6_spill] sm:$0xff] }
 0x22a   : > { %v3058_v53 = vsel %vm1470_vm6, %v3026_v1, %v4744_v47  ;;  %v4747_v26 = vpop.permute.xlu0 %4746  ;;  %5021 = vrot.lane.b32.xlu1 %v7070_v46, %s5162_s22  ;;  %v4759_v47 = vunpack.i.h.bf16 %v4757_v31  ;;  %v5040_v46 = vpack.i.bf16 %v7161_v15, %v7076_v22 }
 0x22b   : > { %v4748_v61 = vunpack.i.l.bf16 %v4747_v26  ;;  %v3090_v34 = vsel %vm1503_vm7, %v3058_v53, %v4734_v13  ;;  %v3152_v21 = vsel %vm1569_vm9, %v3120_v8, %v4758_v57  ;;  %v4749_v19 = vunpack.i.h.bf16 %v4747_v26 }
 0x22c   : > { %v4762_v11 = vpop.permute.xlu1 %4761 }
 0x22d   : > { %v7198_v24 = vsel %vm1602_vm10, %v3152_v21, %v4748_v61  ;;  %v4763_v7 = vunpack.i.l.bf16 %v4762_v11  ;;  %v4764_v26 = vunpack.i.h.bf16 %v4762_v11  ;;  %v5104_v11 = vld [vmem:[%s8281_s3 + $0x38] sm:$0xff]  }
 0x22e   : > { %v7195_v50 = vpop.permute.xlu0 %4751  ;;  %5031 = vrot.lane.b32.xlu1 %v5030_v37, %s5164_s26  ;;  %3363 = vmatpush1.bf16.msra.mxu1 %v5104_v11 }
 0x22f   : > { %v3121_v28 = vsel %vm1536_vm8, %v3089_v43, %v4763_v7  ;;  %v3122_v43 = vsel %vm1536_vm8, %v3090_v34, %v4764_v26  ;;  %v5105_v34 = vld [vmem:[%s8281_s3 + $0x30] sm:$0xff]   ;;  %v8467_v7 = vrot.slane %v6395_v30, 1 }
 0x230   : > { %v7206_v8 = vpop.permute.xlu1 %4766  ;;  %v3153_v23 = vsel %vm1569_vm9, %v3121_v28, %v4759_v47  ;;  %v5107_v28 = vld [vmem:[%s8281_s3 + $0x20] sm:$0xff]   ;;  %v5109_v26 = vld [vmem:[%s8281_s3 + $0x10] sm:$0xff]  }
 0x231   : > { %v7213_v1 = vsel %vm1602_vm10, %v3153_v23, %v4749_v19  ;;  %v8462_v19 = vmov 0   ;;  %v5108_v23 = vld [vmem:[%s8281_s3 + $0x18] sm:$0xff]  }
 0x232   : > { %v7208_v25 = vpop.permute.xlu0 %4776  ;;  %5041 = vrot.lane.b32.xlu1 %v5040_v46, %s5165_s29  ;;  %3364 = vmatprep.subr.bf16.mxu1 %v8462_v19  ;;  %v5106_v46 = vld [vmem:[%s8281_s3 + $0x28] sm:$0xff]  }
 0x233   : > { %3365 = vmatpush1.bf16.msra.mxu1 %v5105_v34 }
 0x234   : > { %v7215_v53 = vpop.permute.xlu1 %4771  ;;  %3366 = vmatprep.subr.bf16.mxu1 %v8462_v19 }
 0x236   : > { %v7217_v31 = vpop.permute.xlu0 %4786 }
 0x237   : > { %v4788_v57 = vunpack.i.l.bf16 %v7217_v31  ;;  %3367 = vmatpush1.bf16.msra.mxu1 %v5106_v46  ;;  %v5111_v46 = vld [vmem:[%s8281_s3] sm:$0xff]  }
 0x238   : > { %v7220_v61 = vpop.permute.xlu1 %4781  ;;  %3368 = vmatprep.subr.bf16.mxu1 %v8462_v19 }
 0x239   : > { %v4783_v37 = vunpack.i.l.bf16 %v7220_v61  ;;  %v3154_v21 = vsel %vm1569_vm9, %v3122_v43, %v4788_v57  ;;  %v5110_v57 = vld [vmem:[%s8281_s3 + $0x8] sm:$0xff]  }
 0x23b   : > { %v7226_v47 = vsel %vm1602_vm10, %v3154_v21, %v4783_v37  ;;  %3369 = vmatpush1.bf16.msra.mxu1 %v5107_v28  ;;  %v8362_v21 = vrot.slane %v7141_v58, 1 }
 0x23c   : > { %3370 = vmatprep.subr.bf16.mxu1 %v8462_v19 }
 0x23f   : > { %3371 = vmatpush1.bf16.msra.mxu1 %v5108_v23 }
 0x240   : > { %3372 = vmatprep.subr.bf16.mxu1 %v8462_v19 }
 0x243   : > { %3373 = vmatpush1.bf16.msra.mxu1 %v5109_v26 }
 0x244   : > { %3374 = vmatprep.subr.bf16.mxu1 %v8462_v19 }
 0x247   : > { %3375 = vmatpush1.bf16.msra.mxu1 %v5110_v57  ;;  %v8463_v57 = vrot.slane %v7114_v40, 1 }
 0x248   : > { %3376 = vmatprep.subr.bf16.mxu1 %v8462_v19 }
 0x24b   : > { %3377 = vmatpush1.bf16.msra.mxu1 %v5111_v46 }
 0x24c   : > { %3392 = vmatprep.subr.bf16.mxu1 %v8462_v19  ;;  %v4554_v19 = vunpack.i.h.bf16 %v6713_v48  ;;  %v4564_v48 = vunpack.i.h.bf16 %v6731_v54 }
 0x2a9   : > { %v1948_v43 = vpop.f32.mrf.mxu0 }
 0x2aa   : > { %v1949_v37 = vadd.f32 %v7040_v56, %v1948_v43 }
 0x2ab   : > { %v1950_v11 = vpop.f32.mrf.mxu0 }
 0x2ac   : > { %v7260_v34 = vmax.f32 %v1949_v37, 0.0  ;;  %v7274_v37 = vsel %vm544_vm0, %v8463_v57, %v8362_v21 }
 0x2ad   : > { %v1951_v28 = vpop.f32.mrf.mxu0  ;;  %8464 = vst [vmem:[#allocation54_spill] sm:$0xff] %v7274_v37  ;;  %v5060_v57 = vpack.i.bf16 %v7274_v37, %v7161_v15  ;;  %v4618_v15 = vunpack.i.l.bf16 %v6866_v0 }
 0x2ae   : > { %v1952_v23 = vadd.f32 %v7040_v56, %v1951_v28  ;;  %v5050_v26 = vpack.i.bf16 %v7260_v34, %v7141_v58  ;;  %v5112_v56 = vld [vmem:[%s8281_s3 + $0x40] sm:$0xff]   ;;  %v8363_v46 = vrot.slane %v7260_v34, 1 }
 0x2af   : > { %v1953_v43 = vpop.f32.mrf.mxu0  ;;  %3393 = vmatpush2.bf16.msra.mxu1 %v5112_v56 }
 0x2b0   : > { %v7277_v11 = vmax.f32 %v1952_v23, 0.0  ;;  %5051 = vrot.lane.b32.xlu1 %v5050_v26, %s5167_s14  ;;  %3991 = vmatprep.subr.mxu1 %v8406_v39  ;;  %v8465_v23 = vrot.slane %v6395_v30, 7 }
 0x2b2   : > { %v2017_v28 = vrot.slane %v7277_v11, 7  ;;  %v2204_v43 = vrot.slane %v7277_v11, 1 }
 0x2b4   : > { %5061 = vrot.lane.b32.xlu1 %v5060_v57, %s5163_s23  ;;  %v2047_v26 = vsel %vm422_vm2, %v2017_v28, %v8465_v23  ;;  %v7299_v63 = vsel %vm544_vm0, %v8363_v46, %v2204_v43  ;;  %v2206_v56 = vsel %vm544_vm0, %v2204_v43, %v8467_v7  ;;  %v4603_v23 = vunpack.i.l.bf16 %v6840_v51 }
 0x2b5   : > { %8466 = vst [vmem:[#allocation55_spill] sm:$0xff] %v7299_v63  ;;  %v2048_v57 = vsel %vm371_vm1, %v2047_v26, 0.0  ;;  %v7310_v13 = vsel %vm388_vm3, %v2206_v56, 0.0  ;;  %v4593_v7 = vunpack.i.l.bf16 %v6818_v20  ;;  %v4623_v43 = vunpack.i.l.bf16 %v6878_v38 }
 0x2b6   : > { %8468 = vst [vmem:[#allocation56_spill] sm:$0xff] %v7310_v13  ;;  %v2987_v21 = vsel %vm1406_vm4, %v2048_v57, %v4554_v19  ;;  %v4800_v46 = vpack.i.bf16 %v6414_v33, %v2048_v57  ;;  %v8469_v26 = vpack.i.bf16 %v7141_v58, %v7114_v40  ;;  %v4619_v33 = vunpack.i.h.bf16 %v6866_v0 }
 0x2b7   : > { %v3017_v54 = vsel %vm1438_vm5, %v2987_v21, %v4564_v48  ;;  %v2199_v19 = vrot.slane %v7260_v34, 7  ;;  %v4609_v20 = vunpack.i.h.bf16 %v6868_v16  ;;  %v2016_v57 = vrot.slane %v7141_v58, 7 }
 0x2b8   : > { %5071 = vrot.lane.b32.xlu1 %v8469_v26, %s5161_s21  ;;  %4801 = vrot.lane.b32.xlu0 %v4800_v46, %s5164_s26  ;;  %v3049_v51 = vsel %vm1470_vm6, %v3017_v54, %v4603_v23  ;;  %v8471_v26 = vpack.i.bf16 %v6645_v41, %v6628_v17  ;;  %v8472_v17 = vpack.i.bf16 %v6752_v36, %v6761_v55  ;;  %v8473_v41 = vld [vmem:[#allocation28_spill] sm:$0xff] }
 0x2b9   : > { %v3081_v56 = vsel %vm1503_vm7, %v3049_v51, %v4593_v7  ;;  %v2200_v38 = vsel %vm422_vm2, %v2199_v19, %v2017_v28  ;;  %v2201_v7 = vsel %vm422_vm2, %v2016_v57, %v2199_v19  ;;  %v8470_v28 = vpack.i.bf16 %v6673_v12, %v6657_v62  ;;  %v8474_v19 = vld [vmem:[#allocation22_spill] sm:$0xff]  ;;  %v8491_v23 = vld [vmem:[#allocation40_spill] sm:$0xff] }
 0x2ba   : > { %v3113_v21 = vsel %vm1536_vm8, %v3081_v56, %v4623_v43  ;;  %v2202_v54 = vsel %vm371_vm1, %v2201_v7, 0.0  ;;  %v5090_v51 = vpack.i.bf16 %v7310_v13, %v7299_v63  ;;  %v8475_v56 = vpack.i.bf16 %v8474_v19, %v6752_v36  ;;  %v8480_v7 = vld [vmem:[#allocation30_spill] sm:$0xff] }
 0x2bb   : > { %v3145_v48 = vsel %vm1569_vm9, %v3113_v21, %v4619_v33  ;;  %v5080_v43 = vpack.i.bf16 %v2200_v38, %v2202_v54  ;;  %v4835_v33 = vpack.i.bf16 %v6864_v32, %v6720_v2 }
 0x2bc   : > { %2863 = vrot.lane.b32.xlu1 %v2200_v38, %s5166_s11  ;;  %4806 = vrot.lane.b32.xlu0 %v6688_v52, %s5167_s14  ;;  %v7339_v46 = vsel %vm1602_vm10, %v3145_v48, %v4609_v20  ;;  %v8477_v20 = vld [vmem:[#allocation19_spill] sm:$0xff]  ;;  %v8479_v38 = vld [vmem:[#allocation32_spill] sm:$0xff] }
 0x2bd   : > { %v4905_v48 = vpack.i.bf16 %v7014_v44, %v8479_v38 }
 0x2c0   : > { %2299 = vrot.lane.b32.xlu1 %v7141_v58, %s5162_s22  ;;  %4816 = vrot.lane.b32.xlu0 %v8470_v28, %s5163_s23  ;;  %v4925_v28 = vpack.i.bf16 %v8479_v38, %v8480_v7  ;;  %v8531_v38 = vpack.c.bf16 %v7226_v47, %v7213_v1 }
 0x2c4   : > { %5081 = vrot.lane.b32.xlu1 %v5080_v43, %s5164_s26  ;;  %4826 = vrot.lane.b32.xlu0 %v8471_v26, %s5161_s21  ;;  %v8481_v43 = vld [vmem:[#allocation36_spill] sm:$0xff]  ;;  %v8482_v26 = vld [vmem:[#allocation35_spill] sm:$0xff] }
 0x2c8   : > { %5091 = vrot.lane.b32.xlu1 %v5090_v51, %s5165_s29  ;;  %4836 = vrot.lane.b32.xlu0 %v4835_v33, %s5166_s11  ;;  %v8483_v51 = vpack.i.bf16 %v8481_v43, %v8482_v26  ;;  %v7395_v33 = vpop.permute.xlu1 %4796 }
 0x2cc   : > { %4846 = vrot.lane.b32.xlu0 %v6688_v52, %s5162_s22  ;;  %v8476_v52 = vld [vmem:[#allocation20_spill] sm:$0xff] }
 0x2cd   : > { %v8478_v21 = vpack.i.bf16 %v8476_v52, %v8477_v20  ;;  %v8487_v52 = vld [vmem:[#allocation34_spill] sm:$0xff]  ;;  %v8488_v20 = vld [vmem:[#allocation33_spill] sm:$0xff] }
 0x2d0   : > { %4856 = vrot.lane.b32.xlu0 %v4855_v5, %s5164_s26  ;;  %v8484_v5 = vld [vmem:[#allocation38_spill] sm:$0xff] }
 0x2d4   : > { %4866 = vrot.lane.b32.xlu0 %v8472_v17, %s5165_s29  ;;  %v7399_v17 = vpop.permute.xlu1 %4811 }
 0x2d8   : > { %4876 = vrot.lane.b32.xlu0 %v8473_v41, %s5167_s14 }
 0x2dc   : > { %4886 = vrot.lane.b32.xlu0 %v8475_v56, %s5163_s23  ;;  %v8485_v56 = vld [vmem:[#allocation37_spill] sm:$0xff] }
 0x2e0   : > { %4896 = vrot.lane.b32.xlu0 %v8478_v21, %s5161_s21  ;;  %v8489_v21 = vpack.i.bf16 %v8487_v52, %v8488_v20  ;;  %v8492_v52 = vpack.i.bf16 %v7064_v29, %v7047_v14  ;;  %v4608_v14 = vunpack.i.l.bf16 %v6868_v16  ;;  %v5085_v16 = vpack.i.bf16 %v7277_v11, %v7260_v34 }
 0x2e4   : > { %4906 = vrot.lane.b32.xlu0 %v4905_v48, %s5166_s11  ;;  %v7409_v48 = vpop.permute.xlu1 %4821 }
 0x2e8   : > { %4916 = vrot.lane.b32.xlu0 %v8473_v41, %s5162_s22  ;;  %v8486_v41 = vpack.i.bf16 %v8485_v56, %v8481_v43  ;;  %v7414_v30 = vpop.permute.xlu1 %4831 }
 0x2ec   : > { %4926 = vrot.lane.b32.xlu0 %v4925_v28, %s5164_s26  ;;  %v8490_v28 = vld [vmem:[#allocation41_spill] sm:$0xff]  ;;  %v7421_v63 = vpop.permute.xlu1 %4841 }
 0x2f0   : > { %4936 = vrot.lane.b32.xlu0 %v8483_v51, %s5165_s29  ;;  %v4975_v51 = vpack.i.bf16 %v7182_v9, %v8490_v28  ;;  %v7427_v20 = vpop.permute.xlu1 %4851 }
 0x2f4   : > { %4946 = vrot.lane.b32.xlu0 %v8484_v5, %s5167_s14 }
 0x2f8   : > { %4956 = vrot.lane.b32.xlu0 %v8486_v41, %s5163_s23  ;;  %v4995_v41 = vpack.i.bf16 %v8490_v28, %v8491_v23  ;;  %v8504_v23 = vld [vmem:[#allocation21_spill] sm:$0xff] }
 0x2fc   : > { %4966 = vrot.lane.b32.xlu0 %v8489_v21, %s5161_s21  ;;  %v7435_v21 = vpop.permute.xlu1 %4861 }
 0x300   : > { %4976 = vrot.lane.b32.xlu0 %v4975_v51, %s5166_s11  ;;  %v8494_v51 = vpack.i.bf16 %v7052_v42, %v7031_v35  ;;  %v7448_v9 = vpop.permute.xlu1 %4871  ;;  %v8498_v35 = vrot.slane %v7141_v58, 1 }
 0x304   : > { %4986 = vrot.lane.b32.xlu0 %v8484_v5, %s5162_s22  ;;  %v8493_v5 = vpack.i.bf16 %v7076_v22, %v7064_v29 }
 0x308   : > { %4996 = vrot.lane.b32.xlu0 %v4995_v41, %s5164_s26  ;;  %v8495_v41 = vrot.slane %v7114_v40, 7  ;;  %v7459_v40 = vpop.permute.xlu1 %4881 }
 0x30c   : > { %5006 = vrot.lane.b32.xlu0 %v8492_v52, %s5165_s29  ;;  %v7445_v52 = vsel %vm422_vm2, %v8495_v41, %v2016_v57  ;;  %v7472_v58 = vpop.permute.xlu1 %4891 }
 0x30d   : > { %8496 = vst [vmem:[#allocation28_spill] sm:$0xff] %v7445_v52  ;;  %v5045_v13 = vpack.i.bf16 %v2202_v54, %v7445_v52  ;;  %v5065_v57 = vpack.i.bf16 %v7445_v52, %v7153_v6 }
 0x310   : > { %5016 = vrot.lane.b32.xlu0 %v7124_v4, %s5167_s14  ;;  %v7481_v6 = vpop.permute.xlu1 %4901 }
 0x314   : > { %5026 = vrot.lane.b32.xlu0 %v8493_v5, %s5163_s23  ;;  %v8497_v5 = vrot.slane %v7260_v34, 1  ;;  %v8508_v34 = vpack.c.bf16 %v6963_v45, %v7339_v46  ;;  %v8515_v45 = vld [vmem:[#allocation8_spill] sm:$0xff] }
 0x316   : > { %v2139_v42 = vsel %vm544_vm0, %v8498_v35, %v8497_v5  ;;  %v8500_v35 = vld [vmem:[#allocation23_spill] sm:$0xff] }
 0x317   : > { %v7465_v54 = vsel %vm388_vm3, %v2139_v42, 0.0  ;;  %v4579_v3 = vunpack.i.h.bf16 %v8500_v35  ;;  %v4578_v10 = vunpack.i.l.bf16 %v8500_v35  ;;  %v8501_v42 = vld [vmem:[#allocation27_spill] sm:$0xff] }
 0x318   : > { %5036 = vrot.lane.b32.xlu0 %v8494_v51, %s5161_s21  ;;  %8499 = vst [vmem:[#allocation22_spill] sm:$0xff] %v7465_v54  ;;  %v4588_v52 = vunpack.i.l.bf16 %v8501_v42 }
 0x31c   : > { %5046 = vrot.lane.b32.xlu0 %v5045_v13, %s5166_s11  ;;  %v7468_v13 = vpop.permute.xlu0 %4791 }
 0x320   : > { %5056 = vrot.lane.b32.xlu0 %v7124_v4, %s5162_s22  ;;  %v5075_v4 = vpack.i.bf16 %v7465_v54, %v7274_v37 }
 0x324   : > { %5066 = vrot.lane.b32.xlu0 %v5065_v57, %s5164_s26  ;;  %v4589_v57 = vunpack.i.h.bf16 %v8501_v42  ;;  %v4574_v42 = vunpack.i.h.bf16 %v8504_v23 }
 0x328   : > { %5076 = vrot.lane.b32.xlu0 %v5075_v4, %s5165_s29 }
 0x32a   : > { %v4802_v51 = vpop.permute.xlu0 %4801 }
 0x32b   : > { %v4804_v41 = vunpack.i.h.bf16 %v4802_v51  ;;  %v4803_v5 = vunpack.i.l.bf16 %v4802_v51  ;;  %v8503_v51 = vld [vmem:[#allocation24_spill] sm:$0xff] }
 0x32c   : > { %2955 = vrot.lane.b32.xlu0 %v7277_v11, %s5167_s14  ;;  %v4569_v22 = vunpack.i.h.bf16 %v8503_v51  ;;  %v8509_v11 = vld [vmem:[#allocation3_spill] sm:$0xff] }
 0x32d   : > { %v3048_v37 = vsel %vm1470_vm6, %v8502_v49, %v4804_v41  ;;  %v3047_v4 = vsel %vm1470_vm6, %v8502_v49, %v4803_v5 }
 0x32e   : > { %v3080_v35 = vsel %vm1503_vm7, %v3048_v37, %v4579_v3  ;;  %v3079_v39 = vsel %vm1503_vm7, %v3047_v4, %v4578_v10  ;;  %v7491_v28 = vpop.permute.xlu0 %4806  ;;  %v8506_v10 = vld [vmem:[#allocation5_spill] sm:$0xff] }
 0x32f   : > { %v3111_v29 = vsel %vm1536_vm8, %v3079_v39, %v4588_v52  ;;  %v3112_v41 = vsel %vm1536_vm8, %v3080_v35, %v4589_v57  ;;  %v7507_v39 = vpop.permute.xlu1 %4911  ;;  %v8505_v52 = vld [vmem:[#allocation4_spill] sm:$0xff]  ;;  %v8510_v57 = vld [vmem:[#allocation7_spill] sm:$0xff] }
 0x330   : > { %2419 = vrot.lane.b32.xlu0 %v7465_v54, %s5163_s23  ;;  %v3143_v49 = vsel %vm1569_vm9, %v3111_v29, %v4569_v22  ;;  %v3144_v0 = vsel %vm1569_vm9, %v3112_v41, %v4618_v15  ;;  %v8507_v29 = vpack.c.bf16 %v8505_v52, %v8506_v10  ;;  %v8511_v4 = vpack.c.bf16 %v8509_v11, %v8510_v57  ;;  %v8512_v41 = vld [vmem:[#allocation42_spill] sm:$0xff]  ;;  %v8517_v52 = vld [vmem:[#allocation49_spill] sm:$0xff]  ;;  %v8518_v10 = vld [vmem:[#allocation48_spill] sm:$0xff] }
 0x331   : > { %v3175_v3 = vsel %vm1602_vm10, %v3143_v49, %v4574_v42  ;;  %v3176_v37 = vsel %vm1602_vm10, %v3144_v0, %v4608_v14  ;;  %v8513_v49 = vpack.c.bf16 %v7089_v27, %v8512_v41  ;;  %v8521_v27 = vld [vmem:[#allocation11_spill] sm:$0xff]  ;;  %v4773_v41 = vunpack.i.l.bf16 %v7215_v53 }
 0x332   : > { %v7503_v5 = vpop.permute.xlu0 %4816  ;;  %v3207_v23 = vpack.c.bf16 %v3176_v37, %v3175_v3  ;;  %v8514_v3 = vld [vmem:[#allocation9_spill] sm:$0xff] }
 0x333   : > { %v7516_v15 = vpop.permute.xlu1 %4921  ;;  %v8516_v46 = vpack.c.bf16 %v8514_v3, %v8515_v45  ;;  %v4778_v3 = vunpack.i.l.bf16 %v7208_v25 }
 0x334   : > { %5086 = vrot.lane.b32.xlu0 %v5085_v16, %s5161_s21  ;;  %3395 = vmatmul.mubr.bf16.vlgmr.msra.gmra.mxu1 %v3207_v23 }
 0x335   : > { %3957 = vmatprep.mubr.msk.bf16.mxu1 %vm1406_vm4, %v8507_v29  ;;  %v8519_v29 = vpack.c.bf16 %v8517_v52, %v8518_v10  ;;  %v4779_v10 = vunpack.i.h.bf16 %v7208_v25  ;;  %v3059_v44 = vsel %vm1470_vm6, %v7177_v18, %v4778_v3  ;;  %v4754_v25 = vunpack.i.h.bf16 %v7195_v50 }
 0x336   : > { %v7514_v22 = vpop.permute.xlu0 %4826  ;;  %v4774_v18 = vunpack.i.h.bf16 %v7215_v53  ;;  %v4789_v3 = vunpack.i.h.bf16 %v7217_v31  ;;  %v8530_v53 = vld [vmem:[#allocation14_spill] sm:$0xff] }
 0x337   : > { %v7529_v35 = vpop.permute.xlu1 %4931 }
 0x33a   : > { %v7518_v14 = vpop.permute.xlu0 %4836 }
 0x33b   : > { %v7536_v0 = vpop.permute.xlu1 %4941 }
 0x33c   : > { %3403 = vmatmul.mubr.bf16.gmra.mxu1 %v8508_v34  ;;  %v8520_v34 = vld [vmem:[#allocation13_spill] sm:$0xff] }
 0x33d   : > { %3958 = vmatprep.mubr.msk.bf16.mxu1 %vm1406_vm4, %v8511_v4  ;;  %v8522_v11 = vpack.c.bf16 %v8520_v34, %v8521_v27  ;;  %v4753_v4 = vunpack.i.l.bf16 %v7195_v50  ;;  %v4768_v34 = vunpack.i.l.bf16 %v7206_v8  ;;  %v4798_v50 = vunpack.i.l.bf16 %v7395_v33 }
 0x33e   : > { %v7527_v51 = vpop.permute.xlu0 %4846 }
 0x33f   : > { %v7546_v23 = vpop.permute.xlu1 %4951  ;;  %v4848_v1 = vunpack.i.l.bf16 %v7527_v51 }
 0x342   : > { %v7531_v42 = vpop.permute.xlu0 %4856 }
 0x344   : > { %3411 = vmatmul.mubr.bf16.gmra.mxu1 %v8513_v49  ;;  %v7559_v49 = vpop.permute.xlu1 %4961 }
 0x345   : > { %3959 = vmatprep.mubr.msk.bf16.mxu1 %vm1406_vm4, %v8516_v46  ;;  %8523 = vst [vmem:[#allocation20_spill] sm:$0xff] %v7559_v49  ;;  %v8524_v46 = vld [vmem:[#allocation10_spill] sm:$0xff]  ;;  %v4829_v49 = vunpack.i.h.bf16 %v7514_v22 }
 0x346   : > { %v7542_v37 = vpop.permute.xlu0 %4866  ;;  %v2998_v52 = vsel %vm1406_vm4, %v8524_v46, %v4753_v4  ;;  %v4793_v4 = vunpack.i.l.bf16 %v7468_v13 }
 0x347   : > { %v3028_v27 = vsel %vm1438_vm5, %v2998_v52, %v4773_v41  ;;  %v3091_v52 = vsel %vm1503_vm7, %v3059_v44, %v4768_v34  ;;  %v4828_v44 = vunpack.i.l.bf16 %v7514_v22  ;;  %v4784_v34 = vunpack.i.h.bf16 %v7220_v61 }
 0x348   : > { %v3060_v41 = vsel %vm1470_vm6, %v3028_v27, %v4779_v10  ;;  %v8529_v10 = vld [vmem:[#allocation12_spill] sm:$0xff] }
 0x34a   : > { %v7544_v16 = vpop.permute.xlu0 %4876 }
 0x34c   : > { %3419 = vmatmul.mubr.bf16.gmra.mxu1 %v8519_v29  ;;  %v8525_v29 = vpack.c.bf16 %v7198_v24, %v7187_v60  ;;  %v4769_v60 = vunpack.i.h.bf16 %v7206_v8  ;;  %v4813_v24 = vunpack.i.l.bf16 %v7399_v17  ;;  %v3123_v8 = vsel %vm1536_vm8, %v3091_v52, %v4793_v4 }
 0x34d   : > { %3960 = vmatprep.mubr.msk.bf16.mxu1 %vm1406_vm4, %v8522_v11  ;;  %v8526_v11 = vld [vmem:[#allocation15_spill] sm:$0xff] }
 0x34e   : > { %v7555_v57 = vpop.permute.xlu0 %4886  ;;  %v8527_v54 = vpack.c.bf16 %v6657_v62, %v8526_v11  ;;  %v4794_v62 = vunpack.i.h.bf16 %v7468_v13  ;;  %v4823_v11 = vunpack.i.l.bf16 %v7409_v48  ;;  %v2999_v13 = vsel %vm1406_vm4, %v8529_v10, %v4754_v25  ;;  %v8532_v10 = vld [vmem:[#allocation18_spill] sm:$0xff] }
 0x34f   : > { %v3092_v27 = vsel %vm1503_vm7, %v3060_v41, %v4769_v60  ;;  %v3000_v31 = vsel %vm1406_vm4, %v8530_v53, %v4813_v24  ;;  %v3029_v25 = vsel %vm1438_vm5, %v2999_v13, %v4774_v18  ;;  %v4824_v24 = vunpack.i.h.bf16 %v7409_v48 }
 0x350   : > { %v3124_v4 = vsel %vm1536_vm8, %v3092_v27, %v4794_v62  ;;  %v8533_v61 = vpack.c.bf16 %v8532_v10, %v6673_v12  ;;  %v3155_v62 = vsel %vm1569_vm9, %v3123_v8, %v4789_v3  ;;  %v3061_v22 = vsel %vm1470_vm6, %v3029_v25, %v4823_v11 }
 0x351   : > { %v3156_v60 = vsel %vm1569_vm9, %v3124_v4, %v4798_v50  ;;  %v3093_v18 = vsel %vm1503_vm7, %v3061_v22, %v4828_v44  ;;  %v4833_v12 = vunpack.i.l.bf16 %v7414_v30  ;;  %v4838_v3 = vunpack.i.l.bf16 %v7518_v14 }
 0x352   : > { %v7562_v45 = vpop.permute.xlu0 %4896  ;;  %v3187_v8 = vsel %vm1602_vm10, %v3155_v62, %v4784_v34  ;;  %v4834_v11 = vunpack.i.h.bf16 %v7414_v30  ;;  %v4819_v13 = vunpack.i.h.bf16 %v7503_v5  ;;  %v4858_v44 = vunpack.i.l.bf16 %v7531_v42 }
 0x353   : > { %v4853_v30 = vunpack.i.l.bf16 %v7427_v20  ;;  %v8536_v22 = vpack.c.bf16 %v6752_v36, %v6761_v55  ;;  %v4888_v36 = vunpack.i.l.bf16 %v7555_v57 }
 0x354   : > { %3427 = vmatmul.mubr.bf16.gmra.mxu1 %v8525_v29  ;;  %v7584_v29 = vpop.permute.xlu1 %4971 }
 0x355   : > { %3961 = vmatprep.mubr.msk.bf16.mxu1 %vm1406_vm4, %v8527_v54  ;;  %8528 = vst [vmem:[#allocation19_spill] sm:$0xff] %v7584_v29  ;;  %v4818_v54 = vunpack.i.l.bf16 %v7503_v5  ;;  %v4808_v29 = vunpack.i.l.bf16 %v7491_v28 }
 0x356   : > { %v7579_v46 = vpop.permute.xlu0 %4906 }
 0x357   : > { %v3030_v52 = vsel %vm1438_vm5, %v3000_v31, %v4818_v54  ;;  %v4814_v54 = vunpack.i.h.bf16 %v7399_v17  ;;  %v8534_v17 = vld [vmem:[#allocation17_spill] sm:$0xff]  ;;  %v4859_v31 = vunpack.i.h.bf16 %v7531_v42  ;;  %v4849_v42 = vunpack.i.h.bf16 %v7527_v51 }
 0x358   : > { %v7614_v41 = vpop.permute.xlu1 %4981  ;;  %v3062_v48 = vsel %vm1470_vm6, %v3030_v52, %v4824_v24  ;;  %v3002_v53 = vsel %vm1406_vm4, %v8534_v17, %v4848_v1  ;;  %v8535_v52 = vld [vmem:[#allocation16_spill] sm:$0xff]  ;;  %v4883_v24 = vunpack.i.l.bf16 %v7459_v40  ;;  %v4869_v51 = vunpack.i.h.bf16 %v7542_v37 }
 0x359   : > { %v3094_v50 = vsel %vm1503_vm7, %v3062_v48, %v4829_v49  ;;  %v4799_v49 = vunpack.i.h.bf16 %v7395_v33  ;;  %v3001_v34 = vsel %vm1406_vm4, %v8535_v52, %v4814_v54  ;;  %v4864_v33 = vunpack.i.h.bf16 %v7435_v21 }
 0x35a   : > { %v7596_v56 = vpop.permute.xlu0 %4916  ;;  %v3126_v25 = vsel %vm1536_vm8, %v3094_v50, %v4834_v11  ;;  %v3032_v62 = vsel %vm1438_vm5, %v3002_v53, %v4853_v30  ;;  %v4868_v48 = vunpack.i.l.bf16 %v7542_v37  ;;  %v4809_v50 = vunpack.i.h.bf16 %v7491_v28 }
 0x35b   : > { %v3158_v10 = vsel %vm1569_vm9, %v3126_v25, %v4838_v3  ;;  %v3064_v54 = vsel %vm1470_vm6, %v3032_v62, %v4859_v31  ;;  %v4854_v3 = vunpack.i.h.bf16 %v7427_v20  ;;  %v3004_v11 = vsel %vm1406_vm4, %v6720_v2, %v4883_v24  ;;  %v8537_v25 = vld [vmem:[#allocation31_spill] sm:$0xff] }
 0x35c   : > { %3435 = vmatmul.mubr.bf16.gmra.mxu1 %v8531_v38  ;;  %v3188_v38 = vsel %vm1602_vm10, %v3156_v60, %v4808_v29  ;;  %v3125_v29 = vsel %vm1536_vm8, %v3093_v18, %v4833_v12  ;;  %v7646_v5 = vpop.permute.xlu1 %4991  ;;  %v4843_v60 = vunpack.i.l.bf16 %v7421_v63  ;;  %v4863_v12 = vunpack.i.l.bf16 %v7435_v21 }
 0x35d   : > { %3962 = vmatprep.mubr.msk.bf16.mxu1 %vm1406_vm4, %v8533_v61  ;;  %v3219_v27 = vpack.c.bf16 %v3188_v38, %v3187_v8  ;;  %v3031_v61 = vsel %vm1438_vm5, %v3001_v34, %v4819_v13  ;;  %v3157_v1 = vsel %vm1569_vm9, %v3125_v29, %v4799_v49  ;;  %v4873_v8 = vunpack.i.l.bf16 %v7448_v9 }
 0x35e   : > { %v7623_v47 = vpop.permute.xlu0 %4926  ;;  %v3063_v38 = vsel %vm1470_vm6, %v3031_v61, %v4858_v44  ;;  %v3190_v55 = vsel %vm1602_vm10, %v3158_v10, %v4843_v60  ;;  %v3003_v37 = vsel %vm1406_vm4, %v6702_v59, %v4849_v42  ;;  %v4839_v21 = vunpack.i.h.bf16 %v7518_v14 }
 0x35f   : > { %v3095_v28 = vsel %vm1503_vm7, %v3063_v38, %v4863_v12  ;;  %v3189_v29 = vsel %vm1602_vm10, %v3157_v1, %v4809_v50  ;;  %v4878_v53 = vunpack.i.l.bf16 %v7544_v16  ;;  %v3033_v59 = vsel %vm1438_vm5, %v3003_v37, %v4854_v3  ;;  %v8539_v3 = vld [vmem:[#allocation29_spill] sm:$0xff] }
 0x360   : > { %v7677_v13 = vpop.permute.xlu1 %5001  ;;  %v3127_v20 = vsel %vm1536_vm8, %v3095_v28, %v4868_v48  ;;  %v3221_v31 = vpack.c.bf16 %v3190_v55, %v3189_v29  ;;  %v3034_v44 = vsel %vm1438_vm5, %v3004_v11, %v4888_v36  ;;  %v4899_v14 = vunpack.i.h.bf16 %v7562_v45 }
 0x361   : > { %v4898_v49 = vunpack.i.l.bf16 %v7562_v45  ;;  %v4894_v52 = vunpack.i.h.bf16 %v7472_v58  ;;  %v4893_v34 = vunpack.i.l.bf16 %v7472_v58  ;;  %v4844_v30 = vunpack.i.h.bf16 %v7421_v63 }
 0x362   : > { %v7640_v4 = vpop.permute.xlu0 %4936  ;;  %v8538_v60 = vpack.c.bf16 %v8537_v25, %v8474_v19  ;;  %v3159_v24 = vsel %vm1569_vm9, %v3127_v20, %v4839_v21  ;;  %v4884_v1 = vunpack.i.h.bf16 %v7459_v40  ;;  %v4904_v38 = vunpack.i.h.bf16 %v7481_v6 }
 0x363   : > { %v3065_v42 = vsel %vm1470_vm6, %v3033_v59, %v4893_v34  ;;  %v3066_v45 = vsel %vm1470_vm6, %v3034_v44, %v4894_v52  ;;  %v4874_v48 = vunpack.i.h.bf16 %v7448_v9  ;;  %v4889_v12 = vunpack.i.h.bf16 %v7555_v57 }
 0x364   : > { %3443 = vmatmul.mubr.bf16.gmra.mxu1 %v3219_v27  ;;  %v3096_v27 = vsel %vm1503_vm7, %v3064_v54, %v4864_v33  ;;  %v4918_v33 = vunpack.i.l.bf16 %v7596_v56  ;;  %v7707_v63 = vpop.permute.xlu1 %5011  ;;  %v3097_v19 = vsel %vm1503_vm7, %v3065_v42, %v4898_v49  ;;  %v3098_v62 = vsel %vm1503_vm7, %v3066_v45, %v4899_v14 }
 0x365   : > { %3963 = vmatprep.mubr.msk.bf16.mxu1 %vm1406_vm4, %v8536_v22  ;;  %v3128_v17 = vsel %vm1536_vm8, %v3096_v27, %v4869_v51  ;;  %v4908_v22 = vunpack.i.l.bf16 %v7579_v46  ;;  %v4903_v54 = vunpack.i.l.bf16 %v7481_v6  ;;  %v3191_v51 = vsel %vm1602_vm10, %v3159_v24, %v4844_v30 }
 0x366   : > { %v7665_v18 = vpop.permute.xlu0 %4946  ;;  %v3160_v10 = vsel %vm1569_vm9, %v3128_v17, %v4873_v8  ;;  %v3130_v55 = vsel %vm1536_vm8, %v3098_v62, %v4904_v38  ;;  %v3006_v8 = vsel %vm1406_vm4, %v8539_v3, %v4918_v33  ;;  %v4929_v40 = vunpack.i.h.bf16 %v7623_v47 }
 0x367   : > { %v3192_v58 = vsel %vm1602_vm10, %v3160_v10, %v4878_v53  ;;  %v3129_v36 = vsel %vm1536_vm8, %v3097_v19, %v4903_v54  ;;  %v4923_v6 = vunpack.i.l.bf16 %v7516_v15  ;;  %v3162_v37 = vsel %vm1569_vm9, %v3130_v55, %v4908_v22 }
 0x368   : > { %v3223_v50 = vpack.c.bf16 %v3192_v58, %v3191_v51  ;;  %v4919_v9 = vunpack.i.h.bf16 %v7596_v56  ;;  %v4928_v57 = vunpack.i.l.bf16 %v7623_v47  ;;  %v3005_v21 = vsel %vm1406_vm4, %v6864_v32, %v4884_v1  ;;  %v7734_v20 = vpop.permute.xlu1 %5021  ;;  %v8542_v1 = vld [vmem:[#allocation20_spill] sm:$0xff] }
 0x369   : > { %v4913_v28 = vunpack.i.l.bf16 %v7507_v39  ;;  %v4934_v27 = vunpack.i.h.bf16 %v7529_v35  ;;  %v4953_v29 = vunpack.i.l.bf16 %v7546_v23  ;;  %v4879_v17 = vunpack.i.h.bf16 %v7544_v16 }
 0x36a   : > { %v7686_v2 = vpop.permute.xlu0 %4956  ;;  %v3036_v53 = vsel %vm1438_vm5, %v3006_v8, %v4923_v6  ;;  %v8540_v56 = vpack.c.bf16 %v8481_v43, %v8482_v26  ;;  %v3161_v32 = vsel %vm1569_vm9, %v3129_v36, %v4874_v48  ;;  %v3035_v47 = vsel %vm1438_vm5, %v3005_v21, %v4889_v12  ;;  %v8544_v36 = vld [vmem:[#allocation37_spill] sm:$0xff]  ;;  %v8546_v21 = vld [vmem:[#allocation19_spill] sm:$0xff] }
 0x36b   : > { %v4939_v59 = vunpack.i.h.bf16 %v7640_v4  ;;  %v3194_v14 = vsel %vm1602_vm10, %v3162_v37, %v4913_v28  ;;  %v3007_v16 = vsel %vm1406_vm4, %v8480_v7, %v4919_v9  ;;  %v3067_v49 = vsel %vm1470_vm6, %v3035_v47, %v4928_v57 }
 0x36c   : > { %3451 = vmatmul.mubr.bf16.gmra.mxu1 %v3221_v31  ;;  %v3068_v31 = vsel %vm1470_vm6, %v3036_v53, %v4929_v40  ;;  %v4938_v43 = vunpack.i.l.bf16 %v7640_v4  ;;  %v4958_v26 = vunpack.i.l.bf16 %v7686_v2  ;;  %v4924_v52 = vunpack.i.h.bf16 %v7516_v15  ;;  %v7760_v10 = vpop.permute.xlu1 %5031 }
 0x36d   : > { %3964 = vmatprep.mubr.msk.bf16.mxu1 %vm1406_vm4, %v8538_v60  ;;  %v4933_v34 = vunpack.i.l.bf16 %v7529_v35  ;;  %v3193_v30 = vsel %vm1602_vm10, %v3161_v32, %v4879_v17  ;;  %v4943_v25 = vunpack.i.l.bf16 %v7536_v0  ;;  %v8541_v60 = vld [vmem:[#allocation32_spill] sm:$0xff]  ;;  %v3100_v7 = vsel %vm1503_vm7, %v3068_v31, %v4934_v27 }
 0x36e   : > { %v7704_v61 = vpop.permute.xlu0 %4966  ;;  %v3008_v24 = vsel %vm1406_vm4, %v8541_v60, %v4953_v29  ;;  %v3225_v42 = vpack.c.bf16 %v3194_v14, %v3193_v30  ;;  %v3037_v4 = vsel %vm1438_vm5, %v3007_v16, %v4924_v52  ;;  %v3132_v15 = vsel %vm1536_vm8, %v3100_v7, %v4939_v59  ;;  %v8547_v16 = vld [vmem:[#allocation39_spill] sm:$0xff]  ;;  %v8549_v7 = vld [vmem:[#allocation46_spill] sm:$0xff] }
 0x36f   : > { %v3099_v45 = vsel %vm1503_vm7, %v3067_v49, %v4933_v34  ;;  %v4948_v35 = vunpack.i.l.bf16 %v7665_v18  ;;  %v3038_v19 = vsel %vm1438_vm5, %v3008_v24, %v4958_v26  ;;  %v4969_v62 = vunpack.i.h.bf16 %v7704_v61  ;;  %v8548_v34 = vld [vmem:[#allocation43_spill] sm:$0xff] }
 0x370   : > { %v3131_v58 = vsel %vm1536_vm8, %v3099_v45, %v4938_v43  ;;  %v4968_v22 = vunpack.i.l.bf16 %v7704_v61  ;;  %v4964_v38 = vunpack.i.h.bf16 %v8542_v1  ;;  %v4963_v54 = vunpack.i.l.bf16 %v8542_v1  ;;  %v7775_v12 = vpop.permute.xlu1 %5041 }
 0x371   : > { %v4909_v51 = vunpack.i.h.bf16 %v7579_v46  ;;  %v4914_v48 = vunpack.i.h.bf16 %v7507_v39  ;;  %v3164_v3 = vsel %vm1569_vm9, %v3132_v15, %v4943_v25  ;;  %v4974_v28 = vunpack.i.h.bf16 %v8546_v21 }
 0x372   : > { %v7723_v11 = vpop.permute.xlu0 %4976  ;;  %v3069_v61 = vsel %vm1470_vm6, %v3037_v4, %v4963_v54  ;;  %v3070_v8 = vsel %vm1470_vm6, %v3038_v19, %v4964_v38  ;;  %v3196_v46 = vsel %vm1602_vm10, %v3164_v3, %v4948_v35  ;;  %v4973_v27 = vunpack.i.l.bf16 %v8546_v21  ;;  %v3595_v54 = vld [vmem:[%s8283_s5 + $0x8] sm:$0xff]  ;;  %v8553_v3 = vld [vmem:[#allocation41_spill] sm:$0xff] }
 0x373   : > { %v3163_v6 = vsel %vm1569_vm9, %v3131_v58, %v4909_v51  ;;  %v3101_v39 = vsel %vm1503_vm7, %v3069_v61, %v4968_v22  ;;  %v3102_v37 = vsel %vm1503_vm7, %v3070_v8, %v4969_v62  ;;  %v4978_v9 = vunpack.i.l.bf16 %v7723_v11  ;;  %3985 = vmatpush3.msra.mxu0 %v3595_v54 }
 0x374   : > { %3459 = vmatmul.mubr.bf16.gmra.mxu1 %v3223_v50  ;;  %v8543_v50 = vld [vmem:[#allocation44_spill] sm:$0xff]  ;;  %v4954_v29 = vunpack.i.h.bf16 %v7546_v23  ;;  %v7793_v17 = vpop.permute.xlu1 %5051  ;;  %v3195_v53 = vsel %vm1602_vm10, %v3163_v6, %v4914_v48  ;;  %v3133_v32 = vsel %vm1536_vm8, %v3101_v39, %v4973_v27  ;;  %v3134_v47 = vsel %vm1536_vm8, %v3102_v37, %v4974_v28 }
 0x375   : > { %3965 = vmatprep.mubr.msk.bf16.mxu1 %vm1406_vm4, %v8540_v56  ;;  %v8545_v55 = vpack.c.bf16 %v8543_v50, %v8544_v36  ;;  %v4959_v56 = vunpack.i.h.bf16 %v7686_v2  ;;  %v3227_v59 = vpack.c.bf16 %v3196_v46, %v3195_v53  ;;  %v3166_v14 = vsel %vm1569_vm9, %v3134_v47, %v4978_v9  ;;  %v8552_v50 = vld [vmem:[#allocation40_spill] sm:$0xff] }
 0x376   : > { %v7746_v44 = vpop.permute.xlu0 %4986  ;;  %v4944_v26 = vunpack.i.h.bf16 %v7536_v0  ;;  %v4983_v52 = vunpack.i.l.bf16 %v7614_v41  ;;  %v4993_v2 = vunpack.i.l.bf16 %v7646_v5  ;;  %v3009_v30 = vsel %vm1406_vm4, %v8548_v34, %v4954_v29 }
 0x377   : > { %v4988_v57 = vunpack.i.l.bf16 %v7746_v44  ;;  %v5023_v25 = vunpack.i.l.bf16 %v7734_v20  ;;  %v4949_v60 = vunpack.i.h.bf16 %v7665_v18  ;;  %v4989_v24 = vunpack.i.h.bf16 %v7746_v44 }
 0x378   : > { %v3039_v0 = vsel %vm1438_vm5, %v3009_v30, %v4959_v56  ;;  %v3165_v35 = vsel %vm1569_vm9, %v3133_v32, %v4944_v26  ;;  %v7822_v58 = vpop.permute.xlu1 %5061  ;;  %v5004_v22 = vunpack.i.h.bf16 %v7677_v13  ;;  %v5003_v1 = vunpack.i.l.bf16 %v7677_v13  ;;  %v8555_v32 = vld [vmem:[#allocation52_spill] sm:$0xff] }
 0x379   : > { %v3010_v49 = vsel %vm1406_vm4, %v8547_v16, %v4988_v57  ;;  %v4994_v51 = vunpack.i.h.bf16 %v7646_v5  ;;  %v5013_v48 = vunpack.i.l.bf16 %v7707_v63  ;;  %v3011_v36 = vsel %vm1406_vm4, %v8552_v50, %v4989_v24 }
 0x37a   : > { %v4997_v33 = vpop.permute.xlu0 %4996  ;;  %v3040_v45 = vsel %vm1438_vm5, %v3010_v49, %v4993_v2  ;;  %v3012_v61 = vsel %vm1406_vm4, %v8553_v3, %v5023_v25  ;;  %v8554_v46 = vmov 0.0   ;;  %v4979_v5 = vunpack.i.h.bf16 %v7723_v11  ;;  %v8556_v11 = vld [vmem:[#allocation47_spill] sm:$0xff] }
 0x37b   : > { %v4999_v43 = vunpack.i.h.bf16 %v4997_v33  ;;  %v4998_v23 = vunpack.i.l.bf16 %v4997_v33  ;;  %v3198_v33 = vsel %vm1602_vm10, %v3166_v14, %v4983_v52  ;;  %3986 = vmatprep.subr.mxu0 %v8554_v46  ;;  %v3041_v57 = vsel %vm1438_vm5, %v3011_v36, %v4994_v51  ;;  %3988 = vmatprep.mubr.msk.f32.mxu0 %vm5169_vm11, %v8554_v46 }
 0x37c   : > { %3467 = vmatmul.mubr.bf16.gmra.mxu1 %v3225_v42  ;;  %v8550_v42 = vld [vmem:[#allocation45_spill] sm:$0xff]  ;;  %v5034_v29 = vunpack.i.h.bf16 %v7760_v10  ;;  %v5033_v53 = vunpack.i.l.bf16 %v7760_v10  ;;  %v5072_v56 = vpop.permute.xlu1 %5071  ;;  %v8557_v47 = vpack.c.bf16 %v8555_v32, %v8556_v11  ;;  %v4984_v49 = vunpack.i.h.bf16 %v7614_v41 }
 0x37d   : > { %3966 = vmatprep.mubr.msk.bf16.mxu1 %vm1406_vm4, %v8545_v55  ;;  %v8551_v4 = vpack.c.bf16 %v8549_v7, %v8550_v42  ;;  %v3071_v18 = vsel %vm1470_vm6, %v3039_v0, %v4998_v23  ;;  %v3072_v44 = vsel %vm1470_vm6, %v3040_v45, %v4999_v43  ;;  %v3197_v55 = vsel %vm1602_vm10, %v3165_v35, %v4949_v60  ;;  %v8558_v45 = vld [vmem:[#allocation54_spill] sm:$0xff] }
 0x37e   : > { %v5007_v40 = vpop.permute.xlu0 %5006  ;;  %v3103_v13 = vsel %vm1503_vm7, %v3071_v18, %v5003_v1  ;;  %v3104_v8 = vsel %vm1503_vm7, %v3072_v44, %v5004_v22  ;;  %v3229_v6 = vpack.c.bf16 %v3198_v33, %v3197_v55  ;;  %v3073_v43 = vsel %vm1470_vm6, %v3041_v57, %v5033_v53  ;;  %v8559_v35 = vld [vmem:[#allocation22_spill] sm:$0xff]  ;;  %v8561_v22 = vld [vmem:[#allocation53_spill] sm:$0xff]  ;;  %v8563_v53 = vld [vmem:[#allocation55_spill] sm:$0xff] }
 0x37f   : > { %v5009_v19 = vunpack.i.h.bf16 %v5007_v40  ;;  %v5008_v62 = vunpack.i.l.bf16 %v5007_v40  ;;  %v5044_v34 = vunpack.i.h.bf16 %v7775_v12  ;;  %v5043_v30 = vunpack.i.l.bf16 %v7775_v12 }
 0x380   : > { %v5024_v60 = vunpack.i.h.bf16 %v7734_v20  ;;  %v2864_v7 = vpop.permute.xlu1 %2863  ;;  %v3234_v33 = vpack.c.bf16 %v8559_v35, %v8558_v45  ;;  %v5014_v18 = vunpack.i.h.bf16 %v7707_v63  ;;  %v5053_v20 = vunpack.i.l.bf16 %v7793_v17 }
 0x381   : > { %v3135_v39 = vsel %vm1536_vm8, %v3103_v13, %v5008_v62  ;;  %v3136_v37 = vsel %vm1536_vm8, %v3104_v8, %v5009_v19  ;;  %v8560_v19 = vld [vmem:[#allocation50_spill] sm:$0xff] }
 0x382   : > { %v7799_v31 = vpop.permute.xlu0 %5016  ;;  %v3167_v14 = vsel %vm1569_vm9, %v3135_v39, %v4979_v5  ;;  %v3168_v16 = vsel %vm1569_vm9, %v3136_v37, %v5013_v48  ;;  %v3013_v1 = vsel %vm1406_vm4, %v8561_v22, %v5024_v60 }
 0x383   : > { %v5018_v9 = vunpack.i.l.bf16 %v7799_v31  ;;  %v3199_v25 = vsel %vm1602_vm10, %v3167_v14, %v4984_v49 }
 0x384   : > { %3475 = vmatmul.mubr.bf16.gmra.mxu1 %v3227_v59  ;;  %v2300_v3 = vpop.permute.xlu1 %2299 }
 0x385   : > { %3967 = vmatprep.mubr.msk.bf16.mxu1 %vm1406_vm4, %v8551_v4  ;;  %v3200_v26 = vsel %vm1602_vm10, %v3168_v16, %v5018_v9 }
 0x386   : > { %v7818_v15 = vpop.permute.xlu0 %5026  ;;  %v3231_v24 = vpack.c.bf16 %v3200_v26, %v3199_v25 }
 0x387   : > { %v5028_v38 = vunpack.i.l.bf16 %v7818_v15  ;;  %v5029_v44 = vunpack.i.h.bf16 %v7818_v15  ;;  %v5019_v15 = vunpack.i.h.bf16 %v7799_v31 }
 0x388   : > { %v5082_v16 = vpop.permute.xlu1 %5081 }
 0x389   : > { %v3042_v21 = vsel %vm1438_vm5, %v3012_v61, %v5028_v38  ;;  %v5063_v38 = vunpack.i.l.bf16 %v7822_v58  ;;  %v3043_v36 = vsel %vm1438_vm5, %v3013_v1, %v5029_v44  ;;  %v8569_v1 = vld [vmem:[#allocation26_spill] sm:$0xff] }
 0x38a   : > { %v5037_v40 = vpop.permute.xlu0 %5036  ;;  %v3074_v23 = vsel %vm1470_vm6, %v3042_v21, %v5034_v29  ;;  %v8562_v29 = vld [vmem:[#allocation56_spill] sm:$0xff] }
 0x38b   : > { %v5039_v28 = vunpack.i.h.bf16 %v5037_v40  ;;  %v5038_v27 = vunpack.i.l.bf16 %v5037_v40  ;;  %v5074_v40 = vunpack.i.h.bf16 %v5072_v56  ;;  %v8564_v32 = vpack.c.bf16 %v8562_v29, %v8563_v53 }
 0x38c   : > { %3483 = vmatmul.mubr.bf16.gmra.mxu1 %v3229_v6  ;;  %v5073_v6 = vunpack.i.l.bf16 %v5072_v56 }
 0x38d   : > { %3968 = vmatprep.mubr.msk.bf16.mxu1 %vm1406_vm4, %v8557_v47  ;;  %v3105_v10 = vsel %vm1503_vm7, %v3073_v43, %v5038_v27  ;;  %v3106_v52 = vsel %vm1503_vm7, %v3074_v23, %v5039_v28  ;;  %v5054_v28 = vunpack.i.h.bf16 %v7793_v17  ;;  %v8565_v43 = vld [vmem:[#allocation51_spill] sm:$0xff] }
 0x38e   : > { %v5047_v59 = vpop.permute.xlu0 %5046  ;;  %v3137_v42 = vsel %vm1536_vm8, %v3105_v10, %v5043_v30  ;;  %v3138_v4 = vsel %vm1536_vm8, %v3106_v52, %v5044_v34  ;;  %v5064_v52 = vunpack.i.h.bf16 %v7822_v58  ;;  %v5092_v30 = vpop.permute.xlu1 %5091 }
 0x38f   : > { %v5048_v2 = vunpack.i.l.bf16 %v5047_v59  ;;  %v3169_v63 = vsel %vm1569_vm9, %v3137_v42, %v5014_v18  ;;  %v5049_v9 = vunpack.i.h.bf16 %v5047_v59  ;;  %v5094_v45 = vunpack.i.h.bf16 %v5092_v30 }
 0x390   : > { %v3201_v8 = vsel %vm1602_vm10, %v3169_v63, %v5019_v15  ;;  %v5093_v35 = vunpack.i.l.bf16 %v5092_v30  ;;  %v3594_v15 = vld [vmem:[%s8283_s5] sm:$0xff] }
 0x391   : > { %v3170_v12 = vsel %vm1569_vm9, %v3138_v4, %v5048_v2  ;;  %v8566_v2 = vld [vmem:[#allocation28_spill] sm:$0xff]  ;;  %3987 = vmatpush3.msra.mxu0 %v3594_v15 }
 0x392   : > { %v5057_v41 = vpop.permute.xlu0 %5056  ;;  %v3202_v50 = vsel %vm1602_vm10, %v3170_v12, %v5053_v20  ;;  %v3016_v34 = vsel %vm1406_vm4, %v8566_v2, %v2300_v3 }
 0x393   : > { %v5058_v0 = vunpack.i.l.bf16 %v5057_v41  ;;  %v3233_v39 = vpack.c.bf16 %v3202_v50, %v3201_v8  ;;  %v5059_v11 = vunpack.i.h.bf16 %v5057_v41  ;;  %v8567_v41 = vmov 0.0|0.0  }
 0x394   : > { %3491 = vmatmul.mubr.bf16.gmra.mxu1 %v3231_v24  ;;  %v5084_v24 = vunpack.i.h.bf16 %v5082_v16 }
 0x395   : > { %v3014_v62 = vsel %vm1406_vm4, %v8560_v19, %v5058_v0  ;;  %3969 = vmatprep.mubr.msk.bf16.mxu1 %vm1406_vm4, %v3234_v33  ;;  %v3015_v23 = vsel %vm1406_vm4, %v8565_v43, %v5059_v11  ;;  %v8568_v19 = vld [vmem:[#allocation25_spill] sm:$0xff] }
 0x396   : > { %v5067_v54 = vpop.permute.xlu0 %5066  ;;  %v3044_v55 = vsel %vm1438_vm5, %v3014_v62, %v5063_v38  ;;  %v3045_v25 = vsel %vm1438_vm5, %v3015_v23, %v5064_v52  ;;  %v7934_v23 = vld [vmem:[%s8282_s4] ss:$0 sm:$0xff] }
 0x397   : > { %v5069_v51 = vunpack.i.h.bf16 %v5067_v54  ;;  %v5068_v48 = vunpack.i.l.bf16 %v5067_v54 }
 0x399   : > { %v3075_v61 = vsel %vm1470_vm6, %v3043_v36, %v5068_v48  ;;  %v3076_v13 = vsel %vm1470_vm6, %v3044_v55, %v5069_v51 }
 0x39a   : > { %v5077_v5 = vpop.permute.xlu0 %5076  ;;  %v3107_v57 = vsel %vm1503_vm7, %v3075_v61, %v5073_v6  ;;  %v3108_v21 = vsel %vm1503_vm7, %v3076_v13, %v5074_v40  ;;  %v3671_v6 = vld [vmem:[%s8285_s7] sm:$0xf] }
 0x39b   : > { %v5079_v31 = vunpack.i.h.bf16 %v5077_v5  ;;  %v5078_v37 = vunpack.i.l.bf16 %v5077_v5  ;;  %3992 = vmatpush3.msk.msra.mxu1 %vm3677_vm12, %v3671_v6 }
 0x39c   : > { %3499 = vmatmul.mubr.bf16.gmra.mxu1 %v3233_v39 }
 0x39d   : > { %v3139_v27 = vsel %vm1536_vm8, %v3107_v57, %v5078_v37  ;;  %3970 = vmatprep.mubr.msk.bf16.mxu1 %vm1406_vm4, %v8564_v32  ;;  %v3140_v56 = vsel %vm1536_vm8, %v3108_v21, %v5079_v31 }
 0x39e   : > { %v2956_v47 = vpop.permute.xlu0 %2955  ;;  %v3171_v59 = vsel %vm1569_vm9, %v3139_v27, %v5049_v9  ;;  %v3172_v14 = vsel %vm1569_vm9, %v3140_v56, %v2864_v7  ;;  %v5083_v7 = vunpack.i.l.bf16 %v5082_v16 }
 0x39f   : > { %v3203_v49 = vsel %vm1602_vm10, %v3171_v59, %v5054_v28  ;;  %v3204_v17 = vsel %vm1602_vm10, %v3172_v14, %v2956_v47 }
 0x3a0   : > { %v3235_v26 = vpack.c.bf16 %v3204_v17, %v3203_v49  ;;  %v3077_v33 = vsel %vm1470_vm6, %v3045_v25, %v5083_v7 }
 0x3a2   : > { %v2420_v10 = vpop.permute.xlu0 %2419 }
 0x3a3   : > { %v3046_v60 = vsel %vm1438_vm5, %v3016_v34, %v2420_v10 }
 0x3a4   : > { %3507 = vmatmul.mubr.bf16.gmra.mxu1 %v3235_v26  ;;  %v3078_v58 = vsel %vm1470_vm6, %v3046_v60, %v5084_v24 }
 0x3a5   : > { %3514 = vmatprep.mubr.bf16.mxu1 %v8567_v41 }
 0x3a6   : > { %v5087_v42 = vpop.permute.xlu0 %5086 }
 0x3a7   : > { %v5089_v4 = vunpack.i.h.bf16 %v5087_v42  ;;  %v5088_v0 = vunpack.i.l.bf16 %v5087_v42 }
 0x3a9   : > { %v3110_v18 = vsel %vm1503_vm7, %v3078_v58, %v5089_v4  ;;  %v3109_v44 = vsel %vm1503_vm7, %v3077_v33, %v5088_v0 }
 0x3aa   : > { %v3142_v12 = vsel %vm1536_vm8, %v3110_v18, %v5094_v45  ;;  %v3141_v20 = vsel %vm1536_vm8, %v3109_v44, %v5093_v35 }
 0x3ab   : > { %v3173_v62 = vsel %vm1569_vm9, %v3141_v20, %v8568_v19  ;;  %v3174_v22 = vsel %vm1569_vm9, %v3142_v12, %v8568_v19 }
 0x3ac   : > { %v3205_v38 = vsel %vm1602_vm10, %v3173_v62, %v8569_v1  ;;  %v3206_v54 = vsel %vm1602_vm10, %v3174_v22, %v8569_v1 }
 0x3ad   : > { %v3237_v63 = vpack.c.bf16 %v3206_v54, %v3205_v38 }
 0x3af   : > { %3515 = vmatmul.mubr.bf16.gmra.mxu1 %v3237_v63 }
 0x3b0   : > { %3993 = vmatprep.mubr.msk.f32.mxu1 %vm5169_vm11, %v8554_v46 }
 0x3f4   : > { %v3396_v51 = vpop.f32.mrf.mxu1 }
 0x3f5   : > { %v7940_v52 = vadd.f32 %v7934_v23, %v3396_v51 }
 0x3f6   : > { %v3398_v48 = vpop.f32.mrf.mxu1 }
 0x3f7   : > { %v3523_v41 = vsel %vm1406_vm4, %v7940_v52, 0.0 }
 0x3f8   : > { %v3399_v50 = vpop.f32.mrf.mxu1 }
 0x3f9   : > { %v7937_v26 = vadd.f32 %v7934_v23, %v3399_v50 }
 0x3fa   : > { %v3401_v36 = vpop.f32.mrf.mxu1 }
 0x3fb   : > { %v3524_v30 = vsel %vm1406_vm4, %v7937_v26, 0.0 }
 0x3fc   : > { %v3404_v55 = vpop.f32.mrf.mxu1  ;;  %v3525_v4 = vadd.f32 %v3524_v30, %v3523_v41 }
 0x3fd   : > { %v7943_v2 = vadd.f32 %v7934_v23, %v3404_v55 }
 0x3fe   : > { %v3406_v3 = vpop.f32.mrf.mxu1 }
 0x3ff   : > { %v3526_v24 = vsel %vm1406_vm4, %v7943_v2, 0.0 }
 0x400   : > { %v3407_v61 = vpop.f32.mrf.mxu1  ;;  %v3527_v58 = vadd.f32 %v3526_v24, %v3525_v4 }
 0x401   : > { %v7948_v25 = vadd.f32 %v7934_v23, %v3407_v61 }
 0x402   : > { %v3409_v13 = vpop.f32.mrf.mxu1 }
 0x403   : > { %v3528_v0 = vsel %vm1406_vm4, %v7948_v25, 0.0 }
 0x404   : > { %v3412_v8 = vpop.f32.mrf.mxu1  ;;  %v3529_v12 = vadd.f32 %v3528_v0, %v3527_v58 }
 0x405   : > { %v7955_v7 = vadd.f32 %v7934_v23, %v3412_v8 }
 0x406   : > { %v3414_v40 = vpop.f32.mrf.mxu1 }
 0x407   : > { %v3530_v33 = vsel %vm1406_vm4, %v7955_v7, 0.0 }
 0x408   : > { %v3415_v5 = vpop.f32.mrf.mxu1  ;;  %v3531_v22 = vadd.f32 %v3530_v33, %v3529_v12 }
 0x409   : > { %v7960_v45 = vadd.f32 %v7934_v23, %v3415_v5 }
 0x40a   : > { %v3417_v39 = vpop.f32.mrf.mxu1 }
 0x40b   : > { %v3532_v20 = vsel %vm1406_vm4, %v7960_v45, 0.0 }
 0x40c   : > { %v3420_v31 = vpop.f32.mrf.mxu1  ;;  %v3533_v63 = vadd.f32 %v3532_v20, %v3531_v22 }
 0x40d   : > { %v7965_v18 = vadd.f32 %v7934_v23, %v3420_v31 }
 0x40e   : > { %v3422_v37 = vpop.f32.mrf.mxu1 }
 0x40f   : > { %v3534_v1 = vsel %vm1406_vm4, %v7965_v18, 0.0 }
 0x410   : > { %v3423_v9 = vpop.f32.mrf.mxu1  ;;  %v3535_v50 = vadd.f32 %v3534_v1, %v3533_v63 }
 0x411   : > { %v7970_v19 = vadd.f32 %v7934_v23, %v3423_v9 }
 0x412   : > { %v3425_v57 = vpop.f32.mrf.mxu1 }
 0x413   : > { %v3536_v15 = vsel %vm1406_vm4, %v7970_v19, 0.0 }
 0x414   : > { %v3428_v21 = vpop.f32.mrf.mxu1  ;;  %v3537_v61 = vadd.f32 %v3536_v15, %v3535_v50 }
 0x415   : > { %v7975_v38 = vadd.f32 %v7934_v23, %v3428_v21 }
 0x416   : > { %v3430_v28 = vpop.f32.mrf.mxu1 }
 0x417   : > { %v3538_v36 = vsel %vm1406_vm4, %v7975_v38, 0.0 }
 0x418   : > { %v3431_v27 = vpop.f32.mrf.mxu1  ;;  %v3539_v6 = vadd.f32 %v3538_v36, %v3537_v61 }
 0x419   : > { %v7980_v51 = vadd.f32 %v7934_v23, %v3431_v27 }
 0x41a   : > { %v3433_v29 = vpop.f32.mrf.mxu1 }
 0x41b   : > { %v3540_v13 = vsel %vm1406_vm4, %v7980_v51, 0.0 }
 0x41c   : > { %v3436_v53 = vpop.f32.mrf.mxu1  ;;  %v3541_v37 = vadd.f32 %v3540_v13, %v3539_v6 }
 0x41d   : > { %v7985_v55 = vadd.f32 %v7934_v23, %v3436_v53 }
 0x41e   : > { %v3438_v32 = vpop.f32.mrf.mxu1 }
 0x41f   : > { %v3542_v5 = vsel %vm1406_vm4, %v7985_v55, 0.0 }
 0x420   : > { %v3439_v56 = vpop.f32.mrf.mxu1  ;;  %v3543_v28 = vadd.f32 %v3542_v5, %v3541_v37 }
 0x421   : > { %v7990_v8 = vadd.f32 %v7934_v23, %v3439_v56 }
 0x422   : > { %v3441_v46 = vpop.f32.mrf.mxu1 }
 0x423   : > { %v3544_v9 = vsel %vm1406_vm4, %v7990_v8, 0.0 }
 0x424   : > { %v3444_v11 = vpop.f32.mrf.mxu1  ;;  %v3545_v32 = vadd.f32 %v3544_v9, %v3543_v28 }
 0x425   : > { %v7995_v39 = vadd.f32 %v7934_v23, %v3444_v11 }
 0x426   : > { %v3446_v47 = vpop.f32.mrf.mxu1 }
 0x427   : > { %v3546_v27 = vsel %vm1406_vm4, %v7995_v39, 0.0 }
 0x428   : > { %v3447_v59 = vpop.f32.mrf.mxu1  ;;  %v3547_v47 = vadd.f32 %v3546_v27, %v3545_v32 }
 0x429   : > { %v8000_v57 = vadd.f32 %v7934_v23, %v3447_v59 }
 0x42a   : > { %v3449_v14 = vpop.f32.mrf.mxu1 }
 0x42b   : > { %v3548_v56 = vsel %vm1406_vm4, %v8000_v57, 0.0 }
 0x42c   : > { %v3452_v16 = vpop.f32.mrf.mxu1 }
 0x42d   : > { %v8005_v29 = vadd.f32 %v7934_v23, %v3452_v16 }
 0x42e   : > { %v3454_v49 = vpop.f32.mrf.mxu1 }
 0x42f   : > { %v3550_v59 = vsel %vm1406_vm4, %v8005_v29, 0.0 }
 0x430   : > { %v3455_v17 = vpop.f32.mrf.mxu1 }
 0x431   : > { %v8010_v46 = vadd.f32 %v7934_v23, %v3455_v17 }
 0x432   : > { %v3457_v43 = vpop.f32.mrf.mxu1 }
 0x433   : > { %v3549_v43 = vadd.f32 %v3548_v56, %v3547_v47  ;;  %v3552_v16 = vsel %vm1406_vm4, %v8010_v46, 0.0 }
 0x434   : > { %v3460_v10 = vpop.f32.mrf.mxu1 }
 0x435   : > { %v8015_v14 = vadd.f32 %v7934_v23, %v3460_v10  ;;  %v3551_v41 = vadd.f32 %v3550_v59, %v3549_v43 }
 0x436   : > { %v3462_v34 = vpop.f32.mrf.mxu1 }
 0x437   : > { %v3554_v17 = vsel %vm1406_vm4, %v8015_v14, 0.0  ;;  %v3553_v4 = vadd.f32 %v3552_v16, %v3551_v41 }
 0x438   : > { %v3463_v60 = vpop.f32.mrf.mxu1 }
 0x439   : > { %v8020_v34 = vadd.f32 %v7934_v23, %v3463_v60  ;;  %v3555_v33 = vadd.f32 %v3554_v17, %v3553_v4 }
 0x43a   : > { %v3465_v42 = vpop.f32.mrf.mxu1 }
 0x43b   : > { %v3556_v10 = vsel %vm1406_vm4, %v8020_v34, 0.0 }
 0x43c   : > { %v3468_v35 = vpop.f32.mrf.mxu1  ;;  %v3557_v20 = vadd.f32 %v3556_v10, %v3555_v33 }
 0x43d   : > { %v8025_v24 = vadd.f32 %v7934_v23, %v3468_v35 }
 0x43e   : > { %v3470_v44 = vpop.f32.mrf.mxu1 }
 0x43f   : > { %v3558_v60 = vsel %vm1406_vm4, %v8025_v24, 0.0 }
 0x440   : > { %v3471_v62 = vpop.f32.mrf.mxu1 }
 0x441   : > { %v8030_v0 = vadd.f32 %v7934_v23, %v3471_v62 }
 0x442   : > { %v3473_v54 = vpop.f32.mrf.mxu1 }
 0x443   : > { %v3560_v35 = vsel %vm1406_vm4, %v8030_v0, 0.0  ;;  %v3559_v54 = vadd.f32 %v3558_v60, %v3557_v20 }
 0x444   : > { %v3476_v48 = vpop.f32.mrf.mxu1 }
 0x445   : > { %v8035_v44 = vadd.f32 %v7934_v23, %v3476_v48  ;;  %v3561_v50 = vadd.f32 %v3560_v35, %v3559_v54 }
 0x446   : > { %v3478_v3 = vpop.f32.mrf.mxu1 }
 0x447   : > { %v3562_v62 = vsel %vm1406_vm4, %v8035_v44, 0.0 }
 0x448   : > { %v3479_v40 = vpop.f32.mrf.mxu1  ;;  %v3563_v61 = vadd.f32 %v3562_v62, %v3561_v50 }
 0x449   : > { %v8040_v22 = vadd.f32 %v7934_v23, %v3479_v40 }
 0x44a   : > { %v3481_v31 = vpop.f32.mrf.mxu1 }
 0x44b   : > { %v3564_v48 = vsel %vm1406_vm4, %v8040_v22, 0.0 }
 0x44c   : > { %v3484_v21 = vpop.f32.mrf.mxu1  ;;  %v3565_v5 = vadd.f32 %v3564_v48, %v3563_v61 }
 0x44d   : > { %v8045_v63 = vadd.f32 %v7934_v23, %v3484_v21 }
 0x44e   : > { %v3486_v53 = vpop.f32.mrf.mxu1 }
 0x44f   : > { %v3566_v13 = vsel %vm1406_vm4, %v8045_v63, 0.0 }
 0x450   : > { %v3487_v11 = vpop.f32.mrf.mxu1  ;;  %v3567_v21 = vadd.f32 %v3566_v13, %v3565_v5 }
 0x451   : > { %v8050_v36 = vadd.f32 %v7934_v23, %v3487_v11 }
 0x452   : > { %v3489_v49 = vpop.f32.mrf.mxu1 }
 0x453   : > { %v3568_v31 = vsel %vm1406_vm4, %v8050_v36, 0.0 }
 0x454   : > { %v3492_v30 = vpop.f32.mrf.mxu1  ;;  %v3569_v32 = vadd.f32 %v3568_v31, %v3567_v21 }
 0x455   : > { %v8055_v40 = vadd.f32 %v7934_v23, %v3492_v30 }
 0x456   : > { %v3494_v42 = vpop.f32.mrf.mxu1 }
 0x457   : > { %v3570_v28 = vsel %vm1406_vm4, %v8055_v40, 0.0 }
 0x458   : > { %v3495_v58 = vpop.f32.mrf.mxu1  ;;  %v3571_v59 = vadd.f32 %v3570_v28, %v3569_v32 }
 0x459   : > { %v8060_v37 = vadd.f32 %v7934_v23, %v3495_v58 }
 0x45a   : > { %v3497_v12 = vpop.f32.mrf.mxu1 }
 0x45b   : > { %v3572_v56 = vsel %vm1406_vm4, %v8060_v37, 0.0 }
 0x45c   : > { %v3500_v1 = vpop.f32.mrf.mxu1  ;;  %v3573_v30 = vadd.f32 %v3572_v56, %v3571_v59 }
 0x45d   : > { %v8065_v27 = vadd.f32 %v7934_v23, %v3500_v1 }
 0x45e   : > { %v3502_v15 = vpop.f32.mrf.mxu1 }
 0x45f   : > { %v3574_v49 = vsel %vm1406_vm4, %v8065_v27, 0.0 }
 0x460   : > { %v3503_v3 = vpop.f32.mrf.mxu1  ;;  %v3575_v42 = vadd.f32 %v3574_v49, %v3573_v30 }
 0x461   : > { %v8070_v11 = vadd.f32 %v7934_v23, %v3503_v3 }
 0x462   : > { %v3505_v6 = vpop.f32.mrf.mxu1 }
 0x463   : > { %v3576_v41 = vsel %vm1406_vm4, %v8070_v11, 0.0 }
 0x464   : > { %v3508_v9 = vpop.f32.mrf.mxu1  ;;  %v3577_v10 = vadd.f32 %v3576_v41, %v3575_v42 }
 0x465   : > { %v8075_v43 = vadd.f32 %v7934_v23, %v3508_v9 }
 0x466   : > { %v3510_v53 = vpop.f32.mrf.mxu1 }
 0x467   : > { %v3578_v4 = vsel %vm1406_vm4, %v8075_v43, 0.0 }
 0x468   : > { %v3511_v47 = vpop.f32.mrf.mxu1  ;;  %v3579_v12 = vadd.f32 %v3578_v4, %v3577_v10  ;;  %v8570_v4 = vld [vmem:[#allocation2_spill] sm:$0xff] }
 0x469   : > { %v8080_v17 = vadd.f32 %v7934_v23, %v3511_v47  ;;  %v3672_v47 = vld [vmem:[%s8286_s8] sm:$0x1]  ;;  %v3759_v10 = vsub.s32 0, %v8570_v4  ;;  %v5133_v4 = vld [vmem:[%s5251_s18 + $0x70] sm:$0xff] }
 0x46a   : > { %v3513_v16 = vpop.f32.mrf.mxu1 }
 0x46b   : > { %v3580_v33 = vsel %vm1406_vm4, %v8080_v17, 0.0 }
 0x46c   : > { %v3581_v1 = vadd.f32 %v3580_v33, %v3579_v12 }
 0x46f   : > { %v3516_v58 = vpop.f32.mrf.mxu1 }
 0x470   : > { %v8087_v60 = vadd.f32 %v7934_v23, %v3516_v58 }
 0x471   : > { %v3518_v20 = vpop.f32.mrf.mxu1 }
 0x472   : > { %v3582_v35 = vsel %vm1406_vm4, %v8087_v60, 0.0 }
 0x473   : > { %v3519_v54 = vpop.f32.mrf.mxu1  ;;  %v3583_v15 = vadd.f32 %v3582_v35, %v3581_v1 }
 0x474   : > { %v8092_v62 = vadd.f32 %v7934_v23, %v3519_v54  ;;  %v3596_v23 = vld [vmem:[%s8284_s6] sm:$0x1] }
 0x475   : > { %v3521_v50 = vpop.f32.mrf.mxu1 }
 0x476   : > { %v3584_v48 = vsel %vm1406_vm4, %v8092_v62, 0.0 }
 0x477   : > { %v3585_v3 = vadd.f32 %v3584_v48, %v3583_v15 }
 0x479   : > { %v3586_v61 = vrot.slane %v3585_v3, 4 }
 0x47b   : > { %v3587_v13 = vadd.f32 %v3586_v61, %v3585_v3 }
 0x47d   : > { %v3588_v6 = vrot.slane %v3587_v13, 2 }
 0x47f   : > { %v3589_v5 = vadd.f32 %v3588_v6, %v3587_v13  ;;  %v5123_v13 = vld [vmem:[%s5251_s18 + $0x20] sm:$0xff]  ;;  %v5124_v6 = vld [vmem:[%s5251_s18 + $0x28] sm:$0xff] }
 0x481   : > { %v3590_v31 = vrot.slane %v3589_v5, 1 }
 0x483   : > { %v3591_v9 = vadd.f32 %v3590_v31, %v3589_v5  ;;  %v5125_v5 = vld [vmem:[%s5251_s18 + $0x30] sm:$0xff] }
 0x485   : > { %v3593_v21 = vmul.f32 0.00390625, %v3591_v9  ;;  %v5126_v9 = vld [vmem:[%s5251_s18 + $0x38] sm:$0xff] }
 0x487   : > { %3989 = vmatmul.mubr.msk.f32.vlgmr.msra.gmra.mxu0 %vm1406_vm4, %v3593_v21 }
 0x547   : > { %v3666_v28 = vpop.f32.mrf.mxu0 }
 0x548   : > { %v3667_v53 = vadd.f32 %v3666_v28, %v3596_v23  ;;  %v5127_v23 = vld [vmem:[%s5251_s18 + $0x40] sm:$0xff] }
 0x549   : > { %v3990_v32 = vpop.f32.mrf.mxu0 }
 0x54a   : > { %v3670_v56 = vmax.f32 %v3667_v53, 0.0  ;;  %v5128_v53 = vld [vmem:[%s5251_s18 + $0x48] sm:$0xff] }
 0x54c   : > { %3994 = vmatmul.mubr.msk.f32.vlgmr.msra.gmra.mxu1 %vm3673_vm13, %v3670_v56  ;;  %v5129_v56 = vld [vmem:[%s5251_s18 + $0x50] sm:$0xff] }
 0x60c   : > { %v3747_v59 = vpop.f32.mrf.mxu1 }
 0x60d   : > { %v3748_v49 = vadd.f32 %v3747_v59, %v3672_v47  ;;  %v5130_v59 = vld [vmem:[%s5251_s18 + $0x58] sm:$0xff] }
 0x60e   : > { %v3995_v16 = vpop.f32.mrf.mxu1 }
 0x60f   : > { %v3974_v30 = vmul.f32 -1.442695, %v3748_v49  ;;  %v5131_v16 = vld [vmem:[%s5251_s18 + $0x60] sm:$0xff] }
 0x611   : > { %5113 = vpow2.f32 %v3974_v30 }
 0x61e   : > { %v5114_v41 = vpop.eup %5113 }
 0x61f   : > { %v3754_v42 = vadd.f32 1.0, %v5114_v41  ;;  %v5132_v41 = vld [vmem:[%s5251_s18 + $0x68] sm:$0xff] }
 0x621   : > { %5115 = vrcp.f32 %v3754_v42 }
 0x62e   : > { %v5116_v58 = vpop.eup %5115 }
 0x62f   : > { %v3760_v33 = vrot.slane %v5116_v58, %v3759_v10  ;;  %v5134_v58 = vld [vmem:[%s5251_s18 + $0x78] sm:$0xff] }
 0x631   : > { %v3761_v12 = vmul.f32 %v3760_v33, %v7940_v52  ;;  %v3762_v20 = vmul.f32 %v3760_v33, %v7937_v26  ;;  %v3763_v35 = vmul.f32 %v3760_v33, %v7943_v2  ;;  %v3764_v1 = vmul.f32 %v3760_v33, %v7948_v25 }
 0x632   : > { %v3765_v54 = vmul.f32 %v3760_v33, %v7955_v7  ;;  %v3766_v15 = vmul.f32 %v3760_v33, %v7960_v45  ;;  %v3767_v50 = vmul.f32 %v3760_v33, %v7965_v18  ;;  %v3768_v48 = vmul.f32 %v3760_v33, %v7970_v19 }
 0x633   : > { %v3769_v3 = vmul.f32 %v3760_v33, %v7975_v38  ;;  %v3770_v61 = vmul.f32 %v3760_v33, %v7980_v51  ;;  %v3771_v52 = vmul.f32 %v3760_v33, %v7985_v55  ;;  %v3772_v26 = vmul.f32 %v3760_v33, %v7990_v8 }
 0x634   : > { %v3773_v2 = vmul.f32 %v3760_v33, %v7995_v39  ;;  %v3774_v25 = vmul.f32 %v3760_v33, %v8000_v57  ;;  %v3775_v7 = vmul.f32 %v3760_v33, %v8005_v29  ;;  %v3776_v45 = vmul.f32 %v3760_v33, %v8010_v46 }
 0x635   : > { %v3777_v18 = vmul.f32 %v3760_v33, %v8015_v14  ;;  %v3778_v19 = vmul.f32 %v3760_v33, %v8020_v34  ;;  %v3779_v38 = vmul.f32 %v3760_v33, %v8025_v24  ;;  %v3780_v51 = vmul.f32 %v3760_v33, %v8030_v0 }
 0x636   : > { %v8125_v55 = vmul.f32 %v3760_v33, %v8035_v44  ;;  %v8128_v8 = vmul.f32 %v3760_v33, %v8040_v22  ;;  %v8131_v39 = vmul.f32 %v3760_v33, %v8045_v63  ;;  %v8134_v57 = vmul.f32 %v3760_v33, %v8050_v36  ;;  %v5119_v63 = vld [vmem:[%s5251_s18] sm:$0xff] }
 0x637   : > { %v8137_v29 = vmul.f32 %v3760_v33, %v8055_v40  ;;  %v8140_v46 = vmul.f32 %v3760_v33, %v8060_v37  ;;  %v8143_v14 = vmul.f32 %v3760_v33, %v8065_v27  ;;  %v8146_v34 = vmul.f32 %v3760_v33, %v8070_v11  ;;  %v5120_v40 = vld [vmem:[%s5251_s18 + $0x8] sm:$0xff]  ;;  %v5121_v27 = vld [vmem:[%s5251_s18 + $0x10] sm:$0xff] }
 0x638   : > { %v8156_v24 = vmul.f32 %v3760_v33, %v8075_v43  ;;  %v8159_v0 = vmul.f32 %v3760_v33, %v8080_v17  ;;  %v8162_v44 = vmul.f32 %v3760_v33, %v8087_v60  ;;  %v8165_v22 = vmul.f32 %v3760_v33, %v8092_v62  ;;  %v5122_v43 = vld [vmem:[%s5251_s18 + $0x18] sm:$0xff] }
 0x639   : > { %v3793_v36 = vadd.f32 %v5119_v63, %v3761_v12  ;;  %v3794_v37 = vadd.f32 %v5120_v40, %v3762_v20  ;;  %v3795_v11 = vadd.f32 %v5121_v27, %v3763_v35  ;;  %v3796_v17 = vadd.f32 %v5122_v43, %v3764_v1  ;;  %v5135_v12 = vld [vmem:[%s5251_s18 + $0x80] sm:$0xff]  ;;  %v5136_v35 = vld [vmem:[%s5251_s18 + $0x88] sm:$0xff]  ;;  %v5149_v63 = vld [vmem:[%s5251_s18 + $0xf0] sm:$0xff] }
 0x63a   : > { %v3797_v60 = vadd.f32 %v5123_v13, %v3765_v54  ;;  %v3798_v62 = vadd.f32 %v5124_v6, %v3766_v15  ;;  %v3799_v31 = vadd.f32 %v5125_v5, %v3767_v50  ;;  %v3800_v21 = vadd.f32 %v5126_v9, %v3768_v48  ;;  %v5137_v54 = vld [vmem:[%s5251_s18 + $0x90] sm:$0xff]  ;;  %v5138_v50 = vld [vmem:[%s5251_s18 + $0x98] sm:$0xff] }
 0x63b   : > { %v3801_v28 = vadd.f32 %v5127_v23, %v3769_v3  ;;  %v3802_v32 = vadd.f32 %v5128_v53, %v3770_v61  ;;  %v3803_v47 = vadd.f32 %v5129_v56, %v3771_v52  ;;  %v3804_v49 = vadd.f32 %v5130_v59, %v3772_v26  ;;  %3825 = vst.msk [vmem:[%s8153_s25] sm:$0xff] %vm1406_vm4, %v3793_v36  ;;  %v5139_v3 = vld [vmem:[%s5251_s18 + $0xa0] sm:$0xff]  ;;  %v5140_v52 = vld [vmem:[%s5251_s18 + $0xa8] sm:$0xff]  ;;  %v5150_v40 = vld [vmem:[%s5251_s18 + $0xf8] sm:$0xff] }
 0x63c   : > { %3826 = vst.msk [vmem:[%s8153_s25 + $0x8] sm:$0xff] %vm1406_vm4, %v3794_v37  ;;  %3827 = vst.msk [vmem:[%s8153_s25 + $0x10] sm:$0xff] %vm1406_vm4, %v3795_v11  ;;  %v3805_v30 = vadd.f32 %v5131_v16, %v3773_v2  ;;  %v3806_v42 = vadd.f32 %v5132_v41, %v3774_v25  ;;  %v3807_v10 = vadd.f32 %v5133_v4, %v3775_v7  ;;  %v5141_v2 = vld [vmem:[%s5251_s18 + $0xb0] sm:$0xff]  ;;  %v5142_v7 = vld [vmem:[%s5251_s18 + $0xb8] sm:$0xff] }
 0x63d   : > { %3828 = vst.msk [vmem:[%s8153_s25 + $0x18] sm:$0xff] %vm1406_vm4, %v3796_v17  ;;  %v3808_v33 = vadd.f32 %v5134_v58, %v3776_v45  ;;  %3829 = vst.msk [vmem:[%s8153_s25 + $0x20] sm:$0xff] %vm1406_vm4, %v3797_v60  ;;  %v3809_v20 = vadd.f32 %v5135_v12, %v3777_v18  ;;  %v3810_v1 = vadd.f32 %v5136_v35, %v3778_v19  ;;  %v5143_v18 = vld [vmem:[%s5251_s18 + $0xc0] sm:$0xff] }
 0x63e   : > { %3830 = vst.msk [vmem:[%s8153_s25 + $0x28] sm:$0xff] %vm1406_vm4, %v3798_v62  ;;  %3831 = vst.msk [vmem:[%s8153_s25 + $0x30] sm:$0xff] %vm1406_vm4, %v3799_v31  ;;  %v3811_v15 = vadd.f32 %v5137_v54, %v3779_v38  ;;  %v3812_v48 = vadd.f32 %v5138_v50, %v3780_v51  ;;  %v3813_v61 = vadd.f32 %v5139_v3, %v8125_v55  ;;  %v5144_v38 = vld [vmem:[%s5251_s18 + $0xc8] sm:$0xff]  ;;  %v5145_v55 = vld [vmem:[%s5251_s18 + $0xd0] sm:$0xff] }
 0x63f   : > { %3832 = vst.msk [vmem:[%s8153_s25 + $0x38] sm:$0xff] %vm1406_vm4, %v3800_v21  ;;  %3833 = vst.msk [vmem:[%s8153_s25 + $0x40] sm:$0xff] %vm1406_vm4, %v3801_v28  ;;  %v3814_v26 = vadd.f32 %v5140_v52, %v8128_v8  ;;  %v3815_v25 = vadd.f32 %v5141_v2, %v8131_v39  ;;  %v3816_v45 = vadd.f32 %v5142_v7, %v8134_v57  ;;  %v5146_v39 = vld [vmem:[%s5251_s18 + $0xd8] sm:$0xff] }
 0x640   : > { %3834 = vst.msk [vmem:[%s8153_s25 + $0x48] sm:$0xff] %vm1406_vm4, %v3802_v32  ;;  %3835 = vst.msk [vmem:[%s8153_s25 + $0x50] sm:$0xff] %vm1406_vm4, %v3803_v47  ;;  %v3817_v19 = vadd.f32 %v5143_v18, %v8137_v29  ;;  %v3818_v51 = vadd.f32 %v5144_v38, %v8140_v46  ;;  %v3819_v8 = vadd.f32 %v5145_v55, %v8143_v14  ;;  %v5147_v29 = vld [vmem:[%s5251_s18 + $0xe0] sm:$0xff]  ;;  %v5148_v14 = vld [vmem:[%s5251_s18 + $0xe8] sm:$0xff] }
 0x641   : > { %3836 = vst.msk [vmem:[%s8153_s25 + $0x58] sm:$0xff] %vm1406_vm4, %v3804_v49  ;;  %3837 = vst.msk [vmem:[%s8153_s25 + $0x60] sm:$0xff] %vm1406_vm4, %v3805_v30  ;;  %v3820_v57 = vadd.f32 %v5146_v39, %v8146_v34  ;;  %v3821_v46 = vadd.f32 %v5147_v29, %v8156_v24  ;;  %v3822_v34 = vadd.f32 %v5148_v14, %v8159_v0 }
 0x642   : > { %3838 = vst.msk [vmem:[%s8153_s25 + $0x68] sm:$0xff] %vm1406_vm4, %v3806_v42  ;;  %3839 = vst.msk [vmem:[%s8153_s25 + $0x70] sm:$0xff] %vm1406_vm4, %v3807_v10  ;;  %v3823_v36 = vadd.f32 %v5149_v63, %v8162_v44  ;;  %v3824_v37 = vadd.f32 %v5150_v40, %v8165_v22 }
 0x643   : > { %3840 = vst.msk [vmem:[%s8153_s25 + $0x78] sm:$0xff] %vm1406_vm4, %v3808_v33  ;;  %3841 = vst.msk [vmem:[%s8153_s25 + $0x80] sm:$0xff] %vm1406_vm4, %v3809_v20 }
 0x644   : > { %3842 = vst.msk [vmem:[%s8153_s25 + $0x88] sm:$0xff] %vm1406_vm4, %v3810_v1  ;;  %3843 = vst.msk [vmem:[%s8153_s25 + $0x90] sm:$0xff] %vm1406_vm4, %v3811_v15 }
 0x645   : > { %3844 = vst.msk [vmem:[%s8153_s25 + $0x98] sm:$0xff] %vm1406_vm4, %v3812_v48  ;;  %3845 = vst.msk [vmem:[%s8153_s25 + $0xa0] sm:$0xff] %vm1406_vm4, %v3813_v61 }
 0x646   : > { %3846 = vst.msk [vmem:[%s8153_s25 + $0xa8] sm:$0xff] %vm1406_vm4, %v3814_v26  ;;  %3847 = vst.msk [vmem:[%s8153_s25 + $0xb0] sm:$0xff] %vm1406_vm4, %v3815_v25 }
 0x647   : > { %3848 = vst.msk [vmem:[%s8153_s25 + $0xb8] sm:$0xff] %vm1406_vm4, %v3816_v45  ;;  %3849 = vst.msk [vmem:[%s8153_s25 + $0xc0] sm:$0xff] %vm1406_vm4, %v3817_v19 }
 0x648   : > { %3850 = vst.msk [vmem:[%s8153_s25 + $0xc8] sm:$0xff] %vm1406_vm4, %v3818_v51  ;;  %3851 = vst.msk [vmem:[%s8153_s25 + $0xd0] sm:$0xff] %vm1406_vm4, %v3819_v8 }
 0x649   : > { %3852 = vst.msk [vmem:[%s8153_s25 + $0xd8] sm:$0xff] %vm1406_vm4, %v3820_v57  ;;  %3853 = vst.msk [vmem:[%s8153_s25 + $0xe0] sm:$0xff] %vm1406_vm4, %v3821_v46 }
 0x64a   : > { %3854 = vst.msk [vmem:[%s8153_s25 + $0xe8] sm:$0xff] %vm1406_vm4, %v3822_v34  ;;  %3855 = vst.msk [vmem:[%s8153_s25 + $0xf0] sm:$0xff] %vm1406_vm4, %v3823_v36 }
 0x64b   : > { %3856 = vst.msk [vmem:[%s8153_s25 + $0xf8] sm:$0xff] %vm1406_vm4, %v3824_v37 }
 0x64c PF: > { %s19_s30 = sadd.s32 1, %s5157_s30  }
 0x64d   : > { %p16_p4 = scmp.ge.s32.totalorder %s19_s30, 4  }
 0x64f   :  { %18 = sbr.rel (!%p16_p4) target bundleno = 1 (0x1), region = 86 }

</bundles_post_ra>
